<compile_context>
chip_gen: v7x
topology: tpu7x:2x2x1
jax: 0.10.0
libtpu: 0.0.40
codegen_flags: <defaults>
</compile_context>

<pallas_src>
import functools

import jax
import jax.numpy as jnp
from jax import lax
from jax.experimental import pallas as pl
from jax.experimental.pallas import tpu as pltpu

EPS = 1e-5


# ----------------------------------------------------------------------------
# Helpers
# ----------------------------------------------------------------------------
def _fold_bn(bn):
    gamma, beta, mean, var = bn
    scale = gamma / jnp.sqrt(var + EPS)
    bias = beta - mean * scale
    return scale, bias


def _pick_tr(H, W, n_images):
    """Output-row tile height.

    Must divide H; prefer the largest tile whose (n, row-tile) grid still has
    >= 4 steps (so both v7x TensorCores get a pipelined stream) while keeping the
    per-tile matmul M = TR*W bounded.  Falls back to the whole image.
    """
    best = H
    for tr in range(1, H):
        if H % tr:
            continue
        if (tr * W) % 8:          # output block sublane constraint
            continue
        if tr * W > 1024:         # bound per-tile f32 intermediates
            continue
        if n_images * (H // tr) >= 4:
            best = tr
    return best


# ----------------------------------------------------------------------------
# Fused Bottleneck kernel
# ----------------------------------------------------------------------------
def _bottleneck_kernel(x_ref, w1_ref, b1_ref, w2_ref, b2_ref, w3_ref, b3_ref,
                       *rest, TR, W, H, has_ds):
    """One (image n, row-tile r) step of the fused Bottleneck.

    x_ref : (H*W, Cin) bf16      -- full image, resident across the r axis
    w1_ref: (Cin, width) bf16    -- BN-folded 1x1
    w2_ref: (9, width, width) bf16 -- BN-folded 3x3 taps, (di*3+dj) major
    w3_ref: (width, Cout) bf16   -- BN-folded 1x1
    wd_ref: (Cin, Cout) bf16     -- BN-folded 1x1 downsample (optional)
    b*_ref: (1, C) f32
    o_ref : (TR*W, Cout) bf16
    y1p   : VMEM (TR+2, W+2, width) bf16 -- zero-padded conv1 tile
    """
    if has_ds:
        wd_ref, bd_ref, o_ref, y1p_ref = rest
    else:
        o_ref, y1p_ref = rest

    r = pl.program_id(1)
    R = H // TR
    width = w1_ref.shape[1]
    row0 = r * TR                               # first output row of this tile

    def conv1(a):                               # a: (m, Cin) bf16 -> (m, width) f32
        z = jnp.dot(a, w1_ref[...], preferred_element_type=jnp.float32)
        return jnp.maximum(z + b1_ref[...], 0.0)

    # ---- conv1 (1x1) + BN + ReLU on the rows this tile needs (centre + halos).
    xa = x_ref[pl.ds(pl.multiple_of(row0 * W, TR * W), TR * W), :]   # (TR*W, Cin)
    y_c = conv1(xa).astype(jnp.bfloat16)                              # (TR*W, width)

    top = jnp.maximum(row0 - 1, 0)                                    # clamped, no OOB
    y_t = conv1(x_ref[pl.ds(pl.multiple_of(top * W, W), W), :])
    y_t = (y_t * jnp.where(r > 0, 1.0, 0.0)).astype(jnp.bfloat16)     # (W, width)

    bot = jnp.minimum(row0 + TR, H - 1)
    y_b = conv1(x_ref[pl.ds(pl.multiple_of(bot * W, W), W), :])
    y_b = (y_b * jnp.where(r < R - 1, 1.0, 0.0)).astype(jnp.bfloat16)  # (W, width)

    # ---- build the zero-padded conv1 tile in VMEM (every element rewritten).
    zcol = jnp.zeros((TR + 2, 1, width), jnp.bfloat16)
    y1p_ref[:, 0:1, :] = zcol
    y1p_ref[:, W + 1:W + 2, :] = zcol
    y1p_ref[0:1, 1:W + 1, :] = y_t.reshape(1, W, width)
    y1p_ref[TR + 1:TR + 2, 1:W + 1, :] = y_b.reshape(1, W, width)
    y1p_ref[1:TR + 1, 1:W + 1, :] = y_c.reshape(TR, W, width)

    # ---- conv2 (3x3, pad 1) + BN + ReLU: 9 taps, f32 register accumulator.
    acc = None
    for di in range(3):
        for dj in range(3):
            win = y1p_ref[di:di + TR, dj:dj + W, :].reshape(TR * W, width)
            part = jnp.dot(win, w2_ref[di * 3 + dj],
                           preferred_element_type=jnp.float32)
            acc = part if acc is None else acc + part
    y2 = jnp.maximum(acc + b2_ref[...], 0.0).astype(jnp.bfloat16)     # (TR*W, width)

    # ---- conv3 (1x1) + BN, residual add (optionally downsampled) + final ReLU.
    out = jnp.dot(y2, w3_ref[...], preferred_element_type=jnp.float32) + b3_ref[...]
    if has_ds:
        ident = jnp.dot(xa, wd_ref[...],
                        preferred_element_type=jnp.float32) + bd_ref[...]
    else:
        ident = xa.astype(jnp.float32)          # requires Cin == Cout (as in PyTorch)
    o_ref[...] = jnp.maximum(out + ident, 0.0).astype(o_ref.dtype)


# ----------------------------------------------------------------------------
# Bottleneck block forward
# ----------------------------------------------------------------------------
def bottleneck_forward(params, x_nchw):
    """Bottleneck.forward (dims=2, groups=1, dilation=1, activation=ReLU)."""
    stride = params["stride"]
    x = jnp.transpose(x_nchw.astype(jnp.bfloat16), (0, 2, 3, 1))   # NCHW -> NHWC bf16
    N, H, W, Cin = x.shape

    w1, bn1 = params["conv1"]
    w2, bn2 = params["conv2"]
    w3, bn3 = params["conv3"]
    width = w1.shape[0]
    Cout = w3.shape[0]

    # Fold BN scale into bf16 weights; keep biases in f32.
    s1, b1 = _fold_bn(bn1)
    s2, b2 = _fold_bn(bn2)
    s3, b3 = _fold_bn(bn3)
    w1m = (w1.reshape(width, Cin).T * s1[None, :]).astype(jnp.bfloat16)     # (Cin, width)
    w2m = (jnp.transpose(w2, (2, 3, 1, 0)) * s2[None, None, None, :])
    w2m = w2m.reshape(9, width, width).astype(jnp.bfloat16)                 # (9, I, O)
    w3m = (w3.reshape(Cout, width).T * s3[None, :]).astype(jnp.bfloat16)    # (width, Cout)

    has_ds = params["downsample"] is not None

    args = [x.reshape(N, H * W, Cin),
            w1m, b1.reshape(1, -1).astype(jnp.float32),
            w2m, b2.reshape(1, -1).astype(jnp.float32),
            w3m, b3.reshape(1, -1).astype(jnp.float32)]
    in_specs = [
        pl.BlockSpec((None, H * W, Cin), lambda n, r: (n, 0, 0)),   # full image / n
        pl.BlockSpec((Cin, width), lambda n, r: (0, 0)),
        pl.BlockSpec((1, width), lambda n, r: (0, 0)),
        pl.BlockSpec((9, width, width), lambda n, r: (0, 0, 0)),
        pl.BlockSpec((1, width), lambda n, r: (0, 0)),
        pl.BlockSpec((width, Cout), lambda n, r: (0, 0)),
        pl.BlockSpec((1, Cout), lambda n, r: (0, 0)),
    ]
    if has_ds:
        wd, bnd = params["downsample"]
        sd, bd = _fold_bn(bnd)
        wdm = (wd.reshape(Cout, Cin).T * sd[None, :]).astype(jnp.bfloat16)  # (Cin, Cout)
        args += [wdm, bd.reshape(1, -1).astype(jnp.float32)]
        in_specs += [pl.BlockSpec((Cin, Cout), lambda n, r: (0, 0)),
                     pl.BlockSpec((1, Cout), lambda n, r: (0, 0))]

    TR = _pick_tr(H, W, N)
    R = H // TR

    out = pl.pallas_call(
        functools.partial(_bottleneck_kernel, TR=TR, W=W, H=H, has_ds=has_ds),
        out_shape=jax.ShapeDtypeStruct((N, H * W, Cout), jnp.bfloat16),
        grid=(N, R),                               # r innermost: x resident per n
        in_specs=in_specs,
        out_specs=pl.BlockSpec((None, TR * W, Cout), lambda n, r: (n, r, 0)),
        scratch_shapes=[pltpu.VMEM((TR + 2, W + 2, width), jnp.bfloat16)],
        compiler_params=pltpu.CompilerParams(
            dimension_semantics=("parallel", "arbitrary")),
    )(*args)

    out = out.reshape(N, H, W, Cout)
    if stride > 1:
        # TODO(synk): stride>1 is exact via subsampling (every strided op here is a
        # 1x1 conv or a pad-1 3x3, so stride-s == stride-1 followed by ::s), but it
        # does stride^2 x the needed conv2/conv3 work; a natively strided tap index
        # inside the kernel would avoid that.
        out = out[:, ::stride, ::stride, :]
    return jnp.transpose(out, (0, 3, 1, 2))        # NHWC -> NCHW, bf16


# ----------------------------------------------------------------------------
# Parameter construction (PyTorch-shaped weights, randomized BN stats)
# ----------------------------------------------------------------------------
def _kaiming_conv(key, cout, cin, kh, kw):
    fan_out = cout * kh * kw
    std = (2.0 / fan_out) ** 0.5
    return jax.random.normal(key, (cout, cin, kh, kw), jnp.float32) * std


def _bn_params(key, c):
    kg, kb, km, kv = jax.random.split(key, 4)
    gamma = jax.random.uniform(kg, (c,), jnp.float32, 0.5, 1.5)
    beta = 0.1 * jax.random.normal(kb, (c,), jnp.float32)
    mean = 0.1 * jax.random.normal(km, (c,), jnp.float32)
    var = jax.random.uniform(kv, (c,), jnp.float32, 0.5, 1.5)
    return gamma, beta, mean, var


def init_bottleneck(key, inplanes, planes, *, stride=1, base_width=64, groups=1,
                    expansion=4):
    width = int(planes * (base_width / 64.0)) * groups
    ks = jax.random.split(key, 8)
    params = {
        "conv1": (_kaiming_conv(ks[0], width, inplanes, 1, 1), _bn_params(ks[1], width)),
        "conv2": (_kaiming_conv(ks[2], width, width, 3, 3), _bn_params(ks[3], width)),
        "conv3": (_kaiming_conv(ks[4], planes * expansion, width, 1, 1),
                  _bn_params(ks[5], planes * expansion)),
        "stride": stride,
    }
    if stride != 1 or inplanes != planes * expansion:
        params["downsample"] = (_kaiming_conv(ks[6], planes * expansion, inplanes, 1, 1),
                                _bn_params(ks[7], planes * expansion))
    else:
        params["downsample"] = None
    return params


# ----------------------------------------------------------------------------
# Plain-JAX reference (same bf16 rounding points as the kernel path)
# ----------------------------------------------------------------------------
def bottleneck_ref(params, x_nchw):
    stride = params["stride"]
    x = jnp.transpose(x_nchw.astype(jnp.bfloat16), (0, 2, 3, 1))

    def cbn(inp, w, bn, s, pad, relu):
        scale, bias = _fold_bn(bn)
        wf = (w * scale[:, None, None, None]).astype(jnp.bfloat16).astype(jnp.float32)
        y = lax.conv_general_dilated(
            inp.astype(jnp.float32), jnp.transpose(wf, (2, 3, 1, 0)),
            window_strides=(s, s), padding=[(pad, pad), (pad, pad)],
            dimension_numbers=("NHWC", "HWIO", "NHWC"))
        y = y + bias.reshape(1, 1, 1, -1)
        return jnp.maximum(y, 0.0) if relu else y

    w1, bn1 = params["conv1"]
    w2, bn2 = params["conv2"]
    w3, bn3 = params["conv3"]
    y = cbn(x, w1, bn1, 1, 0, True).astype(jnp.bfloat16)
    y = cbn(y, w2, bn2, stride, 1, True).astype(jnp.bfloat16)
    y = cbn(y, w3, bn3, 1, 0, False)
    if params["downsample"] is not None:
        wd, bnd = params["downsample"]
        ident = cbn(x, wd, bnd, stride, 0, False)
    else:
        ident = x.astype(jnp.float32)
    out = jnp.maximum(y + ident, 0.0)
    return jnp.transpose(out, (0, 3, 1, 2))


# ----------------------------------------------------------------------------
if __name__ == "__main__":
    key = jax.random.PRNGKey(0)
    kx, kp = jax.random.split(key)

    # Bottleneck(dims=2, inplanes=256, planes=128): width=128, out=512,
    # downsample = 1x1 conv + BN.  Lane-dense (multiple-of-128) channels.
    N, Cin, H, W = 2, 256, 16, 16
    planes = 128
    x = jax.random.normal(kx, (N, Cin, H, W), jnp.float32)
    params = init_bottleneck(kp, inplanes=Cin, planes=planes, stride=1)

    fwd = jax.jit(lambda inp: bottleneck_forward(params, inp))
    out = jax.block_until_ready(fwd(x))
    assert out.shape == (N, planes * 4, H, W), out.shape

    ref = jax.block_until_ready(bottleneck_ref(params, x))
    err = float(jnp.max(jnp.abs(out.astype(jnp.float32) - ref)))
    mag = float(jnp.max(jnp.abs(ref))) + 1e-6
    assert err <= 2e-2 * mag + 3e-2, (err, mag)

    print("KERNEL_OK")
</pallas_src>

<mosaic_0001>
module attributes {stable_mosaic.version = 11 : i64} {
  func.func @_bottleneck_kernel(%arg0: i32, %arg1: i32, %arg2: memref<1x256x256xbf16, #tpu.memory_space<vmem>>, %arg3: memref<256x128xbf16, #tpu.memory_space<vmem>>, %arg4: memref<1x128xf32, #tpu.memory_space<vmem>>, %arg5: memref<9x128x128xbf16, #tpu.memory_space<vmem>>, %arg6: memref<1x128xf32, #tpu.memory_space<vmem>>, %arg7: memref<128x512xbf16, #tpu.memory_space<vmem>>, %arg8: memref<1x512xf32, #tpu.memory_space<vmem>>, %arg9: memref<256x512xbf16, #tpu.memory_space<vmem>>, %arg10: memref<1x512xf32, #tpu.memory_space<vmem>>, %arg11: memref<1x128x512xbf16, #tpu.memory_space<vmem>>, %arg12: memref<10x18x128xbf16, #tpu.memory_space<vmem>>) attributes {dimension_semantics = [#tpu.dimension_semantics<parallel>, #tpu.dimension_semantics<arbitrary>], iteration_bounds = array<i64: 2, 2>, scalar_prefetch = 0 : i64, scratch_operands = 1 : i64, tpu.core_type = #tpu.core_type<tc>, window_params = [{transform_indices = @transform_0, window_bounds = array<i64: 1, 256, 256>}, {pipeline_mode = #tpu.pipeline_mode<synchronous>, transform_indices = @transform_1, window_bounds = array<i64: 256, 128>}, {pipeline_mode = #tpu.pipeline_mode<synchronous>, transform_indices = @transform_2, window_bounds = array<i64: 1, 128>}, {pipeline_mode = #tpu.pipeline_mode<synchronous>, transform_indices = @transform_3, window_bounds = array<i64: 9, 128, 128>}, {pipeline_mode = #tpu.pipeline_mode<synchronous>, transform_indices = @transform_4, window_bounds = array<i64: 1, 128>}, {pipeline_mode = #tpu.pipeline_mode<synchronous>, transform_indices = @transform_5, window_bounds = array<i64: 128, 512>}, {pipeline_mode = #tpu.pipeline_mode<synchronous>, transform_indices = @transform_6, window_bounds = array<i64: 1, 512>}, {pipeline_mode = #tpu.pipeline_mode<synchronous>, transform_indices = @transform_7, window_bounds = array<i64: 256, 512>}, {pipeline_mode = #tpu.pipeline_mode<synchronous>, transform_indices = @transform_8, window_bounds = array<i64: 1, 512>}, {transform_indices = @transform_9, window_bounds = array<i64: 1, 128, 512>}]} {
    %c8_i32 = arith.constant 8 : i32
    %0 = arith.muli %arg1, %c8_i32 : i32
    %c16_i32 = arith.constant 16 : i32
    %1 = arith.muli %0, %c16_i32 : i32
    %2 = tpu.assume_multiple %1, 128 : i32
    %c0 = arith.constant 0 : index
    %3 = arith.index_cast %2 : i32 to index
    %c0_0 = arith.constant 0 : index
    %4 = vector.load %arg2[%c0, %3, %c0_0] : memref<1x256x256xbf16, #tpu.memory_space<vmem>>, vector<1x128x256xbf16>
    %5 = vector.shape_cast %4 : vector<1x128x256xbf16> to vector<128x256xbf16>
    %c0_1 = arith.constant 0 : index
    %c0_2 = arith.constant 0 : index
    %6 = vector.load %arg3[%c0_1, %c0_2] : memref<256x128xbf16, #tpu.memory_space<vmem>>, vector<256x128xbf16>
    %cst = arith.constant dense<0.000000e+00> : vector<128x128xf32>
    %7 = tpu.matmul %5, %6, %cst {dimension_numbers = #tpu.dot_dimension_numbers<[1], [0], [0], [1], [0, 0, 1, 1], [], []>} : vector<128x256xbf16>, vector<256x128xbf16>, vector<128x128xf32> -> vector<128x128xf32>
    %c0_3 = arith.constant 0 : index
    %c0_4 = arith.constant 0 : index
    %8 = vector.load %arg4[%c0_3, %c0_4] : memref<1x128xf32, #tpu.memory_space<vmem>>, vector<1x128xf32>
    %9 = vector.broadcast %8 : vector<1x128xf32> to vector<128x128xf32>
    %10 = arith.addf %7, %9 : vector<128x128xf32>
    %cst_5 = arith.constant 0.000000e+00 : f32
    %11 = vector.broadcast %cst_5 : f32 to vector<128x128xf32>
    %12 = arith.maximumf %10, %11 : vector<128x128xf32>
    %13 = arith.truncf %12 : vector<128x128xf32> to vector<128x128xbf16>
    %c1_i32 = arith.constant 1 : i32
    %14 = arith.subi %0, %c1_i32 : i32
    %c0_i32 = arith.constant 0 : i32
    %15 = arith.maxsi %14, %c0_i32 : i32
    %c16_i32_6 = arith.constant 16 : i32
    %16 = arith.muli %15, %c16_i32_6 : i32
    %17 = tpu.assume_multiple %16, 16 : i32
    %c0_7 = arith.constant 0 : index
    %18 = arith.index_cast %17 : i32 to index
    %c0_8 = arith.constant 0 : index
    %19 = vector.load %arg2[%c0_7, %18, %c0_8] : memref<1x256x256xbf16, #tpu.memory_space<vmem>>, vector<1x16x256xbf16>
    %20 = vector.shape_cast %19 : vector<1x16x256xbf16> to vector<16x256xbf16>
    %c0_9 = arith.constant 0 : index
    %c0_10 = arith.constant 0 : index
    %21 = vector.load %arg3[%c0_9, %c0_10] : memref<256x128xbf16, #tpu.memory_space<vmem>>, vector<256x128xbf16>
    %cst_11 = arith.constant dense<0.000000e+00> : vector<16x128xf32>
    %22 = tpu.matmul %20, %21, %cst_11 {dimension_numbers = #tpu.dot_dimension_numbers<[1], [0], [0], [1], [0, 0, 1, 1], [], []>} : vector<16x256xbf16>, vector<256x128xbf16>, vector<16x128xf32> -> vector<16x128xf32>
    %c0_12 = arith.constant 0 : index
    %c0_13 = arith.constant 0 : index
    %23 = vector.load %arg4[%c0_12, %c0_13] : memref<1x128xf32, #tpu.memory_space<vmem>>, vector<1x128xf32>
    %24 = vector.broadcast %23 : vector<1x128xf32> to vector<16x128xf32>
    %25 = arith.addf %22, %24 : vector<16x128xf32>
    %cst_14 = arith.constant 0.000000e+00 : f32
    %26 = vector.broadcast %cst_14 : f32 to vector<16x128xf32>
    %27 = arith.maximumf %25, %26 : vector<16x128xf32>
    %c0_i32_15 = arith.constant 0 : i32
    %28 = arith.cmpi sgt, %arg1, %c0_i32_15 : i32
    %cst_16 = arith.constant 1.000000e+00 : f32
    %cst_17 = arith.constant 0.000000e+00 : f32
    %29 = arith.select %28, %cst_16, %cst_17 : f32
    %30 = vector.broadcast %29 : f32 to vector<16x128xf32>
    %31 = arith.mulf %27, %30 : vector<16x128xf32>
    %32 = arith.truncf %31 : vector<16x128xf32> to vector<16x128xbf16>
    %c8_i32_18 = arith.constant 8 : i32
    %33 = arith.addi %0, %c8_i32_18 : i32
    %c15_i32 = arith.constant 15 : i32
    %34 = arith.minsi %33, %c15_i32 : i32
    %c16_i32_19 = arith.constant 16 : i32
    %35 = arith.muli %34, %c16_i32_19 : i32
    %36 = tpu.assume_multiple %35, 16 : i32
    %c0_20 = arith.constant 0 : index
    %37 = arith.index_cast %36 : i32 to index
    %c0_21 = arith.constant 0 : index
    %38 = vector.load %arg2[%c0_20, %37, %c0_21] : memref<1x256x256xbf16, #tpu.memory_space<vmem>>, vector<1x16x256xbf16>
    %39 = vector.shape_cast %38 : vector<1x16x256xbf16> to vector<16x256xbf16>
    %c0_22 = arith.constant 0 : index
    %c0_23 = arith.constant 0 : index
    %40 = vector.load %arg3[%c0_22, %c0_23] : memref<256x128xbf16, #tpu.memory_space<vmem>>, vector<256x128xbf16>
    %cst_24 = arith.constant dense<0.000000e+00> : vector<16x128xf32>
    %41 = tpu.matmul %39, %40, %cst_24 {dimension_numbers = #tpu.dot_dimension_numbers<[1], [0], [0], [1], [0, 0, 1, 1], [], []>} : vector<16x256xbf16>, vector<256x128xbf16>, vector<16x128xf32> -> vector<16x128xf32>
    %c0_25 = arith.constant 0 : index
    %c0_26 = arith.constant 0 : index
    %42 = vector.load %arg4[%c0_25, %c0_26] : memref<1x128xf32, #tpu.memory_space<vmem>>, vector<1x128xf32>
    %43 = vector.broadcast %42 : vector<1x128xf32> to vector<16x128xf32>
    %44 = arith.addf %41, %43 : vector<16x128xf32>
    %cst_27 = arith.constant 0.000000e+00 : f32
    %45 = vector.broadcast %cst_27 : f32 to vector<16x128xf32>
    %46 = arith.maximumf %44, %45 : vector<16x128xf32>
    %c1_i32_28 = arith.constant 1 : i32
    %47 = arith.cmpi slt, %arg1, %c1_i32_28 : i32
    %cst_29 = arith.constant 1.000000e+00 : f32
    %cst_30 = arith.constant 0.000000e+00 : f32
    %48 = arith.select %47, %cst_29, %cst_30 : f32
    %49 = vector.broadcast %48 : f32 to vector<16x128xf32>
    %50 = arith.mulf %46, %49 : vector<16x128xf32>
    %51 = arith.truncf %50 : vector<16x128xf32> to vector<16x128xbf16>
    %cst_31 = arith.constant 0.000000e+00 : bf16
    %52 = vector.broadcast %cst_31 : bf16 to vector<10x1x128xbf16>
    %c0_32 = arith.constant 0 : index
    %c0_33 = arith.constant 0 : index
    %c0_34 = arith.constant 0 : index
    %53 = vector.load %arg12[%c0_32, %c0_33, %c0_34] : memref<10x18x128xbf16, #tpu.memory_space<vmem>>, vector<10x1x128xbf16>
    tpu.vector_store %arg12[%c0_32, %c0_33, %c0_34], %52 {strides = array<i32>} : memref<10x18x128xbf16, #tpu.memory_space<vmem>>, vector<10x1x128xbf16>,
    %c0_35 = arith.constant 0 : index
    %c17 = arith.constant 17 : index
    %c0_36 = arith.constant 0 : index
    %54 = vector.load %arg12[%c0_35, %c17, %c0_36] : memref<10x18x128xbf16, #tpu.memory_space<vmem>>, vector<10x1x128xbf16>
    tpu.vector_store %arg12[%c0_35, %c17, %c0_36], %52 {strides = array<i32>} : memref<10x18x128xbf16, #tpu.memory_space<vmem>>, vector<10x1x128xbf16>,
    %55 = vector.shape_cast %32 : vector<16x128xbf16> to vector<1x16x128xbf16>
    %c0_37 = arith.constant 0 : index
    %c1 = arith.constant 1 : index
    %c0_38 = arith.constant 0 : index
    %56 = vector.load %arg12[%c0_37, %c1, %c0_38] : memref<10x18x128xbf16, #tpu.memory_space<vmem>>, vector<1x16x128xbf16>
    tpu.vector_store %arg12[%c0_37, %c1, %c0_38], %55 {strides = array<i32>} : memref<10x18x128xbf16, #tpu.memory_space<vmem>>, vector<1x16x128xbf16>,
    %57 = vector.shape_cast %51 : vector<16x128xbf16> to vector<1x16x128xbf16>
    %c9 = arith.constant 9 : index
    %c1_39 = arith.constant 1 : index
    %c0_40 = arith.constant 0 : index
    %58 = vector.load %arg12[%c9, %c1_39, %c0_40] : memref<10x18x128xbf16, #tpu.memory_space<vmem>>, vector<1x16x128xbf16>
    tpu.vector_store %arg12[%c9, %c1_39, %c0_40], %57 {strides = array<i32>} : memref<10x18x128xbf16, #tpu.memory_space<vmem>>, vector<1x16x128xbf16>,
    %59 = vector.shape_cast %13 : vector<128x128xbf16> to vector<8x16x128xbf16>
    %c1_41 = arith.constant 1 : index
    %c1_42 = arith.constant 1 : index
    %c0_43 = arith.constant 0 : index
    %60 = vector.load %arg12[%c1_41, %c1_42, %c0_43] : memref<10x18x128xbf16, #tpu.memory_space<vmem>>, vector<8x16x128xbf16>
    tpu.vector_store %arg12[%c1_41, %c1_42, %c0_43], %59 {strides = array<i32>} : memref<10x18x128xbf16, #tpu.memory_space<vmem>>, vector<8x16x128xbf16>,
    %c0_44 = arith.constant 0 : index
    %c0_45 = arith.constant 0 : index
    %c0_46 = arith.constant 0 : index
    %61 = vector.load %arg12[%c0_44, %c0_45, %c0_46] : memref<10x18x128xbf16, #tpu.memory_space<vmem>>, vector<8x16x128xbf16>
    %62 = vector.shape_cast %61 : vector<8x16x128xbf16> to vector<128x128xbf16>
    %c0_47 = arith.constant 0 : index
    %c0_48 = arith.constant 0 : index
    %c0_49 = arith.constant 0 : index
    %63 = vector.load %arg5[%c0_47, %c0_48, %c0_49] : memref<9x128x128xbf16, #tpu.memory_space<vmem>>, vector<1x128x128xbf16>
    %64 = vector.shape_cast %63 : vector<1x128x128xbf16> to vector<128x128xbf16>
    %cst_50 = arith.constant dense<0.000000e+00> : vector<128x128xf32>
    %65 = tpu.matmul %62, %64, %cst_50 {dimension_numbers = #tpu.dot_dimension_numbers<[1], [0], [0], [1], [0, 0, 1, 1], [], []>} : vector<128x128xbf16>, vector<128x128xbf16>, vector<128x128xf32> -> vector<128x128xf32>
    %c0_51 = arith.constant 0 : index
    %c1_52 = arith.constant 1 : index
    %c0_53 = arith.constant 0 : index
    %66 = vector.load %arg12[%c0_51, %c1_52, %c0_53] : memref<10x18x128xbf16, #tpu.memory_space<vmem>>, vector<8x16x128xbf16>
    %67 = vector.shape_cast %66 : vector<8x16x128xbf16> to vector<128x128xbf16>
    %c1_54 = arith.constant 1 : index
    %c0_55 = arith.constant 0 : index
    %c0_56 = arith.constant 0 : index
    %68 = vector.load %arg5[%c1_54, %c0_55, %c0_56] : memref<9x128x128xbf16, #tpu.memory_space<vmem>>, vector<1x128x128xbf16>
    %69 = vector.shape_cast %68 : vector<1x128x128xbf16> to vector<128x128xbf16>
    %cst_57 = arith.constant dense<0.000000e+00> : vector<128x128xf32>
    %70 = tpu.matmul %67, %69, %cst_57 {dimension_numbers = #tpu.dot_dimension_numbers<[1], [0], [0], [1], [0, 0, 1, 1], [], []>} : vector<128x128xbf16>, vector<128x128xbf16>, vector<128x128xf32> -> vector<128x128xf32>
    %71 = arith.addf %65, %70 : vector<128x128xf32>
    %c0_58 = arith.constant 0 : index
    %c2 = arith.constant 2 : index
    %c0_59 = arith.constant 0 : index
    %72 = vector.load %arg12[%c0_58, %c2, %c0_59] : memref<10x18x128xbf16, #tpu.memory_space<vmem>>, vector<8x16x128xbf16>
    %73 = vector.shape_cast %72 : vector<8x16x128xbf16> to vector<128x128xbf16>
    %c2_60 = arith.constant 2 : index
    %c0_61 = arith.constant 0 : index
    %c0_62 = arith.constant 0 : index
    %74 = vector.load %arg5[%c2_60, %c0_61, %c0_62] : memref<9x128x128xbf16, #tpu.memory_space<vmem>>, vector<1x128x128xbf16>
    %75 = vector.shape_cast %74 : vector<1x128x128xbf16> to vector<128x128xbf16>
    %cst_63 = arith.constant dense<0.000000e+00> : vector<128x128xf32>
    %76 = tpu.matmul %73, %75, %cst_63 {dimension_numbers = #tpu.dot_dimension_numbers<[1], [0], [0], [1], [0, 0, 1, 1], [], []>} : vector<128x128xbf16>, vector<128x128xbf16>, vector<128x128xf32> -> vector<128x128xf32>
    %77 = arith.addf %71, %76 : vector<128x128xf32>
    %c1_64 = arith.constant 1 : index
    %c0_65 = arith.constant 0 : index
    %c0_66 = arith.constant 0 : index
    %78 = vector.load %arg12[%c1_64, %c0_65, %c0_66] : memref<10x18x128xbf16, #tpu.memory_space<vmem>>, vector<8x16x128xbf16>
    %79 = vector.shape_cast %78 : vector<8x16x128xbf16> to vector<128x128xbf16>
    %c3 = arith.constant 3 : index
    %c0_67 = arith.constant 0 : index
    %c0_68 = arith.constant 0 : index
    %80 = vector.load %arg5[%c3, %c0_67, %c0_68] : memref<9x128x128xbf16, #tpu.memory_space<vmem>>, vector<1x128x128xbf16>
    %81 = vector.shape_cast %80 : vector<1x128x128xbf16> to vector<128x128xbf16>
    %cst_69 = arith.constant dense<0.000000e+00> : vector<128x128xf32>
    %82 = tpu.matmul %79, %81, %cst_69 {dimension_numbers = #tpu.dot_dimension_numbers<[1], [0], [0], [1], [0, 0, 1, 1], [], []>} : vector<128x128xbf16>, vector<128x128xbf16>, vector<128x128xf32> -> vector<128x128xf32>
    %83 = arith.addf %77, %82 : vector<128x128xf32>
    %c1_70 = arith.constant 1 : index
    %c1_71 = arith.constant 1 : index
    %c0_72 = arith.constant 0 : index
    %84 = vector.load %arg12[%c1_70, %c1_71, %c0_72] : memref<10x18x128xbf16, #tpu.memory_space<vmem>>, vector<8x16x128xbf16>
    %85 = vector.shape_cast %84 : vector<8x16x128xbf16> to vector<128x128xbf16>
    %c4 = arith.constant 4 : index
    %c0_73 = arith.constant 0 : index
    %c0_74 = arith.constant 0 : index
    %86 = vector.load %arg5[%c4, %c0_73, %c0_74] : memref<9x128x128xbf16, #tpu.memory_space<vmem>>, vector<1x128x128xbf16>
    %87 = vector.shape_cast %86 : vector<1x128x128xbf16> to vector<128x128xbf16>
    %cst_75 = arith.constant dense<0.000000e+00> : vector<128x128xf32>
    %88 = tpu.matmul %85, %87, %cst_75 {dimension_numbers = #tpu.dot_dimension_numbers<[1], [0], [0], [1], [0, 0, 1, 1], [], []>} : vector<128x128xbf16>, vector<128x128xbf16>, vector<128x128xf32> -> vector<128x128xf32>
    %89 = arith.addf %83, %88 : vector<128x128xf32>
    %c1_76 = arith.constant 1 : index
    %c2_77 = arith.constant 2 : index
    %c0_78 = arith.constant 0 : index
    %90 = vector.load %arg12[%c1_76, %c2_77, %c0_78] : memref<10x18x128xbf16, #tpu.memory_space<vmem>>, vector<8x16x128xbf16>
    %91 = vector.shape_cast %90 : vector<8x16x128xbf16> to vector<128x128xbf16>
    %c5 = arith.constant 5 : index
    %c0_79 = arith.constant 0 : index
    %c0_80 = arith.constant 0 : index
    %92 = vector.load %arg5[%c5, %c0_79, %c0_80] : memref<9x128x128xbf16, #tpu.memory_space<vmem>>, vector<1x128x128xbf16>
    %93 = vector.shape_cast %92 : vector<1x128x128xbf16> to vector<128x128xbf16>
    %cst_81 = arith.constant dense<0.000000e+00> : vector<128x128xf32>
    %94 = tpu.matmul %91, %93, %cst_81 {dimension_numbers = #tpu.dot_dimension_numbers<[1], [0], [0], [1], [0, 0, 1, 1], [], []>} : vector<128x128xbf16>, vector<128x128xbf16>, vector<128x128xf32> -> vector<128x128xf32>
    %95 = arith.addf %89, %94 : vector<128x128xf32>
    %c2_82 = arith.constant 2 : index
    %c0_83 = arith.constant 0 : index
    %c0_84 = arith.constant 0 : index
    %96 = vector.load %arg12[%c2_82, %c0_83, %c0_84] : memref<10x18x128xbf16, #tpu.memory_space<vmem>>, vector<8x16x128xbf16>
    %97 = vector.shape_cast %96 : vector<8x16x128xbf16> to vector<128x128xbf16>
    %c6 = arith.constant 6 : index
    %c0_85 = arith.constant 0 : index
    %c0_86 = arith.constant 0 : index
    %98 = vector.load %arg5[%c6, %c0_85, %c0_86] : memref<9x128x128xbf16, #tpu.memory_space<vmem>>, vector<1x128x128xbf16>
    %99 = vector.shape_cast %98 : vector<1x128x128xbf16> to vector<128x128xbf16>
    %cst_87 = arith.constant dense<0.000000e+00> : vector<128x128xf32>
    %100 = tpu.matmul %97, %99, %cst_87 {dimension_numbers = #tpu.dot_dimension_numbers<[1], [0], [0], [1], [0, 0, 1, 1], [], []>} : vector<128x128xbf16>, vector<128x128xbf16>, vector<128x128xf32> -> vector<128x128xf32>
    %101 = arith.addf %95, %100 : vector<128x128xf32>
    %c2_88 = arith.constant 2 : index
    %c1_89 = arith.constant 1 : index
    %c0_90 = arith.constant 0 : index
    %102 = vector.load %arg12[%c2_88, %c1_89, %c0_90] : memref<10x18x128xbf16, #tpu.memory_space<vmem>>, vector<8x16x128xbf16>
    %103 = vector.shape_cast %102 : vector<8x16x128xbf16> to vector<128x128xbf16>
    %c7 = arith.constant 7 : index
    %c0_91 = arith.constant 0 : index
    %c0_92 = arith.constant 0 : index
    %104 = vector.load %arg5[%c7, %c0_91, %c0_92] : memref<9x128x128xbf16, #tpu.memory_space<vmem>>, vector<1x128x128xbf16>
    %105 = vector.shape_cast %104 : vector<1x128x128xbf16> to vector<128x128xbf16>
    %cst_93 = arith.constant dense<0.000000e+00> : vector<128x128xf32>
    %106 = tpu.matmul %103, %105, %cst_93 {dimension_numbers = #tpu.dot_dimension_numbers<[1], [0], [0], [1], [0, 0, 1, 1], [], []>} : vector<128x128xbf16>, vector<128x128xbf16>, vector<128x128xf32> -> vector<128x128xf32>
    %107 = arith.addf %101, %106 : vector<128x128xf32>
    %c2_94 = arith.constant 2 : index
    %c2_95 = arith.constant 2 : index
    %c0_96 = arith.constant 0 : index
    %108 = vector.load %arg12[%c2_94, %c2_95, %c0_96] : memref<10x18x128xbf16, #tpu.memory_space<vmem>>, vector<8x16x128xbf16>
    %109 = vector.shape_cast %108 : vector<8x16x128xbf16> to vector<128x128xbf16>
    %c8 = arith.constant 8 : index
    %c0_97 = arith.constant 0 : index
    %c0_98 = arith.constant 0 : index
    %110 = vector.load %arg5[%c8, %c0_97, %c0_98] : memref<9x128x128xbf16, #tpu.memory_space<vmem>>, vector<1x128x128xbf16>
    %111 = vector.shape_cast %110 : vector<1x128x128xbf16> to vector<128x128xbf16>
    %cst_99 = arith.constant dense<0.000000e+00> : vector<128x128xf32>
    %112 = tpu.matmul %109, %111, %cst_99 {dimension_numbers = #tpu.dot_dimension_numbers<[1], [0], [0], [1], [0, 0, 1, 1], [], []>} : vector<128x128xbf16>, vector<128x128xbf16>, vector<128x128xf32> -> vector<128x128xf32>
    %113 = arith.addf %107, %112 : vector<128x128xf32>
    %c0_100 = arith.constant 0 : index
    %c0_101 = arith.constant 0 : index
    %114 = vector.load %arg6[%c0_100, %c0_101] : memref<1x128xf32, #tpu.memory_space<vmem>>, vector<1x128xf32>
    %115 = vector.broadcast %114 : vector<1x128xf32> to vector<128x128xf32>
    %116 = arith.addf %113, %115 : vector<128x128xf32>
    %cst_102 = arith.constant 0.000000e+00 : f32
    %117 = vector.broadcast %cst_102 : f32 to vector<128x128xf32>
    %118 = arith.maximumf %116, %117 : vector<128x128xf32>
    %119 = arith.truncf %118 : vector<128x128xf32> to vector<128x128xbf16>
    %c0_103 = arith.constant 0 : index
    %c0_104 = arith.constant 0 : index
    %120 = vector.load %arg7[%c0_103, %c0_104] : memref<128x512xbf16, #tpu.memory_space<vmem>>, vector<128x512xbf16>
    %cst_105 = arith.constant dense<0.000000e+00> : vector<128x512xf32>
    %121 = tpu.matmul %119, %120, %cst_105 {dimension_numbers = #tpu.dot_dimension_numbers<[1], [0], [0], [1], [0, 0, 1, 1], [], []>} : vector<128x128xbf16>, vector<128x512xbf16>, vector<128x512xf32> -> vector<128x512xf32>
    %c0_106 = arith.constant 0 : index
    %c0_107 = arith.constant 0 : index
    %122 = vector.load %arg8[%c0_106, %c0_107] : memref<1x512xf32, #tpu.memory_space<vmem>>, vector<1x512xf32>
    %123 = vector.broadcast %122 : vector<1x512xf32> to vector<128x512xf32>
    %124 = arith.addf %121, %123 : vector<128x512xf32>
    %c0_108 = arith.constant 0 : index
    %c0_109 = arith.constant 0 : index
    %125 = vector.load %arg9[%c0_108, %c0_109] : memref<256x512xbf16, #tpu.memory_space<vmem>>, vector<256x512xbf16>
    %cst_110 = arith.constant dense<0.000000e+00> : vector<128x512xf32>
    %126 = tpu.matmul %5, %125, %cst_110 {dimension_numbers = #tpu.dot_dimension_numbers<[1], [0], [0], [1], [0, 0, 1, 1], [], []>} : vector<128x256xbf16>, vector<256x512xbf16>, vector<128x512xf32> -> vector<128x512xf32>
    %c0_111 = arith.constant 0 : index
    %c0_112 = arith.constant 0 : index
    %127 = vector.load %arg10[%c0_111, %c0_112] : memref<1x512xf32, #tpu.memory_space<vmem>>, vector<1x512xf32>
    %128 = vector.broadcast %127 : vector<1x512xf32> to vector<128x512xf32>
    %129 = arith.addf %126, %128 : vector<128x512xf32>
    %130 = arith.addf %124, %129 : vector<128x512xf32>
    %cst_113 = arith.constant 0.000000e+00 : f32
    %131 = vector.broadcast %cst_113 : f32 to vector<128x512xf32>
    %132 = arith.maximumf %130, %131 : vector<128x512xf32>
    %133 = arith.truncf %132 : vector<128x512xf32> to vector<128x512xbf16>
    %c0_114 = arith.constant 0 : index
    %c0_115 = arith.constant 0 : index
    %c0_116 = arith.constant 0 : index
    %134 = vector.load %arg11[%c0_114, %c0_115, %c0_116] : memref<1x128x512xbf16, #tpu.memory_space<vmem>>, vector<1x128x512xbf16>
    %135 = vector.shape_cast %134 : vector<1x128x512xbf16> to vector<128x512xbf16>
    %136 = vector.shape_cast %133 : vector<128x512xbf16> to vector<1x128x512xbf16>
    tpu.vector_store %arg11[%c0_114, %c0_115, %c0_116], %136 {strides = array<i32>} : memref<1x128x512xbf16, #tpu.memory_space<vmem>>, vector<1x128x512xbf16>,
    return
  }
  func.func @transform_0(%arg0: i32, %arg1: i32) -> (i32, i32, i32) {
    %c0_i32 = arith.constant 0 : i32
    %c0_i32_0 = arith.constant 0 : i32
    %c0_i32_1 = arith.constant 0 : i32
    return %arg0, %c0_i32, %c0_i32_0 : i32, i32, i32
  }
  func.func @transform_1(%arg0: i32, %arg1: i32) -> (i32, i32) {
    %c0_i32 = arith.constant 0 : i32
    %c0_i32_0 = arith.constant 0 : i32
    %c0_i32_1 = arith.constant 0 : i32
    return %c0_i32, %c0_i32_0 : i32, i32
  }
  func.func @transform_2(%arg0: i32, %arg1: i32) -> (i32, i32) {
    %c0_i32 = arith.constant 0 : i32
    %c0_i32_0 = arith.constant 0 : i32
    %c0_i32_1 = arith.constant 0 : i32
    return %c0_i32, %c0_i32_0 : i32, i32
  }
  func.func @transform_3(%arg0: i32, %arg1: i32) -> (i32, i32, i32) {
    %c0_i32 = arith.constant 0 : i32
    %c0_i32_0 = arith.constant 0 : i32
    %c0_i32_1 = arith.constant 0 : i32
    %c0_i32_2 = arith.constant 0 : i32
    return %c0_i32, %c0_i32_0, %c0_i32_1 : i32, i32, i32
  }
  func.func @transform_4(%arg0: i32, %arg1: i32) -> (i32, i32) {
    %c0_i32 = arith.constant 0 : i32
    %c0_i32_0 = arith.constant 0 : i32
    %c0_i32_1 = arith.constant 0 : i32
    return %c0_i32, %c0_i32_0 : i32, i32
  }
  func.func @transform_5(%arg0: i32, %arg1: i32) -> (i32, i32) {
    %c0_i32 = arith.constant 0 : i32
    %c0_i32_0 = arith.constant 0 : i32
    %c0_i32_1 = arith.constant 0 : i32
    return %c0_i32, %c0_i32_0 : i32, i32
  }
  func.func @transform_6(%arg0: i32, %arg1: i32) -> (i32, i32) {
    %c0_i32 = arith.constant 0 : i32
    %c0_i32_0 = arith.constant 0 : i32
    %c0_i32_1 = arith.constant 0 : i32
    return %c0_i32, %c0_i32_0 : i32, i32
  }
  func.func @transform_7(%arg0: i32, %arg1: i32) -> (i32, i32) {
    %c0_i32 = arith.constant 0 : i32
    %c0_i32_0 = arith.constant 0 : i32
    %c0_i32_1 = arith.constant 0 : i32
    return %c0_i32, %c0_i32_0 : i32, i32
  }
  func.func @transform_8(%arg0: i32, %arg1: i32) -> (i32, i32) {
    %c0_i32 = arith.constant 0 : i32
    %c0_i32_0 = arith.constant 0 : i32
    %c0_i32_1 = arith.constant 0 : i32
    return %c0_i32, %c0_i32_0 : i32, i32
  }
  func.func @transform_9(%arg0: i32, %arg1: i32) -> (i32, i32, i32) {
    %c0_i32 = arith.constant 0 : i32
    %c0_i32_0 = arith.constant 0 : i32
    return %arg0, %arg1, %c0_i32 : i32, i32, i32
  }
}

</mosaic_0001>

<bundles_post_ra>
// kernel: _lambda_.1
= control target key start
LH: loop header
LB: loop body
LE: loop exit
PB: predicated region body
PF: predicated region fallthrough
CT: control target
= control target key end

     0   :  { %s9342_s0 = inlined_call_operand.vmem [shape: bf16[2,256,256], index: 0, kind: input, shape index: {}]   ;;  %s9343_s1 = inlined_call_operand.vmem [shape: bf16[256,128], index: 1, kind: input, shape index: {}]   ;;  %s9344_s2 = inlined_call_operand.vmem [shape: f32[1,128], index: 2, kind: input, shape index: {}]   ;;  %s9345_s3 = inlined_call_operand.vmem [shape: bf16[9,128,128], index: 3, kind: input, shape index: {}]   ;;  %s9346_s4 = inlined_call_operand.vmem [shape: f32[1,128], index: 4, kind: input, shape index: {}]   ;;  %s9347_s5 = inlined_call_operand.vmem [shape: bf16[128,512], index: 5, kind: input, shape index: {}]   ;;  %s9348_s6 = inlined_call_operand.vmem [shape: f32[1,512], index: 6, kind: input, shape index: {}]   ;;  %s9349_s7 = inlined_call_operand.vmem [shape: bf16[256,512], index: 7, kind: input, shape index: {}]   ;;  %s9350_s8 = inlined_call_operand.vmem [shape: f32[1,512], index: 8, kind: input, shape index: {}]   ;;  %s9351_s9 = inlined_call_operand.hbm [shape: bf16[2,256,512], index: 9, kind: output, shape index: {}]  }
   0x1   :  { %9357 = sst [smem:[#allocation10_spill]] %s9342_s0 }
   0x2   :  { %14 = vsyncpa [#allocation4], 0 }
   0x3   :  { %16 = vsyncpa [#allocation4 + $0x1], 0  ;;  %s7607_s30 = smov 0   ;;  %s7609_s10 = smov 0  }
   0x4   :  { %s7611_s11 = smov 0   ;;  %s7613_s12 = smov 0  }
   0x5   :  { %s7615_s13 = smov 0   ;;  %s7617_s14 = smov 0  }
   0x6   :  { %s7619_s15 = smov 0   ;;  %s7621_s16 = smov 0  }
   0x7 LB: > { %9358 = sst [smem:[#allocation6_spill]] %s7543_s14  ;;  %s5655_s17 = sadd.s32 4294967295, %s7551_s16   ;;  %s7551_s16 = sphi %s7621_s16, %s22_s16   ;;  %s7547_s15 = sphi %s7619_s15, %s9381_s15   ;;  %s7543_s14 = sphi %s7617_s14, %s9380_s14   ;;  %s7539_s13 = sphi %s7615_s13, %s9379_s13   ;;  %s7535_s12 = sphi %s7613_s12, %s9378_s12   ;;  %s7531_s11 = sphi %s7611_s11, %s9384_s11   ;;  %s7527_s10 = sphi %s7609_s10, %s9383_s10   ;;  %s7523_s30 = sphi %s7607_s30, %s9382_s30  }
   0x8   : > { %9359 = sst [smem:[#allocation7_spill]] %s7547_s15  ;;  %s5656_s18 = sadd.s32 4294967294, %s7551_s16  }
   0x9   : > { %s31_s19 = sadd.s32 1, %s7543_s14  ;;  %s34_s20 = sadd.s32 1, %s7547_s15 }
   0xa   : > { %p32_p0 = scmp.ge.s32.totalorder %s31_s19, 2  ;;  %p247_p1 = scmp.ne.s32.totalorder %s7531_s11, %s7527_s10 }
   0xb   : > { %p248_p2 = scmp.eq.s32.totalorder %s5655_s17, 3  ;;  %p253_p5 = scmp.ne.s32.totalorder %s7527_s10, %s7523_s30 }
   0xc   : > { %s9386_s19 = smov (%p32_p0, %s31_s19), 0  ;;  %s9388_s20 = smov (!%p32_p0, %s34_s20), %s7547_s15 }
   0xd   : > { %9360 = sst [smem:[#allocation8_spill]] %s9386_s19  ;;  %s233_s21 = ssub.s32 %s7543_s14, %s9386_s19 }
   0xe   : > { %p7658_p3 = por %p248_p2, %p247_p1  ;;  %p36_p4 = scmp.ge.s32.totalorder %s9388_s20, 2 }
   0xf   : > { %p254_p6 = scmp.eq.s32.totalorder %s5656_s18, 3  ;;  %p5659_p7 = scmp.ge.s32.totalorder %s7551_s16, 1 }
  0x10   : > { %s9390_s20 = smov (%p36_p4, %s9388_s20), 0  ;;  %p304_p9 = scmp.lt.s32.totalorder %s7551_s16, 5 }
  0x11   : > { %9362 = sst [smem:[#allocation9_spill]] %s9390_s20  ;;  %p7667_p8 = por %p254_p6, %p253_p5 }
  0x12   : > { %s232_s24 = ssub.s32 %s7547_s15, %s9390_s20  ;;  %s237_s25 = sadd.s32 1, %s7531_s11 }
  0x13   : > { %s234_s26 = sor.u32 %s233_s21, %s232_s24  ;;  %p305_p10 = pnand %p5659_p7, %p304_p9 }
  0x14   : > { %p235_p11 = scmp.eq.s32.totalorder %s234_s26, 0  ;;  %v7681_v0 = vld [vmem:[%s9343_s1 + $0x40] sm:$0xff] (!%p305_p10)   ;;  %p340_p12 = scmp.lt.s32.totalorder (!%p305_p10), %s7539_s13, 1  ;;  %v7694_v2 = vld [vmem:[%s9343_s1 + $0x48] sm:$0xff] (!%p305_p10)   ;;  %v7710_v4 = vld [vmem:[%s9343_s1 + $0x50] sm:$0xff] (!%p305_p10)   ;;  %vm846_vm0 = vcmask (!%p305_p10), 1040384  }
  0x15   : > { %308 = sbr.rel (%p305_p10) target bundleno = 1294 (0x50e), region = 56  ;;  %v7687_v1 = vld [vmem:[%s9343_s1] sm:$0xff] (!%p305_p10)   ;;  %6220 = vmatprep.subr.bf16.mxu0 (!%p305_p10), %v7681_v0  ;;  %6284 = vmatprep.subr.bf16.mxu1 (!%p305_p10), %v7681_v0  ;;  %v7702_v3 = vld [vmem:[%s9343_s1 + $0x8] sm:$0xff] (!%p305_p10)   ;;  %s9352_s29 = sshll.u32 (!%p305_p10), %s7535_s12, 3  ;;  %v7719_v5 = vld [vmem:[%s9343_s1 + $0x10] sm:$0xff] (!%p305_p10)   ;;  %vm938_vm5 = vcmask (!%p305_p10), 1043456  }
  0x16   : > { %s7676_s27 = scalar_select %p235_p11, %s7531_s11, %s237_s25  }
  0x17   : > { %6221 = vmatpush3.bf16.msra.mxu0 (!%p305_p10), %v7687_v1  ;;  %6285 = vmatpush3.bf16.msra.mxu1 (!%p305_p10), %v7687_v1  ;;  %s5700_s21 = sadd.s32 (!%p305_p10), 4294967295, %s9352_s29  ;;  %v7160_v6 = vld [vmem:[%s9343_s1 + $0x58] sm:$0xff] (!%p305_p10)   ;;  %s9364_s0 = sld [smem:[#allocation10_spill]] (!%p305_p10)  ;;  %v7162_v8 = vld [vmem:[%s9343_s1 + $0x60] sm:$0xff] (!%p305_p10)   ;;  %v7164_v10 = vld [vmem:[%s9343_s1 + $0x68] sm:$0xff] (!%p305_p10)   ;;  %vm1883_vm12 = vcmask (!%p305_p10), 1042432  }
  0x18   : > { %6222 = vmatprep.subr.bf16.mxu0 (!%p305_p10), %v7694_v2  ;;  %6286 = vmatprep.subr.bf16.mxu1 (!%p305_p10), %v7694_v2  ;;  %p707_p13 = scmp.gt.s32.totalorder (!%p305_p10), %s5700_s21, 0  ;;  %s5664_s24 = sshll.u32 (!%p305_p10), %s7535_s12, 7  ;;  %v7161_v7 = vld [vmem:[%s9343_s1 + $0x18] sm:$0xff] (!%p305_p10)   ;;  %v7163_v9 = vld [vmem:[%s9343_s1 + $0x20] sm:$0xff] (!%p305_p10)   ;;  %v7165_v13 = vld [vmem:[%s9343_s1 + $0x28] sm:$0xff] (!%p305_p10)   ;;  %vm1884_vm13 = vcmask (!%p305_p10), 1046532  }
  0x19   : > { %v7166_v14 = vld [vmem:[%s9343_s1 + $0x70] sm:$0xff] (!%p305_p10)   ;;  %v7168_v16 = vld [vmem:[%s9343_s1 + $0x78] sm:$0xff] (!%p305_p10)   ;;  %v7197_v20 = vld [vmem:[%s9345_s3 + $0x40] sm:$0xff] (!%p305_p10)   ;;  %vm847_vm1 = vsmask.f32 (!%p305_p10), 256  ;;  %s9369_s26 = sshll.u32 (!%p305_p10), %s7535_s12, 3 }
  0x1a   : > { %v7167_v15 = vld [vmem:[%s9343_s1 + $0x30] sm:$0xff] (!%p305_p10)   ;;  %v7169_v17 = vld [vmem:[%s9343_s1 + $0x38] sm:$0xff] (!%p305_p10)   ;;  %vm7791_vm2 = vmand (!%p305_p10), %vm846_vm0, %vm847_vm1  ;;  %vm879_vm3 = vsmask.f32 (!%p305_p10), 7938  ;;  %s776_s14 = sadd.s32 (!%p305_p10), 8, %s9369_s26  ;;  %p770_p1 = scmp.gt.s32.totalorder (!%p305_p10), %s7535_s12, 0 }
  0x1b   : > { %6223 = vmatpush3.bf16.msra.mxu0 (!%p305_p10), %v7702_v3  ;;  %6287 = vmatpush3.bf16.msra.mxu1 (!%p305_p10), %v7702_v3  ;;  %v852_v36 = vld [vmem:[#allocation2 + $0xc] sm:$0x1] (!%p305_p10)  ;;  %vm7798_vm4 = vmand (!%p305_p10), %vm846_vm0, %vm879_vm3  ;;  %v884_v39 = vld [vmem:[#allocation2 + $0x14] sm:$0x1] (!%p305_p10)  ;;  %p777_p0 = scmp.lt.s32.totalorder (!%p305_p10), %s776_s14, 15  ;;  %p840_p2 = scmp.lt.s32.totalorder (!%p305_p10), %s7535_s12, 1 }
  0x1c   : > { %s341_s25 = scalar_select %p340_p12, %s7539_s13, 1  ;;  %6224 = vmatprep.subr.bf16.mxu0 %v7710_v4  ;;  %6288 = vmatprep.subr.bf16.mxu1 %v7710_v4  ;;  %v853_v37 = vsel %vm7791_vm2, 0, %v852_v36  ;;  %v885_v40 = vsel %vm7798_vm4, 0, %v884_v39  ;;  %v849_v41 = vld [vmem:[#allocation2] sm:$0x1]  ;;  %v7198_v43 = vld [vmem:[%s9345_s3 + $0x48] sm:$0xff]   ;;  %vm7873_vm7 = vmand %vm938_vm5, %vm879_vm3 }
  0x1d   : > { %s9392_s21 = smov (!%p707_p13, %s5700_s21), 0  ;;  %854 = vst [vmem:[#allocation2 + $0xc] sm:$0x1] %v853_v37  ;;  %886 = vst [vmem:[#allocation2 + $0x14] sm:$0x1] %v885_v40  ;;  %v850_v42 = vsel %vm7791_vm2, 0, %v849_v41 }
  0x1e   : > { %s6163_s28 = sshll.u32 %s341_s25, 8  ;;  %s5701_s20 = sshll.u32 %s9392_s21, 4  ;;  %851 = vst [vmem:[#allocation2] sm:$0x1] %v850_v42  ;;  %v881_v44 = vld [vmem:[#allocation2 + $0x8] sm:$0x1]  ;;  %vm8113_vm14 = vmor %vm1883_vm12, %vm1884_vm13 }
  0x1f   : > { %s7729_s19 = scalar_lea.vmem %s9364_s0, %s6163_s28  ;;  %6225 = vmatpush3.bf16.msra.mxu0 %v7719_v5  ;;  %6289 = vmatpush3.bf16.msra.mxu1 %v7719_v5  ;;  %v855_v45 = vld [vmem:[#allocation2 + $0x18] sm:$0x1]  ;;  %v882_v46 = vsel %vm7798_vm4, 0, %v881_v44  ;;  %v7199_v48 = vld [vmem:[%s9345_s3 + $0x50] sm:$0xff]   ;;  %v887_v49 = vld [vmem:[#allocation2 + $0x20] sm:$0x1] }
  0x20   : > { %6226 = vmatprep.subr.bf16.mxu0 %v7160_v6  ;;  %6290 = vmatprep.subr.bf16.mxu1 %v7160_v6  ;;  %s7741_s29 = scalar_lea.vmem %s7729_s19, %s5664_s24  ;;  %s714_s25 = scalar_lea.vmem %s7729_s19, %s5701_s20  ;;  %v856_v47 = vsel %vm7791_vm2, 0, %v855_v45  ;;  %883 = vst [vmem:[#allocation2 + $0x8] sm:$0x1] %v882_v46  ;;  %v888_v50 = vsel %vm7798_vm4, 0, %v887_v49  ;;  %v7200_v51 = vld [vmem:[%s9345_s3 + $0x58] sm:$0xff]   ;;  %v7201_v54 = vld [vmem:[%s9345_s3 + $0x60] sm:$0xff]  }
  0x21   : > { %v7170_v11 = vld [vmem:[%s7741_s29 + $0x4] ss:$8 sps:$4 sm:$0xff]   ;;  %v7172_v18 = vld [vmem:[%s714_s25] ss:$8 sps:$4 sm:$0xff]   ;;  %v7176_v21 = vld [vmem:[%s7741_s29 + $0x14] ss:$8 sps:$4 sm:$0xff]  }
  0x22   : > { %617 = vmatprep.mubr.bf16.mxu0 %v7170_v11  ;;  %v7174_v12 = vld [vmem:[%s714_s25 + $0x4] ss:$8 sps:$4 sm:$0xff]   ;;  %v7175_v19 = vld [vmem:[%s7741_s29] ss:$8 sps:$4 sm:$0xff]   ;;  %v7178_v22 = vld [vmem:[%s7741_s29 + $0x10] ss:$8 sps:$4 sm:$0xff]  }
  0x23   : > { %6227 = vmatpush3.bf16.msra.mxu0 %v7161_v7  ;;  %6291 = vmatpush3.bf16.msra.mxu1 %v7161_v7  ;;  %v7179_v23 = vld [vmem:[%s7741_s29 + $0x24] ss:$8 sps:$4 sm:$0xff]   ;;  %v7181_v24 = vld [vmem:[%s7741_s29 + $0x20] ss:$8 sps:$4 sm:$0xff]   ;;  %v7182_v25 = vld [vmem:[%s7741_s29 + $0x34] ss:$8 sps:$4 sm:$0xff]  }
  0x24   : > { %6228 = vmatprep.subr.bf16.mxu0 %v7162_v8  ;;  %6292 = vmatprep.subr.bf16.mxu1 %v7162_v8  ;;  %v7184_v26 = vld [vmem:[%s7741_s29 + $0x30] ss:$8 sps:$4 sm:$0xff]   ;;  %v7185_v27 = vld [vmem:[%s7741_s29 + $0x44] ss:$8 sps:$4 sm:$0xff]   ;;  %v7187_v28 = vld [vmem:[%s7741_s29 + $0x40] ss:$8 sps:$4 sm:$0xff]  }
  0x25   : > { %759 = vmatprep.mubr.bf16.mxu1 %v7174_v12  ;;  %v7188_v29 = vld [vmem:[%s7741_s29 + $0x54] ss:$8 sps:$4 sm:$0xff]   ;;  %v7190_v30 = vld [vmem:[%s7741_s29 + $0x50] ss:$8 sps:$4 sm:$0xff]   ;;  %v7191_v31 = vld [vmem:[%s7741_s29 + $0x64] ss:$8 sps:$4 sm:$0xff]  }
  0x26   : > { %v7193_v32 = vld [vmem:[%s7741_s29 + $0x60] ss:$8 sps:$4 sm:$0xff]   ;;  %v7194_v33 = vld [vmem:[%s7741_s29 + $0x74] ss:$8 sps:$4 sm:$0xff]   ;;  %v7196_v34 = vld [vmem:[%s7741_s29 + $0x70] ss:$8 sps:$4 sm:$0xff]  }
  0x27   : > { %6229 = vmatpush3.bf16.msra.mxu0 %v7163_v9  ;;  %6293 = vmatpush3.bf16.msra.mxu1 %v7163_v9  ;;  %857 = vst [vmem:[#allocation2 + $0x18] sm:$0x1] %v856_v47  ;;  %889 = vst [vmem:[#allocation2 + $0x20] sm:$0x1] %v888_v50  ;;  %s9394_s14 = smov (!%p777_p0, %s776_s14), 15  ;;  %v7205_v59 = vld [vmem:[%s9345_s3 + $0x68] sm:$0xff]  }
  0x28   : > { %6230 = vmatprep.subr.bf16.mxu0 %v7164_v10  ;;  %6294 = vmatprep.subr.bf16.mxu1 %v7164_v10  ;;  %v858_v52 = vld [vmem:[#allocation2 + $0x24] sm:$0x1]  ;;  %s5706_s24 = sshll.u32 %s9394_s14, 4  ;;  %v890_v55 = vld [vmem:[#allocation2 + $0x2c] sm:$0x1]  ;;  %v7206_v62 = vld [vmem:[%s9345_s3 + $0x70] sm:$0xff]  }
  0x29   : > { %v859_v53 = vsel %vm7791_vm2, 0, %v858_v52  ;;  %s784_s25 = scalar_lea.vmem %s7729_s19, %s5706_s24  ;;  %v891_v56 = vsel %vm7798_vm4, 0, %v890_v55  ;;  %v861_v60 = vld [vmem:[#allocation2 + $0x30] sm:$0x1]  ;;  %v893_v63 = vld [vmem:[#allocation2 + $0x38] sm:$0x1] }
  0x2a   : > { %860 = vst [vmem:[#allocation2 + $0x24] sm:$0x1] %v859_v53  ;;  %892 = vst [vmem:[#allocation2 + $0x2c] sm:$0x1] %v891_v56  ;;  %v7202_v57 = vld [vmem:[%s784_s25] ss:$8 sps:$4 sm:$0xff]  }
  0x2b   : > { %6231 = vmatpush3.bf16.msra.mxu0 %v7165_v13  ;;  %6295 = vmatpush3.bf16.msra.mxu1 %v7165_v13  ;;  %v7204_v58 = vld [vmem:[%s784_s25 + $0x4] ss:$8 sps:$4 sm:$0xff]   ;;  %v862_v61 = vsel %vm7791_vm2, 0, %v861_v60  ;;  %v902_v12 = vld [vmem:[#allocation2 + $0x5c] sm:$0x1]  ;;  %s337_s26 = sand.u32 1, %s7527_s10  }
  0x2c   : > { %6232 = vmatprep.subr.bf16.mxu0 %v7166_v14  ;;  %6296 = vmatprep.subr.bf16.mxu1 %v7166_v14  ;;  %863 = vst [vmem:[#allocation2 + $0x30] sm:$0x1] %v862_v61  ;;  %s771_s24 = scalar_select %p770_p1, 1.0, 0.0  ;;  %vm916_vm6 = vsmask.f32 4368 }
  0x2d   : > { %v1181_v56 = vld [vmem:[#allocation2 + $0xc] sm:$0xf]  ;;  %vm7880_vm8 = vmor %vm847_vm1, %vm916_vm6  ;;  %vm1277_vm9 = vsmask.f32 3328  ;;  %vm1278_vm10 = vsmask.f32 7440 }
  0x2e   : > { %vm7934_vm11 = vmor %vm1277_vm9, %vm1278_vm10  ;;  %s841_s20 = scalar_select %p840_p2, 1.0, 0.0 }
  0x2f   : > { %6233 = vmatpush3.bf16.msra.mxu0 %v7167_v15  ;;  %6297 = vmatpush3.bf16.msra.mxu1 %v7167_v15  ;;  %s5660_s19 = sshll.u32 %s337_s26, 8  ;;  %s6219_s15 = sshll.u32 %s7535_s12, 6 }
  0x30   : > { %6234 = vmatprep.subr.bf16.mxu0 %v7168_v16  ;;  %6298 = vmatprep.subr.bf16.mxu1 %v7168_v16  ;;  %s9184_s14 = scalar_lea.vmem [#allocation3], %s5660_s19  ;;  %s6159_s17 = sshll.u32 %s7539_s13, 7 }
  0x31   : > { %s5570_s18 = sadd.s32 %s6219_s15, %s6159_s17  ;;  %s5573_s12 = sshll.u32 %s9184_s14, 4  ;;  %s9279_s12 = int_to_ptr.vmem [resolvable:$true] %s5573_s12 }
  0x32   : > { %s6160_s13 = sshll.u32 %s5570_s18, 6  ;;  %s7554_s25 = smov [#allocation3]  }
  0x33   : > { %6235 = vmatpush3.bf16.msra.mxu0 %v7169_v17  ;;  %6299 = vmatpush3.bf16.msra.mxu1 %v7169_v17  ;;  %s9285_s21 = scalar_lea.hbm %s9351_s9, %s6160_s13  ;;  %s7461_s0 = sshll.u32 %s7554_s25, 4  ;;  %s7462_s0 = int_to_ptr.vmem [resolvable:$false] %s7461_s0 }
  0x34   : > { %6306 = vmatprep.subr.bf16.mxu1 %v7681_v0  ;;  %6472 = vmatprep.subr.bf16.mxu0 %v7197_v20  ;;  %v894_v0 = vsel %vm7798_vm4, 0, %v893_v63  ;;  %s7463_s19 = scalar_lea.vmem %s7462_s0, 8192  ;;  %p7464_p7 = scmp.lt.s32.totalorder %s9279_s12, %s7462_s0 }
  0x35   : > { %895 = vst [vmem:[#allocation2 + $0x38] sm:$0x1] %v894_v0 }
  0x36   : > { %618 = vmatmul.mubr.bf16.vlgmr.msra.gmra.mrb[0].mxu0 %v7175_v19  ;;  %760 = vmatmul.mubr.bf16.vlgmr.msra.gmra.mrb[0].mxu1 %v7172_v18 }
  0x37   : > { %625 = vmatprep.mubr.bf16.mxu0 %v7176_v21  ;;  %6307 = vmatpush3.bf16.msra.mxu1 %v7687_v1  ;;  %v7207_v1 = vld [vmem:[%s9345_s3 + $0x78] sm:$0xff]  }
  0x38   : > { %6473 = vmatpush3.bf16.msra.mxu0 %v7197_v20  ;;  %6308 = vmatprep.subr.bf16.mxu1 %v7694_v2  ;;  %v864_v2 = vld [vmem:[#allocation2 + $0x3c] sm:$0x1] }
  0x39   : > { %6474 = vmatprep.subr.bf16.mxu0 %v7198_v43  ;;  %829 = vmatprep.mubr.bf16.mxu1 %v7204_v58 }
  0x3b   : > { %6309 = vmatpush3.bf16.msra.mxu1 %v7702_v3  ;;  %v865_v3 = vsel %vm7791_vm2, 0, %v864_v2 }
  0x3c   : > { %6310 = vmatprep.subr.bf16.mxu1 %v7710_v4  ;;  %6475 = vmatpush3.bf16.msra.mxu0 %v7198_v43  ;;  %866 = vst [vmem:[#allocation2 + $0x3c] sm:$0x1] %v865_v3  ;;  %v896_v4 = vld [vmem:[#allocation2 + $0x44] sm:$0x1] }
  0x3d   : > { %6476 = vmatprep.subr.bf16.mxu0 %v7199_v48 }
  0x3e   : > { %626 = vmatmul.mubr.bf16.gmra.mrb[4].mxu0 %v7178_v22 }
  0x3f   : > { %633 = vmatprep.mubr.bf16.mxu0 %v7179_v23  ;;  %6311 = vmatpush3.bf16.msra.mxu1 %v7719_v5  ;;  %v897_v5 = vsel %vm7798_vm4, 0, %v896_v4 }
  0x40   : > { %6312 = vmatprep.subr.bf16.mxu1 %v7160_v6  ;;  %6477 = vmatpush3.bf16.msra.mxu0 %v7199_v48  ;;  %898 = vst [vmem:[#allocation2 + $0x44] sm:$0x1] %v897_v5  ;;  %v867_v6 = vld [vmem:[#allocation2 + $0x48] sm:$0x1] }
  0x41   : > { %6478 = vmatprep.subr.bf16.mxu0 %v7200_v51 }
  0x43   : > { %6313 = vmatpush3.bf16.msra.mxu1 %v7161_v7  ;;  %v868_v7 = vsel %vm7791_vm2, 0, %v867_v6 }
  0x44   : > { %6314 = vmatprep.subr.bf16.mxu1 %v7162_v8  ;;  %6479 = vmatpush3.bf16.msra.mxu0 %v7200_v51  ;;  %869 = vst [vmem:[#allocation2 + $0x48] sm:$0x1] %v868_v7  ;;  %v899_v8 = vld [vmem:[#allocation2 + $0x50] sm:$0x1] }
  0x45   : > { %6480 = vmatprep.subr.bf16.mxu0 %v7201_v54 }
  0x46   : > { %634 = vmatmul.mubr.bf16.gmra.mrb[8].mxu0 %v7181_v24 }
  0x47   : > { %641 = vmatprep.mubr.bf16.mxu0 %v7182_v25  ;;  %6315 = vmatpush3.bf16.msra.mxu1 %v7163_v9  ;;  %v900_v9 = vsel %vm7798_vm4, 0, %v899_v8 }
  0x48   : > { %6316 = vmatprep.subr.bf16.mxu1 %v7164_v10  ;;  %6481 = vmatpush3.bf16.msra.mxu0 %v7201_v54  ;;  %901 = vst [vmem:[#allocation2 + $0x50] sm:$0x1] %v900_v9  ;;  %v870_v10 = vld [vmem:[#allocation2 + $0x54] sm:$0x1] }
  0x49   : > { %6482 = vmatprep.subr.bf16.mxu0 %v7205_v59  ;;  %v871_v11 = vsel %vm7791_vm2, 0, %v870_v10 }
  0x4a   : > { %872 = vst [vmem:[#allocation2 + $0x54] sm:$0x1] %v871_v11  ;;  %v1185_v11 = vld [vmem:[#allocation2 + $0x14] sm:$0x1] }
  0x4b   : > { %6317 = vmatpush3.bf16.msra.mxu1 %v7165_v13  ;;  %v903_v13 = vsel %vm7798_vm4, 0, %v902_v12 }
  0x4c   : > { %6318 = vmatprep.subr.bf16.mxu1 %v7166_v14  ;;  %6483 = vmatpush3.bf16.msra.mxu0 %v7205_v59  ;;  %904 = vst [vmem:[#allocation2 + $0x5c] sm:$0x1] %v903_v13  ;;  %v7859_v14 = vld [vmem:[%s9345_s3] sm:$0xff]  }
  0x4d   : > { %6484 = vmatprep.subr.bf16.mxu0 %v7206_v62 }
  0x4e   : > { %642 = vmatmul.mubr.bf16.gmra.mrb[12].mxu0 %v7184_v26 }
  0x4f   : > { %649 = vmatprep.mubr.bf16.mxu0 %v7185_v27  ;;  %6319 = vmatpush3.bf16.msra.mxu1 %v7167_v15 }
  0x50   : > { %6320 = vmatprep.subr.bf16.mxu1 %v7168_v16  ;;  %6485 = vmatpush3.bf16.msra.mxu0 %v7206_v62 }
  0x51   : > { %6486 = vmatprep.subr.bf16.mxu0 %v7207_v1 }
  0x53   : > { %6321 = vmatpush3.bf16.msra.mxu1 %v7169_v17  ;;  %v7866_v17 = vld [vmem:[%s9344_s2] ss:$0 sm:$0xff] }
  0x54   : > { %6487 = vmatpush3.bf16.msra.mxu0 %v7207_v1  ;;  %v940_v1 = vld [vmem:[#allocation2] sm:$0xf] }
  0x55   : > { %6504 = vmatprep.subr.bf16.mxu0 %v7859_v14 }
  0x56   : > { %650 = vmatmul.mubr.bf16.gmra.mrb[16].mxu0 %v7187_v28  ;;  %830 = vmatmul.mubr.bf16.vlgmr.msra.gmra.mrb[4].mxu1 %v7202_v57 }
  0x57   : > { %657 = vmatprep.mubr.bf16.mxu0 %v7188_v29 }
  0x5e   : > { %658 = vmatmul.mubr.bf16.gmra.mrb[20].mxu0 %v7190_v30  ;;  %v772_v30 = vstv %s771_s24  ;;  %s7457_s24 = scalar_lea.vmem %s9279_s12, 4096 }
  0x5f   : > { %665 = vmatprep.mubr.bf16.mxu0 %v7191_v31  ;;  %p7458_p4 = scmp.ne.s32.totalorder %s9279_s12, %s7457_s24  ;;  %p7465_p9 = scmp.lt.s32.totalorder %s7463_s19, %s7457_s24 }
  0x61   : > { %p7459_p5 = pnand %p7458_p4, %p7658_p3  ;;  %p7466_p10 = por %p7465_p9, %p7464_p7 }
  0x63   : > { %p7460_p6 = pneg %p7459_p5 }
  0x65   : > { %p7467_p11 = pnand %p7466_p10, %p7460_p6 }
  0x66   : > { %666 = vmatmul.mubr.bf16.gmra.mrb[24].mxu0 %v7193_v32 }
  0x67   : > { %673 = vmatprep.mubr.bf16.mxu0 %v7194_v33 }
  0x6e   : > { %674 = vmatmul.mubr.bf16.gmra.mrb[28].mxu0 %v7196_v34 }
 0x109   : > { %v6236_v15 = vpop.f32.mrb[0].mxu0  ;;  %v6300_v16 = vpop.f32.mrb[0].mxu1 }
 0x10a   : > { %v6237_v18 = vpop.f32.mrb[1].mxu0  ;;  %v6301_v19 = vpop.f32.mrb[1].mxu1 }
 0x10b   : > { %v6238_v20 = vadd.f32 %v6237_v18, %v6236_v15  ;;  %v6302_v21 = vadd.f32 %v6301_v19, %v6300_v16  ;;  %v6239_v22 = vpop.f32.mrb[2].mxu0  ;;  %v6303_v23 = vpop.f32.mrb[2].mxu1 }
 0x10c   : > { %v6240_v24 = vpop.f32.mrb[3].mxu0  ;;  %v6304_v25 = vpop.f32.mrb[3].mxu1 }
 0x10d   : > { %v620_v26 = vadd.f32 %v6238_v20, %v7866_v17  ;;  %v762_v27 = vadd.f32 %v6302_v21, %v7866_v17  ;;  %v6241_v28 = vadd.f32 %v6240_v24, %v6239_v22  ;;  %v6305_v29 = vadd.f32 %v6304_v25, %v6303_v23  ;;  %v944_v22 = vld [vmem:[#allocation2 + $0x8] sm:$0x1] }
 0x10f   : > { %v682_v31 = vmax.f32 %v620_v26, 0.0  ;;  %v768_v32 = vmax.f32 %v762_v27, 0.0  ;;  %v623_v33 = vadd.f32 %v6241_v28, %v7866_v17  ;;  %v765_v34 = vadd.f32 %v6305_v29, %v7866_v17 }
 0x111   : > { %v6171_v36 = vpack.c.bf16 %v682_v31, %v682_v31  ;;  %v773_v37 = vmul.f32 %v772_v30, %v768_v32  ;;  %v683_v39 = vmax.f32 %v623_v33, 0.0  ;;  %v769_v40 = vmax.f32 %v765_v34, 0.0  ;;  %v6242_v41 = vpop.f32.mrb[4].mxu0  ;;  %v873_v34 = vld [vmem:[#allocation2 + $0x60] sm:$0x1] }
 0x112   : > { %v6243_v42 = vpop.f32.mrb[5].mxu0 }
 0x113   : > { %v1021_v43 = vshrl.u32 %v6171_v36, 16  ;;  %v6167_v44 = vpack.c.bf16 %v773_v37, %v773_v37  ;;  %v6172_v45 = vpack.c.bf16 %v683_v39, %v683_v39  ;;  %v6245_v46 = vpop.f32.mrb[6].mxu0  ;;  %v1024_v47 = vshll.u32 %v6171_v36, 16 }
 0x114   : > { %v774_v48 = vmul.f32 %v772_v30, %v769_v40  ;;  %v6244_v49 = vadd.f32 %v6243_v42, %v6242_v41  ;;  %v6246_v50 = vpop.f32.mrb[7].mxu0  ;;  %v874_v40 = vsel %vm7791_vm2, 0, %v873_v34  ;;  %v1188_v41 = vld [vmem:[#allocation2 + $0x18] sm:$0xf] }
 0x115   : > { %v1023_v51 = vrot.slane %v1021_v43, 7  ;;  %v919_v52 = vshrl.u32 %v6167_v44, 16  ;;  %v922_v53 = vshll.u32 %v6167_v44, 16  ;;  %v1029_v54 = vshrl.u32 %v6172_v45, 16  ;;  %875 = vst [vmem:[#allocation2 + $0x60] sm:$0x1] %v874_v40 }
 0x116   : > { %v1032_v57 = vshll.u32 %v6172_v45, 16  ;;  %v6168_v58 = vpack.c.bf16 %v774_v48, %v774_v48  ;;  %v628_v59 = vadd.f32 %v6244_v49, %v7866_v17  ;;  %v6247_v60 = vadd.f32 %v6246_v50, %v6245_v46 }
 0x117   : > { %v1026_v61 = vor.u32 %v1024_v47, %v1023_v51  ;;  %v1027_v62 = vrot.slane %v1023_v51, 4  ;;  %v921_v63 = vrot.slane %v919_v52, 7  ;;  %v1031_v0 = vrot.slane %v1029_v54, 7  ;;  %v1192_v54 = vld [vmem:[#allocation2 + $0x20] sm:$0x1] }
 0x118   : > { %v927_v3 = vshrl.u32 %v6168_v58, 16  ;;  %v930_v4 = vshll.u32 %v6168_v58, 16  ;;  %v684_v5 = vmax.f32 %v628_v59, 0.0  ;;  %v631_v6 = vadd.f32 %v6247_v60, %v7866_v17 }
 0x119   : > { %v1182_v7 = vsel %vm7873_vm7, %v1026_v61, %v1181_v56  ;;  %v924_v8 = vor.u32 %v922_v53, %v921_v63  ;;  %v925_v9 = vrot.slane %v921_v63, 4  ;;  %v1034_v10 = vor.u32 %v1032_v57, %v1031_v0  ;;  %v6248_v12 = vpop.f32.mrb[8].mxu0 }
 0x11a   : > { %1183 = vst [vmem:[#allocation2 + $0xc] sm:$0xf] %v1182_v7  ;;  %v1036_v13 = vrot.slane %v1031_v0, 4  ;;  %v929_v15 = vrot.slane %v927_v3, 7  ;;  %v6173_v16 = vpack.c.bf16 %v684_v5, %v684_v5  ;;  %v685_v18 = vmax.f32 %v631_v6, 0.0  ;;  %v6249_v19 = vpop.f32.mrb[9].mxu0 }
 0x11b   : > { %v941_v20 = vsel %vm7873_vm7, %v924_v8, %v940_v1  ;;  %v1035_v21 = vsel %vm7880_vm8, %v1027_v62, %v1034_v10  ;;  %v6250_v23 = vadd.f32 %v6249_v19, %v6248_v12  ;;  %v6251_v24 = vpop.f32.mrb[10].mxu0  ;;  %v1195_v10 = vld [vmem:[#allocation2 + $0x24] sm:$0xf] }
 0x11c   : > { %942 = vst [vmem:[#allocation2] sm:$0xf] %v941_v20  ;;  %1184 = vst [vmem:[#allocation2 + $0x10] sm:$0xf] %v1035_v21  ;;  %v1186_v25 = vsel %vm7791_vm2, %v1036_v13, %v1185_v11  ;;  %v932_v26 = vor.u32 %v930_v4, %v929_v15  ;;  %v934_v27 = vrot.slane %v929_v15, 4  ;;  %v1038_v28 = vshrl.u32 %v6173_v16, 16 }
 0x11d   : > { %v6252_v29 = vpop.f32.mrb[11].mxu0  ;;  %1187 = vst [vmem:[#allocation2 + $0x14] sm:$0x1] %v1186_v25  ;;  %v1041_v30 = vshll.u32 %v6173_v16, 16  ;;  %v6174_v31 = vpack.c.bf16 %v685_v18, %v685_v18  ;;  %v636_v32 = vadd.f32 %v6250_v23, %v7866_v17  ;;  %v1199_v21 = vld [vmem:[#allocation2 + $0x2c] sm:$0x1] }
 0x11e   : > { %v6253_v33 = vadd.f32 %v6252_v29, %v6251_v24  ;;  %v933_v36 = vsel %vm7880_vm8, %v925_v9, %v932_v26  ;;  %v945_v37 = vsel %vm7791_vm2, %v934_v27, %v944_v22  ;;  %v1040_v39 = vrot.slane %v1038_v28, 7 }
 0x11f   : > { %943 = vst [vmem:[#allocation2 + $0x4] sm:$0xf] %v933_v36  ;;  %946 = vst [vmem:[#allocation2 + $0x8] sm:$0x1] %v945_v37  ;;  %v1046_v42 = vshrl.u32 %v6174_v31, 16  ;;  %v686_v43 = vmax.f32 %v636_v32, 0.0 }
 0x120   : > { %v639_v44 = vadd.f32 %v6253_v33, %v7866_v17  ;;  %v1043_v45 = vor.u32 %v1041_v30, %v1040_v39  ;;  %v1049_v47 = vshll.u32 %v6174_v31, 16  ;;  %v1044_v52 = vrot.slane %v1040_v39, 4 }
 0x121   : > { %v1048_v46 = vrot.slane %v1046_v42, 7  ;;  %v6175_v48 = vpack.c.bf16 %v686_v43, %v686_v43  ;;  %v6254_v50 = vpop.f32.mrb[12].mxu0  ;;  %v7901_v51 = vld [vmem:[#allocation2 + $0xc] sm:$0xf] }
 0x122   : > { %v687_v49 = vmax.f32 %v639_v44, 0.0  ;;  %v1189_v53 = vsel %vm7873_vm7, %v1043_v45, %v1188_v41  ;;  %v6255_v56 = vpop.f32.mrb[13].mxu0  ;;  %v1305_v57 = vshrl.u32 %v7901_v51, 16  ;;  %v1308_v58 = vshll.u32 %v7901_v51, 16 }
 0x123   : > { %1190 = vst [vmem:[#allocation2 + $0x18] sm:$0xf] %v1189_v53  ;;  %v1051_v59 = vor.u32 %v1049_v47, %v1048_v46  ;;  %v1053_v60 = vrot.slane %v1048_v46, 4  ;;  %v1055_v61 = vshrl.u32 %v6175_v48, 16  ;;  %v1058_v62 = vshll.u32 %v6175_v48, 16  ;;  %v6257_v63 = vpop.f32.mrb[14].mxu0 }
 0x124   : > { %v7907_v0 = vld [vmem:[#allocation2] sm:$0xf]  ;;  %v6176_v1 = vpack.c.bf16 %v687_v49, %v687_v49  ;;  %v6256_v3 = vadd.f32 %v6255_v56, %v6254_v50  ;;  %v6258_v4 = vpop.f32.mrb[15].mxu0  ;;  %v1202_v50 = vld [vmem:[#allocation2 + $0x30] sm:$0xf] }
 0x125   : > { %v1281_v5 = vshrl.u32 %v7907_v0, 16  ;;  %v1284_v6 = vshll.u32 %v7907_v0, 16  ;;  %v1052_v7 = vsel %vm7880_vm8, %v1044_v52, %v1051_v59  ;;  %v1193_v8 = vsel %vm7791_vm2, %v1053_v60, %v1192_v54 }
 0x126   : > { %v1057_v9 = vrot.slane %v1055_v61, 7  ;;  %v6259_v11 = vadd.f32 %v6258_v4, %v6257_v63  ;;  %1191 = vst [vmem:[#allocation2 + $0x1c] sm:$0xf] %v1052_v7  ;;  %1194 = vst [vmem:[#allocation2 + $0x20] sm:$0x1] %v1193_v8  ;;  %v1063_v12 = vshrl.u32 %v6176_v1, 16  ;;  %v644_v15 = vadd.f32 %v6256_v3, %v7866_v17 }
 0x127   : > { %v1066_v13 = vshll.u32 %v6176_v1, 16  ;;  %v7916_v16 = vld [vmem:[#allocation2 + $0x4] sm:$0xf]  ;;  %v7918_v18 = vld [vmem:[#allocation2 + $0x8] sm:$0x1]  ;;  %v1283_v23 = vrot.slane %v1281_v5, 4 }
 0x128   : > { %v1060_v19 = vor.u32 %v1058_v62, %v1057_v9  ;;  %v1061_v20 = vrot.slane %v1057_v9, 4  ;;  %v647_v22 = vadd.f32 %v6259_v11, %v7866_v17  ;;  %v1065_v24 = vrot.slane %v1063_v12, 7  ;;  %v7938_v5 = vld [vmem:[#allocation2 + $0x10] sm:$0xf]  ;;  %v1206_v9 = vld [vmem:[#allocation2 + $0x38] sm:$0x1] }
 0x129   : > { %v688_v25 = vmax.f32 %v644_v15, 0.0  ;;  %v1286_v26 = vrot.slane %v1284_v6, 5  ;;  %v1290_v27 = vshll.u32 %v7916_v16, 16  ;;  %v6260_v30 = vpop.f32.mrb[16].mxu0  ;;  %v1294_v31 = vshrl.u32 %v7916_v16, 16 }
 0x12a   : > { %v1196_v28 = vsel %vm7873_vm7, %v1060_v19, %v1195_v10  ;;  %v689_v29 = vmax.f32 %v647_v22, 0.0  ;;  %v1300_v32 = vshll.u32 %v7918_v18, 16  ;;  %v1068_v33 = vor.u32 %v1066_v13, %v1065_v24  ;;  %v6261_v37 = vpop.f32.mrb[17].mxu0 }
 0x12b   : > { %1197 = vst [vmem:[#allocation2 + $0x24] sm:$0xf] %v1196_v28  ;;  %v1070_v34 = vrot.slane %v1065_v24, 4  ;;  %v6177_v36 = vpack.c.bf16 %v688_v25, %v688_v25  ;;  %v1287_v39 = vor.u32 %v1286_v26, %v1283_v23  ;;  %v6262_v41 = vadd.f32 %v6261_v37, %v6260_v30  ;;  %v6263_v42 = vpop.f32.mrb[18].mxu0 }
 0x12c   : > { %v6178_v40 = vpack.c.bf16 %v689_v29, %v689_v29  ;;  %v1292_v43 = vrot.slane %v1290_v27, 5  ;;  %v1296_v44 = vrot.slane %v1294_v31, 4  ;;  %v1069_v45 = vsel %vm7880_vm8, %v1061_v20, %v1068_v33  ;;  %v6264_v49 = vpop.f32.mrb[19].mxu0  ;;  %v1209_v31 = vld [vmem:[#allocation2 + $0x3c] sm:$0xf] }
 0x12d   : > { %v1200_v46 = vsel %vm7791_vm2, %v1070_v34, %v1199_v21  ;;  %v1072_v47 = vshrl.u32 %v6177_v36, 16  ;;  %v1075_v48 = vshll.u32 %v6177_v36, 16  ;;  %1198 = vst [vmem:[#allocation2 + $0x28] sm:$0xf] %v1069_v45  ;;  %v652_v54 = vadd.f32 %v6262_v41, %v7866_v17 }
 0x12e   : > { %1201 = vst [vmem:[#allocation2 + $0x2c] sm:$0x1] %v1200_v46  ;;  %v1080_v52 = vshrl.u32 %v6178_v40, 16  ;;  %v1083_v53 = vshll.u32 %v6178_v40, 16  ;;  %v6265_v56 = vadd.f32 %v6264_v49, %v6263_v42  ;;  %v1288_v60 = vrot.slane %v1287_v39, 4 }
 0x12f   : > { %v1074_v59 = vrot.slane %v1072_v47, 7  ;;  %v1297_v61 = vor.u32 %v1296_v44, %v1292_v43  ;;  %v1302_v62 = vrot.slane %v1300_v32, 5  ;;  %v690_v1 = vmax.f32 %v652_v54, 0.0  ;;  %v7960_v46 = vld [vmem:[#allocation2 + $0x18] sm:$0xf] }
 0x130   : > { %v1082_v63 = vrot.slane %v1080_v52, 7  ;;  %v655_v3 = vadd.f32 %v6265_v56, %v7866_v17  ;;  %v1307_v6 = vrot.slane %v1305_v57, 4  ;;  %v1293_v10 = vsel %vm7934_vm11, %v1288_v60, %v1292_v43  ;;  %v7948_v57 = vld [vmem:[#allocation2 + $0x14] sm:$0x1] }
 0x131   : > { %v1077_v7 = vor.u32 %v1075_v48, %v1074_v59  ;;  %v1078_v8 = vrot.slane %v1074_v59, 4  ;;  %v1298_v11 = vrot.slane %v1297_v61, 4  ;;  %v6179_v15 = vpack.c.bf16 %v690_v1, %v690_v1  ;;  %v6266_v20 = vpop.f32.mrb[20].mxu0  ;;  %v7964_v59 = vld [vmem:[#allocation2 + $0x1c] sm:$0xf] }
 0x132   : > { %v1085_v12 = vor.u32 %v1083_v53, %v1082_v63  ;;  %v1087_v13 = vrot.slane %v1082_v63, 4  ;;  %v691_v19 = vmax.f32 %v655_v3, 0.0  ;;  %v6267_v23 = vpop.f32.mrb[21].mxu0  ;;  %v1310_v24 = vrot.slane %v1308_v58, 5  ;;  %v1213_v61 = vld [vmem:[#allocation2 + $0x44] sm:$0x1] }
 0x133   : > { %v1203_v21 = vsel %vm7873_vm7, %v1077_v7, %v1202_v50  ;;  %v1303_v22 = vsel %vm7934_vm11, %v1298_v11, %v1302_v62  ;;  %v1314_v25 = vshll.u32 %v7938_v5, 16  ;;  %v1089_v28 = vshrl.u32 %v6179_v15, 16  ;;  %v6269_v30 = vpop.f32.mrb[22].mxu0 }
 0x134   : > { %1204 = vst [vmem:[#allocation2 + $0x30] sm:$0xf] %v1203_v21  ;;  %v1086_v26 = vsel %vm7880_vm8, %v1078_v8, %v1085_v12  ;;  %v1207_v27 = vsel %vm7791_vm2, %v1087_v13, %v1206_v9  ;;  %v1092_v29 = vshll.u32 %v6179_v15, 16  ;;  %v6180_v32 = vpack.c.bf16 %v691_v19, %v691_v19  ;;  %v6270_v58 = vpop.f32.mrb[23].mxu0 }
 0x135   : > { %1205 = vst [vmem:[#allocation2 + $0x34] sm:$0xf] %v1086_v26  ;;  %1208 = vst [vmem:[#allocation2 + $0x38] sm:$0x1] %v1207_v27  ;;  %v5747_v33 = vcombine.low %v1293_v10, %v1303_v22  ;;  %v6268_v34 = vadd.f32 %v6267_v23, %v6266_v20  ;;  %v1311_v36 = vor.u32 %v1310_v24, %v1307_v6  ;;  %v1091_v37 = vrot.slane %v1089_v28, 7 }
 0x136   : > { %v1316_v39 = vrot.slane %v1314_v25, 5  ;;  %v1318_v40 = vshrl.u32 %v7938_v5, 16  ;;  %v1324_v41 = vshll.u32 %v7948_v57, 16  ;;  %v1097_v42 = vshrl.u32 %v6180_v32, 16  ;;  %v7971_v10 = vld [vmem:[#allocation2 + $0x20] sm:$0x1] }
 0x137   : > { %v1100_v43 = vshll.u32 %v6180_v32, 16  ;;  %6488 = vmatprep.mubr.bf16.mxu0 %v5747_v33  ;;  %v660_v44 = vadd.f32 %v6268_v34, %v7866_v17  ;;  %v1312_v45 = vrot.slane %v1311_v36, 4  ;;  %v1094_v47 = vor.u32 %v1092_v29, %v1091_v37  ;;  %v7209_v34 = vld [vmem:[%s9345_s3 + $0x8] sm:$0xff]  }
 0x138   : > { %v1095_v48 = vrot.slane %v1091_v37, 4  ;;  %v1320_v49 = vrot.slane %v1318_v40, 4  ;;  %v1326_v50 = vrot.slane %v1324_v41, 5  ;;  %v1099_v52 = vrot.slane %v1097_v42, 7  ;;  %v1216_v36 = vld [vmem:[#allocation2 + $0x48] sm:$0xf] }
 0x139   : > { %v692_v53 = vmax.f32 %v660_v44, 0.0  ;;  %v1317_v54 = vsel %vm7934_vm11, %v1312_v45, %v1316_v39  ;;  %v6271_v56 = vadd.f32 %v6270_v58, %v6269_v30  ;;  %v1210_v60 = vsel %vm7873_vm7, %v1094_v47, %v1209_v31  ;;  %v6272_v3 = vpop.f32.mrb[24].mxu0  ;;  %v7985_v41 = vld [vmem:[#allocation2 + $0x24] sm:$0xf]  ;;  %v7987_v47 = vld [vmem:[#allocation2 + $0x28] sm:$0xf] }
 0x13a   : > { %v1321_v62 = vor.u32 %v1320_v49, %v1316_v39  ;;  %v1329_v63 = vshrl.u32 %v7960_v46, 16  ;;  %v1332_v1 = vshll.u32 %v7960_v46, 16  ;;  %1211 = vst [vmem:[#allocation2 + $0x3c] sm:$0xf] %v1210_v60  ;;  %v1102_v6 = vor.u32 %v1100_v43, %v1099_v52  ;;  %v6273_v11 = vpop.f32.mrb[25].mxu0 }
 0x13b   : > { %v1104_v7 = vrot.slane %v1099_v52, 4  ;;  %v6181_v8 = vpack.c.bf16 %v692_v53, %v692_v53  ;;  %v663_v9 = vadd.f32 %v6271_v56, %v7866_v17  ;;  %v1338_v19 = vshll.u32 %v7964_v59, 16  ;;  %v6275_v20 = vpop.f32.mrb[26].mxu0 }
 0x13c   : > { %v1322_v12 = vrot.slane %v1321_v62, 4  ;;  %v1331_v13 = vrot.slane %v1329_v63, 4  ;;  %v1334_v15 = vrot.slane %v1332_v1, 5  ;;  %v1103_v21 = vsel %vm7880_vm8, %v1095_v48, %v1102_v6  ;;  %v6276_v25 = vpop.f32.mrb[27].mxu0  ;;  %v7210_v62 = vld [vmem:[%s9345_s3 + $0x10] sm:$0xff]  }
 0x13d   : > { %v1214_v22 = vsel %vm7791_vm2, %v1104_v7, %v1213_v61  ;;  %v1106_v23 = vshrl.u32 %v6181_v8, 16  ;;  %v1109_v24 = vshll.u32 %v6181_v8, 16  ;;  %1212 = vst [vmem:[#allocation2 + $0x40] sm:$0xf] %v1103_v21  ;;  %v693_v27 = vmax.f32 %v663_v9, 0.0 }
 0x13e   : > { %1215 = vst [vmem:[#allocation2 + $0x44] sm:$0x1] %v1214_v22  ;;  %v1327_v26 = vsel %vm7934_vm11, %v1322_v12, %v1326_v50  ;;  %v1335_v28 = vor.u32 %v1334_v15, %v1331_v13  ;;  %v1340_v29 = vrot.slane %v1338_v19, 5  ;;  %v1342_v32 = vshrl.u32 %v7964_v59, 16  ;;  %v8006_v9 = vld [vmem:[#allocation2 + $0x2c] sm:$0x1] }
 0x13f   : > { %v1108_v30 = vrot.slane %v1106_v23, 7  ;;  %v5748_v31 = vcombine.low %v1317_v54, %v1327_v26  ;;  %v1348_v33 = vshll.u32 %v7971_v10, 16  ;;  %v6182_v58 = vpack.c.bf16 %v693_v27, %v693_v27  ;;  %v1220_v54 = vld [vmem:[#allocation2 + $0x50] sm:$0x1]  ;;  %v7211_v27 = vld [vmem:[%s9345_s3 + $0x18] sm:$0xff]  }
 0x140   : > { %v1336_v37 = vrot.slane %v1335_v28, 4  ;;  %v6274_v39 = vadd.f32 %v6273_v11, %v6272_v3  ;;  %v6277_v40 = vadd.f32 %v6276_v25, %v6275_v20  ;;  %v1344_v44 = vrot.slane %v1342_v32, 4  ;;  %v8009_v21 = vld [vmem:[#allocation2 + $0x30] sm:$0xf] }
 0x141   : > { %v1111_v42 = vor.u32 %v1109_v24, %v1108_v30  ;;  %v1112_v43 = vrot.slane %v1108_v30, 4  ;;  %6489 = vmatmul.mubr.bf16.vlgmr.msra.gmra.mrb[32].mxu0 %v5748_v31  ;;  %v1350_v45 = vrot.slane %v1348_v33, 5  ;;  %v1114_v48 = vshrl.u32 %v6182_v58, 16  ;;  %v8000_v63 = vpop.f32.mrb[28].mxu0  ;;  %v8024_v33 = vld [vmem:[#allocation2 + $0x34] sm:$0xf] }
 0x142   : > { %v1117_v49 = vshll.u32 %v6182_v58, 16  ;;  %v1341_v50 = vsel %vm7934_vm11, %v1336_v37, %v1340_v29  ;;  %v668_v52 = vadd.f32 %v6274_v39, %v7866_v17  ;;  %6505 = vmatpush3.bf16.msra.mxu0 %v7859_v14  ;;  %v1345_v56 = vor.u32 %v1344_v44, %v1340_v29  ;;  %v8004_v7 = vpop.f32.mrb[29].mxu0 }
 0x143   : > { %v1217_v53 = vsel %vm7873_vm7, %v1111_v42, %v1216_v36  ;;  %v671_v60 = vadd.f32 %v6277_v40, %v7866_v17  ;;  %v1353_v61 = vshrl.u32 %v7985_v41, 16  ;;  %6506 = vmatprep.subr.bf16.mxu0 %v7209_v34  ;;  %v1116_v1 = vrot.slane %v1114_v48, 7  ;;  %v8011_v22 = vpop.f32.mrb[30].mxu0  ;;  %v1223_v36 = vld [vmem:[#allocation2 + $0x54] sm:$0xf] }
 0x144   : > { %1218 = vst [vmem:[#allocation2 + $0x48] sm:$0xf] %v1217_v53  ;;  %v694_v3 = vmax.f32 %v668_v52, 0.0  ;;  %v1356_v14 = vshll.u32 %v7985_v41, 16  ;;  %v1362_v6 = vshll.u32 %v7987_v47, 16  ;;  %v1346_v8 = vrot.slane %v1345_v56, 4 }
 0x145   : > { %v695_v17 = vmax.f32 %v671_v60, 0.0  ;;  %v1355_v11 = vrot.slane %v1353_v61, 4  ;;  %v1366_v12 = vshrl.u32 %v7987_v47, 16  ;;  %v1119_v13 = vor.u32 %v1117_v49, %v1116_v1  ;;  %v8018_v28 = vpop.f32.mrb[31].mxu0  ;;  %v1227_v42 = vld [vmem:[#allocation2 + $0x5c] sm:$0x1] }
 0x146   : > { %v1121_v15 = vrot.slane %v1116_v1, 4  ;;  %v6183_v19 = vpack.c.bf16 %v694_v3, %v694_v3  ;;  %v1358_v20 = vrot.slane %v1356_v14, 5  ;;  %6507 = vmatpush3.bf16.msra.mxu0 %v7209_v34  ;;  %v1351_v23 = vsel %vm7934_vm11, %v1346_v8, %v1350_v45  ;;  %v7212_v53 = vld [vmem:[%s9345_s3 + $0x20] sm:$0xff]   ;;  %v8033_v1 = vld [vmem:[#allocation2 + $0x38] sm:$0x1] }
 0x147   : > { %v6184_v24 = vpack.c.bf16 %v695_v17, %v695_v17  ;;  %v1364_v25 = vrot.slane %v1362_v6, 5  ;;  %v1368_v26 = vrot.slane %v1366_v12, 4  ;;  %6508 = vmatprep.subr.bf16.mxu0 %v7210_v62  ;;  %v1120_v29 = vsel %vm7880_vm8, %v1112_v43, %v1119_v13  ;;  %v8037_v8 = vld [vmem:[#allocation2 + $0x3c] sm:$0xf] }
 0x148   : > { %v1221_v30 = vsel %vm7791_vm2, %v1121_v15, %v1220_v54  ;;  %v5749_v31 = vcombine.low %v1341_v50, %v1351_v23  ;;  %v1123_v32 = vshrl.u32 %v6183_v19, 16  ;;  %1219 = vst [vmem:[#allocation2 + $0x4c] sm:$0xf] %v1120_v29  ;;  %v1126_v34 = vshll.u32 %v6183_v19, 16  ;;  %v8043_v15 = vld [vmem:[#allocation2 + $0x40] sm:$0xf] }
 0x149   : > { %1222 = vst [vmem:[#allocation2 + $0x50] sm:$0x1] %v1221_v30  ;;  %v1131_v58 = vshrl.u32 %v6184_v24, 16  ;;  %v1134_v37 = vshll.u32 %v6184_v24, 16  ;;  %v1359_v39 = vor.u32 %v1358_v20, %v1355_v11  ;;  %v1369_v44 = vor.u32 %v1368_v26, %v1364_v25  ;;  %v8045_v19 = vld [vmem:[#allocation2 + $0x44] sm:$0x1] }
 0x14a   : > { %6492 = vmatprep.mubr.bf16.mxu0 %v5749_v31  ;;  %v1125_v40 = vrot.slane %v1123_v32, 7  ;;  %v1372_v43 = vshll.u32 %v8006_v9, 16  ;;  %v1377_v45 = vshrl.u32 %v8009_v21, 16  ;;  %6509 = vmatpush3.bf16.msra.mxu0 %v7210_v62  ;;  %v1380_v50 = vshll.u32 %v8009_v21, 16  ;;  %v7213_v26 = vld [vmem:[%s9345_s3 + $0x28] sm:$0xff]  }
 0x14b   : > { %v1133_v48 = vrot.slane %v1131_v58, 7  ;;  %v1360_v49 = vrot.slane %v1359_v39, 4  ;;  %v1386_v52 = vshll.u32 %v8024_v33, 16  ;;  %6510 = vmatprep.subr.bf16.mxu0 %v7211_v27  ;;  %v1370_v60 = vrot.slane %v1369_v44, 4  ;;  %v8058_v32 = vld [vmem:[#allocation2 + $0x48] sm:$0xf] }
 0x14c   : > { %v1128_v54 = vor.u32 %v1126_v34, %v1125_v40  ;;  %v1129_v56 = vrot.slane %v1125_v40, 4  ;;  %v1374_v61 = vrot.slane %v1372_v43, 5  ;;  %v1379_v6 = vrot.slane %v1377_v45, 4 }
 0x14d   : > { %v1136_v3 = vor.u32 %v1134_v37, %v1133_v48  ;;  %v1138_v14 = vrot.slane %v1133_v48, 4  ;;  %v1365_v62 = vsel %vm7934_vm11, %v1360_v49, %v1364_v25  ;;  %v1382_v12 = vrot.slane %v1380_v50, 5 }
 0x14e   : > { %v1224_v17 = vsel %vm7873_vm7, %v1128_v54, %v1223_v36  ;;  %v1375_v11 = vsel %vm7934_vm11, %v1370_v60, %v1374_v61  ;;  %v1388_v13 = vrot.slane %v1386_v52, 5  ;;  %6511 = vmatpush3.bf16.msra.mxu0 %v7211_v27  ;;  %v1390_v25 = vshrl.u32 %v8024_v33, 16  ;;  %v7214_v54 = vld [vmem:[%s9345_s3 + $0x30] sm:$0xff]  }
 0x14f   : > { %1225 = vst [vmem:[#allocation2 + $0x54] sm:$0xf] %v1224_v17  ;;  %v1137_v20 = vsel %vm7880_vm8, %v1129_v56, %v1136_v3  ;;  %v1228_v23 = vsel %vm7791_vm2, %v1138_v14, %v1227_v42  ;;  %v5750_v24 = vcombine.low %v1365_v62, %v1375_v11  ;;  %6512 = vmatprep.subr.bf16.mxu0 %v7212_v53  ;;  %v1396_v27 = vshll.u32 %v8033_v1, 16  ;;  %v8063_v39 = vld [vmem:[#allocation2 + $0x4c] sm:$0xf] }
 0x150   : > { %1226 = vst [vmem:[#allocation2 + $0x58] sm:$0xf] %v1137_v20  ;;  %1229 = vst [vmem:[#allocation2 + $0x5c] sm:$0x1] %v1228_v23  ;;  %v1383_v29 = vor.u32 %v1382_v12, %v1379_v6  ;;  %v1401_v30 = vshrl.u32 %v8037_v8, 16  ;;  %v1404_v31 = vshll.u32 %v8037_v8, 16 }
 0x151   : > { %6493 = vmatmul.mubr.bf16.gmra.mrb[36].mxu0 %v5750_v24  ;;  %v1392_v34 = vrot.slane %v1390_v25, 4  ;;  %v1410_v36 = vshll.u32 %v8043_v15, 16  ;;  %v1414_v58 = vshrl.u32 %v8043_v15, 16  ;;  %v1420_v37 = vshll.u32 %v8045_v19, 16  ;;  %v8065_v52 = vld [vmem:[#allocation2 + $0x50] sm:$0x1] }
 0x152   : > { %v1384_v40 = vrot.slane %v1383_v29, 4  ;;  %v1398_v42 = vrot.slane %v1396_v27, 5  ;;  %v1403_v44 = vrot.slane %v1401_v30, 4  ;;  %v1406_v43 = vrot.slane %v1404_v31, 5  ;;  %6513 = vmatpush3.bf16.msra.mxu0 %v7212_v53  ;;  %v7216_v30 = vld [vmem:[%s9345_s3 + $0x38] sm:$0xff]  }
 0x153   : > { %v1393_v45 = vor.u32 %v1392_v34, %v1388_v13  ;;  %v1412_v48 = vrot.slane %v1410_v36, 5  ;;  %v1416_v49 = vrot.slane %v1414_v58, 4  ;;  %v1422_v50 = vrot.slane %v1420_v37, 5  ;;  %6514 = vmatprep.subr.bf16.mxu0 %v7213_v26 }
 0x154   : > { %v1389_v56 = vsel %vm7934_vm11, %v1384_v40, %v1388_v13  ;;  %v1407_v60 = vor.u32 %v1406_v43, %v1403_v44  ;;  %v1425_v61 = vshrl.u32 %v8058_v32, 16  ;;  %v1428_v3 = vshll.u32 %v8058_v32, 16 }
 0x155   : > { %v1394_v53 = vrot.slane %v1393_v45, 4  ;;  %v1417_v14 = vor.u32 %v1416_v49, %v1412_v48  ;;  %v1434_v62 = vshll.u32 %v8063_v39, 16  ;;  %v1438_v6 = vshrl.u32 %v8063_v39, 16 }
 0x156   : > { %v1408_v17 = vrot.slane %v1407_v60, 4  ;;  %v1427_v11 = vrot.slane %v1425_v61, 4  ;;  %v1430_v12 = vrot.slane %v1428_v3, 5  ;;  %v1444_v20 = vshll.u32 %v8065_v52, 16  ;;  %6515 = vmatpush3.bf16.msra.mxu0 %v7213_v26  ;;  %v8077_v23 = vld [vmem:[#allocation2 + $0x54] sm:$0xf] }
 0x157   : > { %v1399_v13 = vsel %vm7934_vm11, %v1394_v53, %v1398_v42  ;;  %v1418_v24 = vrot.slane %v1417_v14, 4  ;;  %v1436_v25 = vrot.slane %v1434_v62, 5  ;;  %v1440_v29 = vrot.slane %v1438_v6, 4  ;;  %6516 = vmatprep.subr.bf16.mxu0 %v7214_v54  ;;  %v8081_v27 = vld [vmem:[#allocation2 + $0x58] sm:$0xf] }
 0x158   : > { %v5751_v31 = vcombine.low %v1389_v56, %v1399_v13  ;;  %v1413_v34 = vsel %vm7934_vm11, %v1408_v17, %v1412_v48  ;;  %v1431_v26 = vor.u32 %v1430_v12, %v1427_v11  ;;  %v1446_v36 = vrot.slane %v1444_v20, 5  ;;  %v8088_v58 = vld [vmem:[#allocation2 + $0x5c] sm:$0x1]  ;;  %v1859_v17 = vld [vmem:[#allocation2] sm:$0xe] }
 0x159   : > { %v1423_v37 = vsel %vm7934_vm11, %v1418_v24, %v1422_v50  ;;  %v1441_v40 = vor.u32 %v1440_v29, %v1436_v25  ;;  %v1449_v42 = vshrl.u32 %v8077_v23, 16  ;;  %v1452_v44 = vshll.u32 %v8077_v23, 16  ;;  %v8100_v50 = vld [vmem:[%s9345_s3 + $0x80] sm:$0xff]   ;;  %v1860_v20 = vld [vmem:[#allocation2 + $0xc] sm:$0xe] }
 0x15a   : > { %6496 = vmatprep.mubr.bf16.mxu0 %v5751_v31  ;;  %v5752_v43 = vcombine.low %v1413_v34, %v1423_v37  ;;  %v1432_v45 = vrot.slane %v1431_v26, 4  ;;  %v1458_v49 = vshll.u32 %v8081_v27, 16  ;;  %v1462_v56 = vshrl.u32 %v8081_v27, 16  ;;  %6517 = vmatpush3.bf16.msra.mxu0 %v7214_v54 }
 0x15b   : > { %v1442_v48 = vrot.slane %v1441_v40, 4  ;;  %v1451_v60 = vrot.slane %v1449_v42, 4  ;;  %v1454_v61 = vrot.slane %v1452_v44, 5  ;;  %v1468_v3 = vshll.u32 %v8088_v58, 16  ;;  %6518 = vmatprep.subr.bf16.mxu0 %v7216_v30  ;;  %v1861_v40 = vld [vmem:[#allocation2 + $0x18] sm:$0xe] }
 0x15c   : > { %6497 = vmatmul.mubr.bf16.gmra.mrb[40].mxu0 %v5752_v43  ;;  %v1460_v53 = vrot.slane %v1458_v49, 5  ;;  %v1464_v14 = vrot.slane %v1462_v56, 4  ;;  %v1437_v62 = vsel %vm7934_vm11, %v1432_v45, %v1436_v25  ;;  %v5779_v31 = vrot.slane %v1859_v17, 9  ;;  %v1862_v45 = vld [vmem:[#allocation2 + $0x24] sm:$0xe] }
 0x15d   : > { %v1447_v54 = vsel %vm7934_vm11, %v1442_v48, %v1446_v36  ;;  %v1455_v6 = vor.u32 %v1454_v61, %v1451_v60  ;;  %v1470_v24 = vrot.slane %v1468_v3, 5  ;;  %v1888_v34 = vrot.slane %v7916_v16, 5  ;;  %v7319_v36 = vld [vmem:[%s9347_s5 + $0xe4] ss:$16 sps:$4 sm:$0xff]  }
 0x15e   : > { %v5753_v11 = vcombine.low %v1437_v62, %v1447_v54  ;;  %v1465_v12 = vor.u32 %v1464_v14, %v1460_v53  ;;  %6519 = vmatpush3.bf16.msra.mxu0 %v7216_v30  ;;  %v1891_v25 = vrot.slane %v7918_v18, 5  ;;  %v5780_v30 = vrot.slane %v1860_v20, 9 }
 0x15f   : > { %v1456_v13 = vrot.slane %v1455_v6, 4  ;;  %6536 = vmatprep.subr.bf16.mxu0 %v8100_v50  ;;  %v1895_v37 = vrot.slane %v7938_v5, 5  ;;  %v8122_v44 = vsel %vm8113_vm14, %v5779_v31, %v1888_v34  ;;  %v1890_v18 = vrot.slane %v1888_v34, 4 }
 0x160   : > { %6500 = vmatprep.mubr.bf16.mxu0 %v5753_v11  ;;  %v1466_v29 = vrot.slane %v1465_v12, 4  ;;  %v1898_v43 = vrot.slane %v7948_v57, 5  ;;  %v5763_v56 = vcombine.low %v7907_v0, %v7916_v16  ;;  %v1902_v60 = vrot.slane %v7964_v59, 5  ;;  %v1864_v12 = vld [vmem:[#allocation2 + $0x3c] sm:$0xe] }
 0x161   : > { %v1461_v26 = vsel %vm7934_vm11, %v1456_v13, %v1460_v53  ;;  %v1897_v48 = vrot.slane %v1895_v37, 4  ;;  %v8130_v61 = vsel %vm8113_vm14, %v1890_v18, %v1891_v25  ;;  %v8134_v3 = vsel %vm8113_vm14, %v5780_v30, %v1895_v37  ;;  %v1865_v25 = vld [vmem:[#allocation2 + $0x48] sm:$0xe] }
 0x162   : > { %v1471_v42 = vsel %vm7934_vm11, %v1466_v29, %v1470_v24  ;;  %v5781_v53 = vrot.slane %v1861_v40, 9  ;;  %v1909_v14 = vrot.slane %v7987_v47, 5  ;;  %v5803_v57 = vcombine.low %v8122_v44, %v8130_v61  ;;  %v1863_v44 = vld [vmem:[#allocation2 + $0x30] sm:$0xe] }
 0x163   : > { %v5754_v49 = vcombine.low %v1461_v26, %v1471_v42  ;;  %v8141_v0 = vsel %vm8113_vm14, %v1897_v48, %v1898_v43  ;;  %v1904_v16 = vrot.slane %v1902_v60, 4  ;;  %v1905_v62 = vrot.slane %v7971_v10, 5  ;;  %v905_v42 = vld [vmem:[#allocation2 + $0x68] sm:$0x1]  ;;  %v8195_v48 = vld [vmem:[%s9344_s2] ss:$0 sm:$0xff] }
 0x164   : > { %v5804_v54 = vcombine.low %v8134_v3, %v8141_v0  ;;  %v5782_v6 = vrot.slane %v1862_v45, 9  ;;  %v1911_v17 = vrot.slane %v1909_v14, 4  ;;  %v1912_v11 = vrot.slane %v8006_v9, 5  ;;  %v7220_v43 = vld [vmem:[%s9345_s3 + $0x88] sm:$0xff]  }
 0x165   : > { %6501 = vmatmul.mubr.bf16.gmra.mrb[44].mxu0 %v5754_v49  ;;  %v8149_v20 = vsel %vm8113_vm14, %v5781_v53, %v1902_v60  ;;  %v8153_v13 = vsel %vm8113_vm14, %v1904_v16, %v1905_v62  ;;  %v1923_v9 = vrot.slane %v8043_v15, 5  ;;  %v5784_v34 = vrot.slane %v1864_v12, 9 }
 0x166   : > { %6520 = vmatprep.mubr.bf16.mxu0 %v5763_v56  ;;  %v5805_v10 = vcombine.low %v8149_v20, %v8153_v13  ;;  %v8159_v24 = vsel %vm8113_vm14, %v5782_v6, %v1909_v14  ;;  %v8163_v29 = vsel %vm8113_vm14, %v1911_v17, %v1912_v11  ;;  %v5764_v26 = vcombine.low %v7901_v51, %v7938_v5  ;;  %v7221_v14 = vld [vmem:[%s9345_s3 + $0x90] sm:$0xff]   ;;  %v7237_v13 = vld [vmem:[%s9345_s3 + $0xe8] sm:$0xff]  }
 0x167   : > { %v5806_v31 = vcombine.low %v8159_v24, %v8163_v29  ;;  %v1925_v30 = vrot.slane %v1923_v9, 4  ;;  %v1926_v37 = vrot.slane %v8045_v19, 5  ;;  %v1930_v40 = vrot.slane %v8063_v39, 5  ;;  %v7238_v24 = vld [vmem:[%s9345_s3 + $0xf0] sm:$0xff]  }
 0x168   : > { %v5765_v18 = vcombine.low %v7960_v46, %v7964_v59  ;;  %v8179_v45 = vsel %vm8113_vm14, %v5784_v34, %v1923_v9  ;;  %v6280_v51 = vadd.f32 %v8004_v7, %v8000_v63  ;;  %v6283_v5 = vadd.f32 %v8018_v28, %v8011_v22  ;;  %v1866_v28 = vld [vmem:[#allocation2 + $0x54] sm:$0xe] }
 0x169   : > { %v8187_v19 = vsel %vm8113_vm14, %v1925_v30, %v1926_v37  ;;  %v5785_v49 = vrot.slane %v1865_v25, 9  ;;  %v1932_v46 = vrot.slane %v1930_v40, 4  ;;  %v1933_v59 = vrot.slane %v8065_v52, 5  ;;  %v7224_v30 = vld [vmem:[%s9345_s3 + $0x98] sm:$0xff]  }
 0x16a   : > { %v5808_v56 = vcombine.low %v8179_v45, %v8187_v19  ;;  %v676_v63 = vadd.f32 %v8195_v48, %v6280_v51  ;;  %v679_v7 = vadd.f32 %v8195_v48, %v6283_v5  ;;  %v906_v22 = vsel %vm7798_vm4, 0, %v905_v42  ;;  %v1230_v51 = vld [vmem:[#allocation2 + $0x60] sm:$0xf]  ;;  %v7240_v19 = vld [vmem:[%s9345_s3 + $0xf8] sm:$0xff]  }
 0x16b   : > { %v8204_v52 = vsel %vm8113_vm14, %v5785_v49, %v1930_v40  ;;  %v8208_v60 = vsel %vm8113_vm14, %v1932_v46, %v1933_v59  ;;  %907 = vst [vmem:[#allocation2 + $0x68] sm:$0x1] %v906_v22  ;;  %v1937_v53 = vrot.slane %v8081_v27, 5  ;;  %v5786_v6 = vrot.slane %v1866_v28, 9  ;;  %v7225_v49 = vld [vmem:[%s9345_s3 + $0xa0] sm:$0xff]  }
 0x16c   : > { %v696_v16 = vmax.f32 %v676_v63, 0.0  ;;  %v697_v62 = vmax.f32 %v679_v7, 0.0  ;;  %v1940_v11 = vrot.slane %v8088_v58, 5  ;;  %v5766_v34 = vcombine.low %v7985_v41, %v7987_v47 }
 0x16d   : > { %6521 = vmatmul.mubr.bf16.vlgmr.msra.gmra.mrb[32].mxu0 %v5764_v26  ;;  %v1939_v17 = vrot.slane %v1937_v53, 4  ;;  %v8221_v25 = vsel %vm8113_vm14, %v5786_v6, %v1937_v53  ;;  %v5767_v41 = vcombine.low %v8009_v21, %v8024_v33  ;;  %v5768_v53 = vcombine.low %v8037_v8, %v8043_v15 }
 0x16e   : > { %6537 = vmatpush3.bf16.msra.mxu0 %v8100_v50  ;;  %6524 = vmatprep.mubr.bf16.mxu0 %v5765_v18  ;;  %v5809_v50 = vcombine.low %v8204_v52, %v8208_v60  ;;  %v6185_v12 = vpack.c.bf16 %v696_v16, %v696_v16  ;;  %v6186_v9 = vpack.c.bf16 %v697_v62, %v697_v62  ;;  %v6322_v62 = vpop.f32.mrb[4].mxu1  ;;  %v1919_v61 = vrot.slane %v8033_v1, 5  ;;  %v7236_v1 = vld [vmem:[%s9345_s3 + $0xe0] sm:$0xff]  }
 0x16f   : > { %6538 = vmatprep.subr.bf16.mxu0 %v7220_v43  ;;  %v8225_v26 = vsel %vm8113_vm14, %v1939_v17, %v1940_v11  ;;  %v5769_v16 = vcombine.low %v8058_v32, %v8063_v39  ;;  %v6323_v6 = vpop.f32.mrb[5].mxu1  ;;  %v7229_v17 = vld [vmem:[%s9345_s3 + $0xb0] sm:$0xff]   ;;  %v7231_v32 = vld [vmem:[%s9345_s3 + $0xb8] sm:$0xff]   ;;  %v7232_v39 = vld [vmem:[%s9345_s3 + $0xc0] sm:$0xff]  }
 0x170   : > { %v1140_v58 = vshrl.u32 %v6185_v12, 16  ;;  %v1143_v37 = vshll.u32 %v6185_v12, 16  ;;  %v1148_v40 = vshrl.u32 %v6186_v9, 16  ;;  %v1151_v42 = vshll.u32 %v6186_v9, 16  ;;  %v6325_v11 = vpop.f32.mrb[6].mxu1 }
 0x171   : > { %v5810_v47 = vcombine.low %v8221_v25, %v8225_v26  ;;  %v6326_v12 = vpop.f32.mrb[7].mxu1  ;;  %v6324_v8 = vadd.f32 %v6323_v6, %v6322_v62  ;;  %v5770_v9 = vcombine.low %v8077_v23, %v8081_v27  ;;  %v7233_v23 = vld [vmem:[%s9345_s3 + $0xc8] sm:$0xff]  }
 0x172   : > { %6539 = vmatpush3.bf16.msra.mxu0 %v7220_v43  ;;  %v1142_v18 = vrot.slane %v1140_v58, 7  ;;  %v1150_v43 = vrot.slane %v1148_v40, 7  ;;  %v1234_v5 = vld [vmem:[#allocation2 + $0x68] sm:$0x1]  ;;  %v6327_v15 = vadd.f32 %v6326_v12, %v6325_v11 }
 0x173   : > { %6540 = vmatprep.subr.bf16.mxu0 %v7221_v14  ;;  %v832_v29 = vadd.f32 %v8195_v48, %v6324_v8  ;;  %v7244_v25 = vld [vmem:[%s9345_s3 + $0x108] sm:$0xff]  }
 0x174   : > { %v1145_v46 = vor.u32 %v1143_v37, %v1142_v18  ;;  %v1146_v59 = vrot.slane %v1142_v18, 4  ;;  %v1153_v63 = vor.u32 %v1151_v42, %v1150_v43  ;;  %v1155_v7 = vrot.slane %v1150_v43, 4  ;;  %v7241_v42 = vld [vmem:[%s9345_s3 + $0x100] sm:$0xff]  }
 0x175   : > { %6525 = vmatmul.mubr.bf16.gmra.mrb[36].mxu0 %v5766_v34  ;;  %v1916_v34 = vrot.slane %v8024_v33, 5  ;;  %v7234_v33 = vld [vmem:[%s9345_s3 + $0xd0] sm:$0xff]   ;;  %v838_v58 = vmax.f32 %v832_v29, 0.0  ;;  %v835_v52 = vadd.f32 %v8195_v48, %v6327_v15  ;;  %v2397_v15 = vld [vmem:[#allocation2 + $0x18] sm:$0xf] }
 0x176   : > { %6541 = vmatpush3.bf16.msra.mxu0 %v7221_v14  ;;  %6528 = vmatprep.mubr.bf16.mxu0 %v5767_v41  ;;  %v1231_v21 = vsel %vm7873_vm7, %v1145_v46, %v1230_v51  ;;  %v1154_v22 = vsel %vm7880_vm8, %v1146_v59, %v1153_v63  ;;  %v1235_v28 = vsel %vm7791_vm2, %v1155_v7, %v1234_v5  ;;  %v7228_v14 = vld [vmem:[%s9345_s3 + $0xa8] sm:$0xff]   ;;  %v7242_v5 = vld [vmem:[#allocation2 + $0x18] sm:$0xff]   ;;  %v8322_v59 = vld [vmem:[#allocation2 + $0x10] sm:$0xf] }
 0x177   : > { %6542 = vmatprep.subr.bf16.mxu0 %v7224_v30  ;;  %1232 = vst [vmem:[#allocation2 + $0x60] sm:$0xf] %v1231_v21  ;;  %1233 = vst [vmem:[#allocation2 + $0x64] sm:$0xf] %v1154_v22  ;;  %v1918_v27 = vrot.slane %v1916_v34, 4  ;;  %v839_v40 = vmax.f32 %v835_v52, 0.0 }
 0x178   : > { %1236 = vst [vmem:[#allocation2 + $0x68] sm:$0x1] %v1235_v28  ;;  %v7243_v46 = vld [vmem:[#allocation2 + $0x24] sm:$0xff]   ;;  %v7245_v28 = vld [vmem:[%s9345_s3 + $0x110] sm:$0xff]  }
 0x179   : > { %v1920_v3 = vsel %vm8113_vm14, %v1918_v27, %v1919_v61  ;;  %v8344_v27 = vld [vmem:[#allocation2 + $0x14] sm:$0x1]  ;;  %v2446_v61 = vshll.u32 %v2397_v15, 16 }
 0x17a   : > { %6543 = vmatpush3.bf16.msra.mxu0 %v7224_v30  ;;  %v908_v30 = vld [vmem:[#allocation2 + $0x74] sm:$0x1] }
 0x17b   : > { %6544 = vmatprep.subr.bf16.mxu0 %v7225_v49  ;;  %v909_v60 = vsel %vm7798_vm4, 0, %v908_v30  ;;  %v8359_v52 = vld [vmem:[#allocation2 + $0x34] sm:$0xf] }
 0x17c   : > { %910 = vst [vmem:[#allocation2 + $0x74] sm:$0x1] %v909_v60  ;;  %v7250_v60 = vld [vmem:[#allocation2 + $0x48] sm:$0xff]  }
 0x17d   : > { %6529 = vmatmul.mubr.bf16.gmra.mrb[40].mxu0 %v5768_v53  ;;  %v2394_v53 = vld [vmem:[#allocation2 + $0xc] sm:$0xf] }
 0x17e   : > { %6545 = vmatpush3.bf16.msra.mxu0 %v7225_v49  ;;  %6532 = vmatprep.mubr.bf16.mxu0 %v5769_v16  ;;  %v2432_v16 = vshrl.u32 %v8322_v59, 16  ;;  %v2419_v12 = vshrl.u32 %v2394_v53, 16  ;;  %v2422_v8 = vshll.u32 %v2394_v53, 16 }
 0x17f   : > { %6546 = vmatprep.subr.bf16.mxu0 %v7228_v14 }
 0x182   : > { %6547 = vmatpush3.bf16.msra.mxu0 %v7228_v14  ;;  %v2428_v14 = vshll.u32 %v8322_v59, 16 }
 0x183   : > { %6548 = vmatprep.subr.bf16.mxu0 %v7229_v17  ;;  %v977_v22 = vld [vmem:[#allocation2 + $0x74] sm:$0x1] }
 0x185   : > { %6533 = vmatmul.mubr.bf16.gmra.mrb[44].mxu0 %v5770_v9  ;;  %v7246_v9 = vld [vmem:[#allocation2 + $0x30] sm:$0xff]  }
 0x186   : > { %6549 = vmatpush3.bf16.msra.mxu0 %v7229_v17  ;;  %6552 = vmatprep.mubr.bf16.mxu0 %v5803_v57  ;;  %v5783_v57 = vrot.slane %v1863_v44, 9  ;;  %v8331_v17 = vld [vmem:[#allocation2 + $0x1c] sm:$0xf]  ;;  %v2400_v44 = vld [vmem:[#allocation2 + $0x24] sm:$0xf] }
 0x187   : > { %6550 = vmatprep.subr.bf16.mxu0 %v7231_v32  ;;  %v2452_v2 = vshll.u32 %v8331_v17, 16  ;;  %v2456_v35 = vshrl.u32 %v8331_v17, 16  ;;  %v2470_v29 = vshll.u32 %v2400_v44, 16 }
 0x188   : > { %v1917_v0 = vsel %vm8113_vm14, %v5783_v57, %v1916_v34  ;;  %v2434_v34 = vrot.slane %v2432_v16, 4  ;;  %v8346_v57 = vld [vmem:[#allocation2 + $0x28] sm:$0xf] }
 0x189   : > { %v5807_v20 = vcombine.low %v1917_v0, %v1920_v3  ;;  %v2421_v3 = vrot.slane %v2419_v12, 4  ;;  %v2424_v0 = vrot.slane %v2422_v8, 5  ;;  %v2480_v30 = vshrl.u32 %v8346_v57, 16 }
 0x18a   : > { %6551 = vmatpush3.bf16.msra.mxu0 %v7231_v32  ;;  %v7248_v32 = vld [vmem:[%s9345_s3 + $0x118] sm:$0xff]  }
 0x18b   : > { %6568 = vmatprep.subr.bf16.mxu0 %v7232_v39 }
 0x18d   : > { %6553 = vmatmul.mubr.bf16.vlgmr.msra.gmra.mrb[32].mxu0 %v5804_v54  ;;  %v7235_v54 = vld [vmem:[%s9345_s3 + $0xd8] sm:$0xff]  }
 0x18e   : > { %6569 = vmatpush3.bf16.msra.mxu0 %v7232_v39  ;;  %6556 = vmatprep.mubr.bf16.mxu0 %v5805_v10  ;;  %v876_v10 = vld [vmem:[#allocation2 + $0x6c] sm:$0x1]  ;;  %v8340_v39 = vrot.slane %v2428_v14, 5 }
 0x18f   : > { %6570 = vmatprep.subr.bf16.mxu0 %v7233_v23  ;;  %v877_v45 = vsel %vm7791_vm2, 0, %v876_v10  ;;  %v2458_v10 = vrot.slane %v2456_v35, 4  ;;  %v7254_v35 = vld [vmem:[#allocation2 + $0x60] sm:$0xff]  }
 0x190   : > { %878 = vst [vmem:[#allocation2 + $0x6c] sm:$0x1] %v877_v45  ;;  %v2448_v45 = vrot.slane %v2446_v61, 5 }
 0x192   : > { %6571 = vmatpush3.bf16.msra.mxu0 %v7233_v23  ;;  %v7247_v23 = vld [vmem:[#allocation2 + $0x3c] sm:$0xff]  }
 0x193   : > { %6572 = vmatprep.subr.bf16.mxu0 %v7234_v33 }
 0x195   : > { %6557 = vmatmul.mubr.bf16.gmra.mrb[36].mxu0 %v5806_v31  ;;  %v842_v31 = vstv %s841_s20 }
 0x196   : > { %6573 = vmatpush3.bf16.msra.mxu0 %v7234_v33  ;;  %6560 = vmatprep.mubr.bf16.mxu0 %v5807_v20  ;;  %v844_v18 = vmul.f32 %v842_v31, %v839_v40  ;;  %v2443_v33 = vshrl.u32 %v2397_v15, 16  ;;  %v2435_v20 = vor.u32 %v2434_v34, %v8340_v39 }
 0x197   : > { %6574 = vmatprep.subr.bf16.mxu0 %v7235_v54  ;;  %v973_v51 = vld [vmem:[#allocation2 + $0x6c] sm:$0xf] }
 0x198   : > { %v6170_v43 = vpack.c.bf16 %v844_v18, %v844_v18 }
 0x19a   : > { %6575 = vmatpush3.bf16.msra.mxu0 %v7235_v54  ;;  %v964_v49 = vshll.u32 %v6170_v43, 16  ;;  %v7249_v54 = vld [vmem:[%s9345_s3 + $0x120] sm:$0xff]  }
 0x19b   : > { %6576 = vmatprep.subr.bf16.mxu0 %v7236_v1 }
 0x19d   : > { %6561 = vmatmul.mubr.bf16.gmra.mrb[40].mxu0 %v5808_v56  ;;  %v843_v56 = vmul.f32 %v842_v31, %v838_v58  ;;  %v2476_v31 = vshll.u32 %v8346_v57, 16  ;;  %v2445_v58 = vrot.slane %v2443_v33, 4 }
 0x19e   : > { %6577 = vmatpush3.bf16.msra.mxu0 %v7236_v1  ;;  %6564 = vmatprep.mubr.bf16.mxu0 %v5809_v50  ;;  %v7239_v50 = vld [vmem:[#allocation2 + $0xc] sm:$0xff]   ;;  %v2438_v1 = vshll.u32 %v8344_v27, 16 }
 0x19f   : > { %6578 = vmatprep.subr.bf16.mxu0 %v7237_v13  ;;  %v6169_v37 = vpack.c.bf16 %v843_v56, %v843_v56  ;;  %v8357_v56 = vld [vmem:[#allocation2 + $0x20] sm:$0x1] }
 0x1a0   : > { %v2440_v40 = vrot.slane %v2438_v1, 5 }
 0x1a1   : > { %v953_v41 = vshrl.u32 %v6169_v37, 16  ;;  %v956_v48 = vshll.u32 %v6169_v37, 16  ;;  %v2436_v37 = vrot.slane %v2435_v20, 4 }
 0x1a2   : > { %6579 = vmatpush3.bf16.msra.mxu0 %v7237_v13  ;;  %v8353_v13 = vrot.slane %v2452_v2, 5 }
 0x1a3   : > { %6580 = vmatprep.subr.bf16.mxu0 %v7238_v24  ;;  %v955_v38 = vrot.slane %v953_v41, 7  ;;  %v8365_v41 = vld [vmem:[#allocation2 + $0x40] sm:$0xf] }
 0x1a4   : > { %v2524_v53 = vshll.u32 %v8365_v41, 16  ;;  %v2528_v14 = vshrl.u32 %v8365_v41, 16 }
 0x1a5   : > { %6565 = vmatmul.mubr.bf16.gmra.mrb[44].mxu0 %v5810_v47  ;;  %v958_v26 = vor.u32 %v956_v48, %v955_v38  ;;  %v961_v47 = vshrl.u32 %v6170_v43, 16  ;;  %v959_v63 = vrot.slane %v955_v38, 4  ;;  %v7251_v48 = vld [vmem:[#allocation2 + $0x54] sm:$0xff]   ;;  %v2472_v38 = vrot.slane %v2470_v29, 5 }
 0x1a6   : > { %6581 = vmatpush3.bf16.msra.mxu0 %v7238_v24  ;;  %6584 = vmatprep.mubr.bf16.mxu0 %v7239_v50  ;;  %v2467_v24 = vshrl.u32 %v2400_v44, 16  ;;  %v7252_v50 = vld [vmem:[%s9345_s3 + $0x128] sm:$0xff]   ;;  %v8367_v43 = vrot.slane %v2476_v31, 5  ;;  %v7255_v44 = vld [vmem:[%s9345_s3 + $0x138] sm:$0xff]   ;;  %v8393_v61 = vrot.slane %v2524_v53, 5 }
 0x1a7   : > { %6582 = vmatprep.subr.bf16.mxu0 %v7240_v19  ;;  %v974_v7 = vsel %vm7873_vm7, %v958_v26, %v973_v51  ;;  %v963_v21 = vrot.slane %v961_v47, 7  ;;  %v2482_v51 = vrot.slane %v2480_v30, 4  ;;  %v2403_v26 = vld [vmem:[#allocation2 + $0x30] sm:$0xf]  ;;  %v2500_v47 = vshll.u32 %v8359_v52, 16 }
 0x1a8   : > { %975 = vst [vmem:[#allocation2 + $0x6c] sm:$0xf] %v974_v7  ;;  %v2469_v18 = vrot.slane %v2467_v24, 4  ;;  %v7253_v7 = vld [vmem:[%s9345_s3 + $0x130] sm:$0xff]   ;;  %v8400_v24 = vld [vmem:[#allocation2 + $0x38] sm:$0x1] }
 0x1a9   : > { %v966_v62 = vor.u32 %v964_v49, %v963_v21  ;;  %v968_v6 = vrot.slane %v963_v21, 4  ;;  %v2504_v49 = vshrl.u32 %v8359_v52, 16  ;;  %v2441_v21 = vsel %vm7934_vm11, %v2436_v37, %v2440_v40  ;;  %v8403_v31 = vld [vmem:[#allocation2 + $0x44] sm:$0x1]  ;;  %v2409_v40 = vld [vmem:[#allocation2 + $0x48] sm:$0xf] }
 0x1aa   : > { %6583 = vmatpush3.bf16.msra.mxu0 %v7240_v19  ;;  %v2425_v19 = vor.u32 %v2424_v0, %v2421_v3  ;;  %v2473_v16 = vor.u32 %v2472_v38, %v2469_v18  ;;  %v8382_v8 = vrot.slane %v2500_v47, 5  ;;  %v2530_v3 = vrot.slane %v2528_v14, 4  ;;  %v8395_v0 = vld [vmem:[#allocation2 + $0x4c] sm:$0xf] }
 0x1ab   : > { %6600 = vmatprep.subr.bf16.mxu0 %v7241_v42  ;;  %v967_v55 = vsel %vm7880_vm8, %v959_v63, %v966_v62  ;;  %v978_v11 = vsel %vm7791_vm2, %v968_v6, %v977_v22  ;;  %v8372_v63 = vld [vmem:[#allocation2 + $0x2c] sm:$0x1]  ;;  %v2483_v62 = vor.u32 %v2482_v51, %v8367_v43  ;;  %v2491_v6 = vshrl.u32 %v2403_v26, 16 }
 0x1ac   : > { %976 = vst [vmem:[#allocation2 + $0x70] sm:$0xf] %v967_v55  ;;  %979 = vst [vmem:[#allocation2 + $0x74] sm:$0x1] %v978_v11  ;;  %v2494_v55 = vshll.u32 %v2403_v26, 16  ;;  %v2506_v15 = vrot.slane %v2504_v49, 4  ;;  %v2531_v37 = vor.u32 %v2530_v3, %v8393_v61 }
 0x1ad   : > { %6585 = vmatmul.mubr.bf16.vlgmr.msra.gmra.mrb[32].mxu0 %v7242_v5  ;;  %v2449_v5 = vor.u32 %v2448_v45, %v2445_v58  ;;  %v2493_v20 = vrot.slane %v2491_v6, 4  ;;  %v2510_v51 = vshll.u32 %v8400_v24, 16  ;;  %v2534_v26 = vshll.u32 %v8403_v31, 16  ;;  %v8436_v3 = vld [vmem:[#allocation2 + $0x50] sm:$0x1] }
 0x1ae   : > { %6601 = vmatpush3.bf16.msra.mxu0 %v7241_v42  ;;  %6588 = vmatprep.mubr.bf16.mxu0 %v7243_v46  ;;  %v2459_v42 = vor.u32 %v2458_v10, %v8353_v13  ;;  %v2426_v46 = vrot.slane %v2425_v19, 4  ;;  %v2496_v1 = vrot.slane %v2494_v55, 5  ;;  %v2507_v29 = vor.u32 %v2506_v15, %v8382_v8  ;;  %v2415_v55 = vld [vmem:[#allocation2 + $0x60] sm:$0xf] }
 0x1af   : > { %6602 = vmatprep.subr.bf16.mxu0 %v7244_v25  ;;  %v2450_v11 = vrot.slane %v2449_v5, 4  ;;  %v2548_v19 = vshll.u32 %v8395_v0, 16  ;;  %v2412_v5 = vld [vmem:[#allocation2 + $0x54] sm:$0xf]  ;;  %v2512_v6 = vrot.slane %v2510_v51, 5 }
 0x1b0   : > { %v2460_v22 = vrot.slane %v2459_v42, 4  ;;  %v2552_v42 = vshrl.u32 %v8395_v0, 16  ;;  %v2497_v38 = vor.u32 %v2496_v1, %v2493_v20  ;;  %v2563_v14 = vshrl.u32 %v2412_v5, 16  ;;  %v8439_v1 = vld [vmem:[#allocation2 + $0x5c] sm:$0x1] }
 0x1b1   : > { %v2455_v10 = vsel %vm7934_vm11, %v2450_v11, %v8353_v13  ;;  %v7256_v13 = vld [vmem:[%s9345_s3 + $0x140] sm:$0xff]  }
 0x1b2   : > { %6603 = vmatpush3.bf16.msra.mxu0 %v7244_v25  ;;  %v2462_v25 = vshll.u32 %v8357_v56, 16  ;;  %v2554_v53 = vrot.slane %v2552_v42, 4  ;;  %v2498_v11 = vrot.slane %v2497_v38, 4 }
 0x1b3   : > { %6604 = vmatprep.subr.bf16.mxu0 %v7245_v28 }
 0x1b4   : > { %v2464_v12 = vrot.slane %v2462_v25, 5  ;;  %v2508_v25 = vrot.slane %v2507_v29, 4  ;;  %v2590_v29 = vshll.u32 %v2415_v55, 16 }
 0x1b5   : > { %6589 = vmatmul.mubr.bf16.gmra.mrb[36].mxu0 %v7246_v9  ;;  %v2431_v9 = vsel %vm7934_vm11, %v2426_v46, %v8340_v39  ;;  %v2474_v39 = vrot.slane %v2473_v16, 4  ;;  %v2566_v16 = vshll.u32 %v2412_v5, 16 }
 0x1b6   : > { %6605 = vmatpush3.bf16.msra.mxu0 %v7245_v28  ;;  %6592 = vmatprep.mubr.bf16.mxu0 %v7247_v23  ;;  %v2406_v28 = vld [vmem:[#allocation2 + $0x3c] sm:$0xf]  ;;  %v5867_v23 = vcombine.low %v2431_v9, %v2441_v21  ;;  %v2465_v33 = vsel %vm7934_vm11, %v2460_v22, %v2464_v12  ;;  %v2542_v21 = vshll.u32 %v2409_v40, 16  ;;  %v8422_v22 = vrot.slane %v2548_v19, 5 }
 0x1b7   : > { %6606 = vmatprep.subr.bf16.mxu0 %v7248_v32  ;;  %v2515_v34 = vshrl.u32 %v2406_v28, 16  ;;  %v2518_v2 = vshll.u32 %v2406_v28, 16  ;;  %v2532_v28 = vrot.slane %v2531_v37, 4  ;;  %v2536_v12 = vrot.slane %v2534_v26, 5 }
 0x1b8   : > { %v2568_v20 = vrot.slane %v2566_v16, 5  ;;  %v2592_v5 = vrot.slane %v2590_v29, 5  ;;  %v2868_v29 = vrot.slane %v8346_v57, 5  ;;  %v7298_v57 = vld [vmem:[%s9347_s5 + $0x4] ss:$16 sps:$4 sm:$0xff]  }
 0x1b9   : > { %v2517_v58 = vrot.slane %v2515_v34, 4  ;;  %v2520_v45 = vrot.slane %v2518_v2, 5  ;;  %v2513_v34 = vsel %vm7934_vm11, %v2508_v25, %v2512_v6  ;;  %v2854_v6 = vrot.slane %v8322_v59, 5  ;;  %4346 = vmatprep.subr.bf16.mxu1 %v7298_v57 }
 0x1ba   : > { %6607 = vmatpush3.bf16.msra.mxu0 %v7248_v32  ;;  %v2486_v32 = vshll.u32 %v8372_v63, 16 }
 0x1bb   : > { %6608 = vmatprep.subr.bf16.mxu0 %v7249_v54  ;;  %v2521_v46 = vor.u32 %v2520_v45, %v2517_v58  ;;  %v2503_v45 = vsel %vm7934_vm11, %v2498_v11, %v8382_v8  ;;  %v2582_v8 = vshll.u32 %v8439_v1, 16  ;;  %v2856_v59 = vrot.slane %v2854_v6, 4 }
 0x1bc   : > { %v2488_v30 = vrot.slane %v2486_v32, 5  ;;  %v8427_v32 = vld [vmem:[#allocation2 + $0x64] sm:$0xf] }
 0x1bd   : > { %6593 = vmatmul.mubr.bf16.gmra.mrb[40].mxu0 %v7250_v60  ;;  %v8406_v60 = vld [vmem:[#allocation2 + $0x58] sm:$0xf]  ;;  %v2522_v2 = vrot.slane %v2521_v46, 4  ;;  %v2600_v58 = vshrl.u32 %v8427_v32, 16 }
 0x1be   : > { %6609 = vmatpush3.bf16.msra.mxu0 %v7249_v54  ;;  %6596 = vmatprep.mubr.bf16.mxu0 %v7251_v48  ;;  %v2484_v54 = vrot.slane %v2483_v62, 4  ;;  %v2479_v48 = vsel %vm7934_vm11, %v2474_v39, %v8367_v43  ;;  %v2572_v47 = vshll.u32 %v8406_v60, 16  ;;  %v2576_v49 = vshrl.u32 %v8406_v60, 16  ;;  %v7257_v43 = vld [vmem:[%s9345_s3 + $0x148] sm:$0xff]  }
 0x1bf   : > { %6610 = vmatprep.subr.bf16.mxu0 %v7252_v50  ;;  %v2555_v39 = vor.u32 %v2554_v53, %v8422_v22  ;;  %v2602_v26 = vrot.slane %v2600_v58, 4  ;;  %v7263_v58 = vld [vmem:[%s9345_s3 + $0x178] sm:$0xff]  }
 0x1c0   : > { %v2489_v18 = vsel %vm7934_vm11, %v2484_v54, %v2488_v30  ;;  %v2574_v15 = vrot.slane %v2572_v47, 5  ;;  %v2578_v9 = vrot.slane %v2576_v49, 4  ;;  %v2565_v54 = vrot.slane %v2563_v14, 4 }
 0x1c1   : > { %v5869_v62 = vcombine.low %v2479_v48, %v2489_v18  ;;  %v2596_v30 = vshll.u32 %v8427_v32, 16  ;;  %v7259_v48 = vld [vmem:[%s9345_s3 + $0x158] sm:$0xff]   ;;  %v2556_v18 = vrot.slane %v2555_v39, 4 }
 0x1c2   : > { %6611 = vmatpush3.bf16.msra.mxu0 %v7252_v50  ;;  %v5868_v50 = vcombine.low %v2455_v10, %v2465_v33  ;;  %v2537_v33 = vsel %vm7934_vm11, %v2532_v28, %v2536_v12  ;;  %v2587_v10 = vshrl.u32 %v2415_v55, 16  ;;  %v2579_v19 = vor.u32 %v2578_v9, %v2574_v15  ;;  %v7261_v9 = vld [vmem:[%s9345_s3 + $0x168] sm:$0xff]  }
 0x1c3   : > { %6612 = vmatprep.subr.bf16.mxu0 %v7253_v7  ;;  %v2569_v38 = vor.u32 %v2568_v20, %v2565_v54  ;;  %v2598_v25 = vrot.slane %v2596_v30, 5  ;;  %v2861_v54 = vrot.slane %v8331_v17, 5  ;;  %v2870_v17 = vrot.slane %v2868_v29, 4 }
 0x1c4   : > { %v2589_v51 = vrot.slane %v2587_v10, 4  ;;  %v2580_v47 = vrot.slane %v2579_v19, 4  ;;  %v2821_v19 = vld [vmem:[#allocation2 + $0x18] sm:$0xe] }
 0x1c5   : > { %6597 = vmatmul.mubr.bf16.gmra.mrb[44].mxu0 %v7254_v35  ;;  %v2603_v14 = vor.u32 %v2602_v26, %v2598_v25  ;;  %v2882_v26 = vrot.slane %v8365_v41, 5 }
 0x1c6   : > { %6613 = vmatpush3.bf16.msra.mxu0 %v7253_v7  ;;  %6616 = vmatprep.mubr.bf16.mxu0 %v5867_v23  ;;  %v2539_v7 = vshrl.u32 %v2409_v40, 16  ;;  %v2544_v23 = vrot.slane %v2542_v21, 5  ;;  %v2558_v40 = vshll.u32 %v8436_v3, 16  ;;  %v2570_v21 = vrot.slane %v2569_v38, 4 }
 0x1c7   : > { %6614 = vmatprep.subr.bf16.mxu0 %v7255_v44  ;;  %v2593_v53 = vor.u32 %v2592_v5, %v2589_v51  ;;  %v5884_v38 = vrot.slane %v2821_v19, 9  ;;  %v2875_v51 = vrot.slane %v8359_v52, 5 }
 0x1c8   : > { %v2541_v35 = vrot.slane %v2539_v7, 4  ;;  %v2560_v46 = vrot.slane %v2558_v40, 5  ;;  %v7260_v7 = vld [vmem:[%s9345_s3 + $0x160] sm:$0xff]   ;;  %v2575_v12 = vsel %vm7934_vm11, %v2570_v21, %v2574_v15  ;;  %v2857_v15 = vrot.slane %v8344_v27, 5 }
 0x1c9   : > { %v2822_v40 = vld [vmem:[#allocation2 + $0x24] sm:$0xe]  ;;  %v2862_v52 = vsel %vm8113_vm14, %v5884_v38, %v2861_v54  ;;  %v2877_v41 = vrot.slane %v2875_v51, 4  ;;  %v7302_v21 = vld [vmem:[%s9347_s5 + $0x40] ss:$16 sps:$4 sm:$0xff]  }
 0x1ca   : > { %6615 = vmatpush3.bf16.msra.mxu0 %v7255_v44  ;;  %v7258_v44 = vld [vmem:[%s9345_s3 + $0x150] sm:$0xff]   ;;  %v2545_v37 = vor.u32 %v2544_v23, %v2541_v35  ;;  %v2561_v28 = vsel %vm7934_vm11, %v2556_v18, %v2560_v46  ;;  %v2604_v35 = vrot.slane %v2603_v14, 4  ;;  %v2858_v10 = vsel %vm8113_vm14, %v2856_v59, %v2857_v15  ;;  %v7265_v46 = vld [vmem:[%s9345_s3 + $0x188] sm:$0xff]   ;;  %v7267_v59 = vld [vmem:[%s9345_s3 + $0x198] sm:$0xff]  }
 0x1cb   : > { %6632 = vmatprep.subr.bf16.mxu0 %v7256_v13  ;;  %v2871_v18 = vrot.slane %v8372_v63, 5  ;;  %v5885_v5 = vrot.slane %v2822_v40, 9  ;;  %v7304_v63 = vld [vmem:[%s9347_s5 + $0x44] ss:$16 sps:$4 sm:$0xff]   ;;  %v2878_v14 = vrot.slane %v8400_v24, 5 }
 0x1cc   : > { %v2546_v49 = vrot.slane %v2545_v37, 4  ;;  %v2864_v37 = vrot.slane %v8357_v56, 5  ;;  %v7299_v56 = vld [vmem:[%s9347_s5 + $0x20] ss:$16 sps:$4 sm:$0xff]   ;;  %v2825_v15 = vld [vmem:[#allocation2 + $0x48] sm:$0xe] }
 0x1cd   : > { %6617 = vmatmul.mubr.bf16.vlgmr.msra.gmra.mrb[32].mxu0 %v5868_v50  ;;  %v2527_v50 = vsel %vm7934_vm11, %v2522_v2, %v8393_v61  ;;  %v8454_v61 = vld [vmem:[#allocation2 + $0x68] sm:$0x1]  ;;  %v2594_v2 = vrot.slane %v2593_v53, 4  ;;  %v7307_v53 = vld [vmem:[%s9347_s5 + $0x64] ss:$16 sps:$4 sm:$0xff]  }
 0x1ce   : > { %6633 = vmatpush3.bf16.msra.mxu0 %v7256_v13  ;;  %6620 = vmatprep.mubr.bf16.mxu0 %v5869_v62  ;;  %v5870_v13 = vcombine.low %v2503_v45, %v2513_v34  ;;  %v5871_v42 = vcombine.low %v2527_v50, %v2537_v33  ;;  %v2606_v16 = vshll.u32 %v8454_v61, 16  ;;  %v2551_v55 = vsel %vm7934_vm11, %v2546_v49, %v8422_v22  ;;  %v7262_v22 = vld [vmem:[%s9345_s3 + $0x170] sm:$0xff]  }
 0x1cf   : > { %6634 = vmatprep.subr.bf16.mxu0 %v7257_v43  ;;  %v5872_v11 = vcombine.low %v2551_v55, %v2561_v28  ;;  %v2599_v33 = vsel %vm7934_vm11, %v2594_v2, %v2598_v25  ;;  %v7296_v50 = vld [vmem:[%s9347_s5] ss:$16 sps:$4 sm:$0xff]   ;;  %v2872_v25 = vsel %vm8113_vm14, %v2870_v17, %v2871_v18  ;;  %v2869_v49 = vsel %vm8113_vm14, %v5885_v5, %v2868_v29  ;;  %v7274_v5 = vld [vmem:[#allocation2 + $0x24] sm:$0xff]  }
 0x1d0   : > { %v2608_v23 = vrot.slane %v2606_v16, 5  ;;  %4347 = vmatpush1.bf16.msra.mxu1 %v7296_v50  ;;  %v2884_v28 = vrot.slane %v2882_v26, 4  ;;  %v2824_v16 = vld [vmem:[#allocation2 + $0x3c] sm:$0xe]  ;;  %v2896_v2 = vrot.slane %v8406_v60, 5  ;;  %v2899_v29 = vrot.slane %v8439_v1, 5 }
 0x1d1   : > { %v5887_v24 = vrot.slane %v2824_v16, 9  ;;  %v7269_v50 = vld [vmem:[%s9345_s3 + $0x1a8] sm:$0xff]   ;;  %v7280_v16 = vld [vmem:[%s9345_s3 + $0x1d8] sm:$0xff]  }
 0x1d2   : > { %6635 = vmatpush3.bf16.msra.mxu0 %v7257_v43  ;;  %v2584_v43 = vrot.slane %v2582_v8, 5  ;;  %v2609_v39 = vsel %vm7934_vm11, %v2604_v35, %v2608_v23 }
 0x1d3   : > { %6636 = vmatprep.subr.bf16.mxu0 %v7258_v44  ;;  %v5874_v30 = vcombine.low %v2599_v33, %v2609_v39  ;;  %v2883_v23 = vsel %vm8113_vm14, %v5887_v24, %v2882_v26  ;;  %v2898_v33 = vrot.slane %v2896_v2, 4  ;;  %v7313_v39 = vld [vmem:[%s9347_s5 + $0xa4] ss:$16 sps:$4 sm:$0xff]  }
 0x1d4   : > { %v2585_v62 = vsel %vm7934_vm11, %v2580_v47, %v2584_v43  ;;  %v2823_v43 = vld [vmem:[#allocation2 + $0x30] sm:$0xe] }
 0x1d5   : > { %6621 = vmatmul.mubr.bf16.gmra.mrb[36].mxu0 %v5870_v13  ;;  %v5873_v34 = vcombine.low %v2575_v12, %v2585_v62  ;;  %v2863_v13 = vrot.slane %v2861_v54, 4  ;;  %v7266_v62 = vld [vmem:[%s9345_s3 + $0x190] sm:$0xff]   ;;  %v5886_v55 = vrot.slane %v2823_v43, 9  ;;  %v2889_v12 = vrot.slane %v8395_v0, 5  ;;  %v3364_v43 = vld [vmem:[#allocation2 + $0x24] sm:$0xf] }
 0x1d6   : > { %6637 = vmatpush3.bf16.msra.mxu0 %v7258_v44  ;;  %6624 = vmatprep.mubr.bf16.mxu0 %v5871_v42  ;;  %v2820_v44 = vld [vmem:[#allocation2 + $0xc] sm:$0xe]  ;;  %v7301_v42 = vld [vmem:[%s9347_s5 + $0x24] ss:$16 sps:$4 sm:$0xff]   ;;  %v2892_v54 = vrot.slane %v8436_v3, 5  ;;  %v2900_v19 = vsel %vm8113_vm14, %v2898_v33, %v2899_v29  ;;  %v3410_v24 = vshrl.u32 %v3364_v43, 16 }
 0x1d7   : > { %6638 = vmatprep.subr.bf16.mxu0 %v7259_v48  ;;  %v5883_v20 = vrot.slane %v2820_v44, 9  ;;  %v2865_v8 = vsel %vm8113_vm14, %v2863_v13, %v2864_v37  ;;  %4348 = vmatprep.subr.bf16.mxu1 %v7301_v42  ;;  %v2876_v0 = vsel %vm8113_vm14, %v5886_v55, %v2875_v51  ;;  %v2891_v60 = vrot.slane %v2889_v12, 4  ;;  %v2827_v13 = vld [vmem:[#allocation2 + $0x60] sm:$0xe]  ;;  %v7271_v51 = vld [vmem:[#allocation2 + $0x18] sm:$0xff]   ;;  %v7275_v26 = vld [vmem:[#allocation2 + $0x30] sm:$0xff]  }
 0x1d8   : > { %v5908_v47 = vcombine.low %v2862_v52, %v2865_v8  ;;  %4349 = vmatpush1.bf16.msra.mxu1 %v7299_v56  ;;  %v5890_v37 = vrot.slane %v2827_v13, 9  ;;  %v2906_v42 = vrot.slane %v8454_v61, 5  ;;  %v7272_v61 = vld [vmem:[%s9345_s3 + $0x1b8] sm:$0xff]   ;;  %v7273_v56 = vld [vmem:[%s9345_s3 + $0x1c0] sm:$0xff]   ;;  %v7279_v55 = vld [vmem:[#allocation2 + $0x48] sm:$0xff]  }
 0x1d9   : > { %v2855_v27 = vsel %vm8113_vm14, %v5883_v20, %v2854_v6  ;;  %4350 = vmatprep.subr.bf16.mxu1 %v7304_v63  ;;  %v2885_v6 = vrot.slane %v8403_v31, 5  ;;  %v7310_v31 = vld [vmem:[%s9347_s5 + $0x84] ss:$16 sps:$4 sm:$0xff]   ;;  %v3361_v63 = vld [vmem:[#allocation2 + $0x18] sm:$0xf] }
 0x1da   : > { %6639 = vmatpush3.bf16.msra.mxu0 %v7259_v48  ;;  %v5907_v45 = vcombine.low %v2855_v27, %v2858_v10  ;;  %v7264_v48 = vld [vmem:[%s9345_s3 + $0x180] sm:$0xff]   ;;  %v2826_v20 = vld [vmem:[#allocation2 + $0x54] sm:$0xe]  ;;  %v2893_v27 = vsel %vm8113_vm14, %v2891_v60, %v2892_v54  ;;  %v8596_v52 = vld [vmem:[#allocation2 + $0x1c] sm:$0xf]  ;;  %v3412_v54 = vrot.slane %v3410_v24, 4 }
 0x1db   : > { %6640 = vmatprep.subr.bf16.mxu0 %v7260_v7  ;;  %v7268_v10 = vld [vmem:[%s9345_s3 + $0x1a0] sm:$0xff]   ;;  %v5889_v3 = vrot.slane %v2826_v20, 9 }
 0x1dc   : > { %4351 = vmatpush1.bf16.msra.mxu1 %v7302_v21  ;;  %v3399_v21 = vshrl.u32 %v8596_v52, 16  ;;  %v7283_v13 = vld [vmem:[#allocation2 + $0x60] sm:$0xff]  }
 0x1dd   : > { %6625 = vmatmul.mubr.bf16.gmra.mrb[40].mxu0 %v5872_v11  ;;  %v2879_v11 = vsel %vm8113_vm14, %v2877_v41, %v2878_v14  ;;  %4352 = vmatprep.subr.bf16.mxu1 %v7307_v53  ;;  %v3395_v41 = vshll.u32 %v8596_v52, 16  ;;  %v7278_v14 = vld [vmem:[#allocation2 + $0x3c] sm:$0xff]  }
 0x1de   : > { %6641 = vmatpush3.bf16.msra.mxu0 %v7260_v7  ;;  %6628 = vmatprep.mubr.bf16.mxu0 %v5873_v34  ;;  %v5909_v7 = vcombine.low %v2869_v49, %v2872_v25  ;;  %v2886_v34 = vsel %vm8113_vm14, %v2884_v28, %v2885_v6  ;;  %v5910_v35 = vcombine.low %v2876_v0, %v2879_v11  ;;  %v7276_v25 = vld [vmem:[%s9345_s3 + $0x1c8] sm:$0xff]   ;;  %v3386_v49 = vshrl.u32 %v3361_v63, 16  ;;  %v3367_v11 = vld [vmem:[#allocation2 + $0x30] sm:$0xf] }
 0x1df   : > { %6642 = vmatprep.subr.bf16.mxu0 %v7261_v9  ;;  %v5911_v44 = vcombine.low %v2883_v23, %v2886_v34  ;;  %v3413_v34 = vshll.u32 %v3364_v43, 16  ;;  %v8619_v23 = vld [vmem:[#allocation2 + $0x20] sm:$0x1]  ;;  %v3434_v60 = vshrl.u32 %v3367_v11, 16 }
 0x1e1   : > { %v3415_v20 = vrot.slane %v3413_v34, 5 }
 0x1e2   : > { %6643 = vmatpush3.bf16.msra.mxu0 %v7261_v9  ;;  %v7305_v9 = vld [vmem:[%s9347_s5 + $0x60] ss:$16 sps:$4 sm:$0xff]  }
 0x1e3   : > { %6644 = vmatprep.subr.bf16.mxu0 %v7262_v22  ;;  %4353 = vmatpush1.bf16.msra.mxu1 %v7305_v9  ;;  %v3401_v9 = vrot.slane %v3399_v21, 4 }
 0x1e4   : > { %4354 = vmatprep.subr.bf16.mxu1 %v7310_v31 }
 0x1e5   : > { %6629 = vmatmul.mubr.bf16.gmra.mrb[44].mxu0 %v5874_v30  ;;  %v5888_v30 = vrot.slane %v2825_v15, 9 }
 0x1e6   : > { %6645 = vmatpush3.bf16.msra.mxu0 %v7262_v22  ;;  %6648 = vmatprep.mubr.bf16.mxu0 %v5907_v45  ;;  %v7308_v22 = vld [vmem:[%s9347_s5 + $0x80] ss:$16 sps:$4 sm:$0xff]  }
 0x1e7   : > { %6646 = vmatprep.subr.bf16.mxu0 %v7263_v58  ;;  %4355 = vmatpush1.bf16.msra.mxu1 %v7308_v22  ;;  %v7311_v45 = vld [vmem:[%s9347_s5 + $0xa0] ss:$16 sps:$4 sm:$0xff]   ;;  %v2890_v1 = vsel %vm8113_vm14, %v5888_v30, %v2889_v12  ;;  %v8610_v12 = vrot.slane %v3395_v41, 5  ;;  %v3437_v22 = vshll.u32 %v3367_v11, 16 }
 0x1e8   : > { %4356 = vmatprep.subr.bf16.mxu1 %v7313_v39  ;;  %v5912_v17 = vcombine.low %v2890_v1, %v2893_v27  ;;  %v8628_v30 = vld [vmem:[#allocation2 + $0x40] sm:$0xf]  ;;  %v7282_v27 = vld [vmem:[#allocation2 + $0x54] sm:$0xff]   ;;  %v3436_v1 = vrot.slane %v3434_v60, 4 }
 0x1e9   : > { %v3402_v39 = vor.u32 %v3401_v9, %v8610_v12 }
 0x1ea   : > { %6647 = vmatpush3.bf16.msra.mxu0 %v7263_v58  ;;  %v2903_v58 = vrot.slane %v8427_v32, 5  ;;  %v2897_v32 = vsel %vm8113_vm14, %v5889_v3, %v2896_v2  ;;  %v8612_v2 = vld [vmem:[#allocation2 + $0x34] sm:$0xf] }
 0x1eb   : > { %6664 = vmatprep.subr.bf16.mxu0 %v7264_v48  ;;  %v5913_v57 = vcombine.low %v2897_v32, %v2900_v19  ;;  %4357 = vmatpush1.bf16.msra.mxu1 %v7311_v45  ;;  %v3443_v15 = vshll.u32 %v8612_v2, 16  ;;  %v3447_v33 = vshrl.u32 %v8612_v2, 16  ;;  %v8634_v19 = vld [vmem:[#allocation2 + $0x4c] sm:$0xf] }
 0x1ec   : > { %v2905_v40 = vrot.slane %v2903_v58, 4  ;;  %v2904_v18 = vsel %vm8113_vm14, %v5890_v37, %v2903_v58  ;;  %v7284_v58 = vld [vmem:[%s9345_s3 + $0x1e8] sm:$0xff]   ;;  %v3416_v37 = vor.u32 %v3415_v20, %v3412_v54 }
 0x1ed   : > { %6649 = vmatmul.mubr.bf16.vlgmr.msra.gmra.mrb[32].mxu0 %v5908_v47  ;;  %v7277_v47 = vld [vmem:[%s9345_s3 + $0x1d0] sm:$0xff]   ;;  %v8636_v32 = vrot.slane %v3443_v15, 5 }
 0x1ee   : > { %6665 = vmatpush3.bf16.msra.mxu0 %v7264_v48  ;;  %6652 = vmatprep.mubr.bf16.mxu0 %v5909_v7  ;;  %v7270_v48 = vld [vmem:[%s9345_s3 + $0x1b0] sm:$0xff]   ;;  %v2907_v38 = vsel %vm8113_vm14, %v2905_v40, %v2906_v42  ;;  %v8601_v7 = vld [vmem:[#allocation2 + $0x28] sm:$0xf]  ;;  %v8638_v40 = vld [vmem:[#allocation2 + $0x38] sm:$0x1] }
 0x1ef   : > { %6666 = vmatprep.subr.bf16.mxu0 %v7265_v46  ;;  %v5914_v8 = vcombine.low %v2904_v18, %v2907_v38  ;;  %v3419_v28 = vshll.u32 %v8601_v7, 16  ;;  %v3423_v53 = vshrl.u32 %v8601_v7, 16  ;;  %v3370_v18 = vld [vmem:[#allocation2 + $0x3c] sm:$0xf]  ;;  %v3373_v38 = vld [vmem:[#allocation2 + $0x48] sm:$0xf] }
 0x1f0   : > { %v3453_v41 = vshll.u32 %v8638_v40, 16  ;;  %v3458_v21 = vshrl.u32 %v3370_v18, 16  ;;  %v8670_v15 = vld [vmem:[#allocation2 + $0x50] sm:$0x1] }
 0x1f1   : > { %v8614_v31 = vrot.slane %v3419_v28, 5  ;;  %v3425_v0 = vrot.slane %v3423_v53, 4  ;;  %v3461_v28 = vshll.u32 %v3370_v18, 16  ;;  %v3482_v53 = vshrl.u32 %v3373_v38, 16 }
 0x1f2   : > { %6667 = vmatpush3.bf16.msra.mxu0 %v7265_v46  ;;  %v3389_v46 = vshll.u32 %v3361_v63, 16  ;;  %v3455_v60 = vrot.slane %v3453_v41, 5 }
 0x1f3   : > { %6668 = vmatprep.subr.bf16.mxu0 %v7266_v62  ;;  %v3426_v29 = vor.u32 %v3425_v0, %v8614_v31  ;;  %v8663_v0 = vld [vmem:[#allocation2 + $0x44] sm:$0x1]  ;;  %v3463_v54 = vrot.slane %v3461_v28, 5  ;;  %v3484_v20 = vrot.slane %v3482_v53, 4  ;;  %v8695_v53 = vld [vmem:[#allocation2 + $0x70] sm:$0xf] }
 0x1f4   : > { %v3391_v6 = vrot.slane %v3389_v46, 5  ;;  %v3417_v46 = vrot.slane %v3416_v37, 4 }
 0x1f5   : > { %6653 = vmatmul.mubr.bf16.gmra.mrb[36].mxu0 %v5910_v35  ;;  %v7281_v35 = vld [vmem:[%s9345_s3 + $0x1e0] sm:$0xff]  }
 0x1f6   : > { %6669 = vmatpush3.bf16.msra.mxu0 %v7266_v62  ;;  %6656 = vmatprep.mubr.bf16.mxu0 %v5911_v44  ;;  %v3388_v62 = vrot.slane %v3386_v49, 4  ;;  %v8621_v44 = vld [vmem:[#allocation2 + $0x2c] sm:$0x1] }
 0x1f7   : > { %6670 = vmatprep.subr.bf16.mxu0 %v7267_v59  ;;  %v3429_v3 = vshll.u32 %v8621_v44, 16 }
 0x1fa   : > { %6671 = vmatpush3.bf16.msra.mxu0 %v7267_v59  ;;  %v3392_v59 = vor.u32 %v3391_v6, %v3388_v62  ;;  %v7287_v62 = vld [vmem:[%s9345_s3 + $0x1f8] sm:$0xff]  }
 0x1fb   : > { %6672 = vmatprep.subr.bf16.mxu0 %v7268_v10 }
 0x1fc   : > { %v3393_v45 = vrot.slane %v3392_v59, 4  ;;  %v3422_v59 = vsel %vm7934_vm11, %v3417_v46, %v8614_v31  ;;  %v3382_v46 = vld [vmem:[#allocation2 + $0x6c] sm:$0xf] }
 0x1fd   : > { %6657 = vmatmul.mubr.bf16.gmra.mrb[40].mxu0 %v5912_v17  ;;  %v3439_v17 = vrot.slane %v3437_v22, 5  ;;  %v3460_v22 = vrot.slane %v3458_v21, 4 }
 0x1fe   : > { %6673 = vmatpush3.bf16.msra.mxu0 %v7268_v10  ;;  %6660 = vmatprep.mubr.bf16.mxu0 %v5913_v57  ;;  %v3405_v10 = vshll.u32 %v8619_v23, 16  ;;  %v3403_v57 = vrot.slane %v3402_v39, 4 }
 0x1ff   : > { %6674 = vmatprep.subr.bf16.mxu0 %v7269_v50  ;;  %v3440_v63 = vor.u32 %v3439_v17, %v3436_v1 }
 0x200   : > { %v3407_v42 = vrot.slane %v3405_v10, 5 }
 0x201   : > { %v3441_v24 = vrot.slane %v3440_v63, 4 }
 0x202   : > { %6675 = vmatpush3.bf16.msra.mxu0 %v7269_v50  ;;  %v3449_v50 = vrot.slane %v3447_v33, 4  ;;  %v3408_v49 = vsel %vm7934_vm11, %v3403_v57, %v3407_v42  ;;  %v3379_v33 = vld [vmem:[#allocation2 + $0x60] sm:$0xf]  ;;  %v3501_v57 = vshll.u32 %v8670_v15, 16 }
 0x203   : > { %6676 = vmatprep.subr.bf16.mxu0 %v7270_v48  ;;  %v3446_v1 = vsel %vm7934_vm11, %v3441_v24, %v8636_v32  ;;  %v3530_v37 = vshrl.u32 %v3379_v33, 16  ;;  %v3533_v42 = vshll.u32 %v3379_v33, 16  ;;  %v3557_v33 = vshll.u32 %v3382_v46, 16 }
 0x205   : > { %6661 = vmatmul.mubr.bf16.gmra.mrb[44].mxu0 %v5914_v8  ;;  %v7285_v8 = vld [vmem:[%s9345_s3 + $0x1f0] sm:$0xff]   ;;  %v3532_v41 = vrot.slane %v3530_v37, 4  ;;  %v3535_v21 = vrot.slane %v3533_v42, 5  ;;  %v3559_v37 = vrot.slane %v3557_v33, 5  ;;  %v3835_v33 = vrot.slane %v8612_v2, 5 }
 0x206   : > { %6677 = vmatpush3.bf16.msra.mxu0 %v7270_v48  ;;  %6680 = vmatprep.mubr.bf16.mxu0 %v7271_v51  ;;  %v3427_v48 = vrot.slane %v3426_v29, 4  ;;  %v3471_v51 = vshrl.u32 %v8628_v30, 16  ;;  %v8672_v29 = vld [vmem:[#allocation2 + $0x64] sm:$0xf]  ;;  %v3789_v2 = vld [vmem:[#allocation2 + $0x30] sm:$0xe] }
 0x207   : > { %6678 = vmatprep.subr.bf16.mxu0 %v7272_v61  ;;  %v3543_v18 = vshrl.u32 %v8672_v29, 16 }
 0x209   : > { %v3545_v28 = vrot.slane %v3543_v18, 4 }
 0x20a   : > { %6679 = vmatpush3.bf16.msra.mxu0 %v7272_v61  ;;  %v3467_v61 = vshll.u32 %v8628_v30, 16 }
 0x20b   : > { %6696 = vmatprep.subr.bf16.mxu0 %v7273_v56 }
 0x20c   : > { %v8659_v6 = vrot.slane %v3467_v61, 5 }
 0x20d   : > { %6681 = vmatmul.mubr.bf16.vlgmr.msra.gmra.mrb[32].mxu0 %v7274_v5  ;;  %v3495_v5 = vshrl.u32 %v8634_v19, 16 }
 0x20e   : > { %6697 = vmatpush3.bf16.msra.mxu0 %v7273_v56  ;;  %6684 = vmatprep.mubr.bf16.mxu0 %v7275_v26  ;;  %v3491_v56 = vshll.u32 %v8634_v19, 16  ;;  %v3431_v26 = vrot.slane %v3429_v3, 5 }
 0x20f   : > { %6698 = vmatprep.subr.bf16.mxu0 %v7276_v25 }
 0x210   : > { %v3432_v43 = vsel %vm7934_vm11, %v3427_v48, %v3431_v26  ;;  %v8661_v11 = vrot.slane %v3491_v56, 5  ;;  %v3539_v48 = vshll.u32 %v8672_v29, 16 }
 0x211   : > { %v5972_v39 = vcombine.low %v3422_v59, %v3432_v43  ;;  %v8706_v59 = vld [vmem:[#allocation2 + $0x5c] sm:$0x1] }
 0x212   : > { %6699 = vmatpush3.bf16.msra.mxu0 %v7276_v25  ;;  %v3398_v25 = vsel %vm7934_vm11, %v3393_v45, %v8610_v12  ;;  %v3497_v12 = vrot.slane %v3495_v5, 4  ;;  %v3376_v45 = vld [vmem:[#allocation2 + $0x54] sm:$0xf]  ;;  %v3541_v43 = vrot.slane %v3539_v48, 5 }
 0x213   : > { %6700 = vmatprep.subr.bf16.mxu0 %v7277_v47  ;;  %v5971_v9 = vcombine.low %v3398_v25, %v3408_v49  ;;  %v3506_v61 = vshrl.u32 %v3376_v45, 16  ;;  %v3503_v49 = vrot.slane %v3501_v57, 5 }
 0x215   : > { %6685 = vmatmul.mubr.bf16.gmra.mrb[36].mxu0 %v7278_v14  ;;  %v3485_v14 = vshll.u32 %v3373_v38, 16  ;;  %v3464_v38 = vor.u32 %v3463_v54, %v3460_v22  ;;  %v3554_v22 = vshrl.u32 %v3382_v46, 16  ;;  %v3567_v54 = vshrl.u32 %v8695_v53, 16 }
 0x216   : > { %6701 = vmatpush3.bf16.msra.mxu0 %v7277_v47  ;;  %6688 = vmatprep.mubr.bf16.mxu0 %v7279_v55  ;;  %v3450_v47 = vor.u32 %v3449_v50, %v8636_v32  ;;  %v3473_v55 = vrot.slane %v3471_v51, 4  ;;  %v3477_v50 = vshll.u32 %v8663_v0, 16  ;;  %v3509_v51 = vshll.u32 %v3376_v45, 16  ;;  %v7289_v32 = vld [vmem:[%s9345_s3 + $0x208] sm:$0xff]  }
 0x217   : > { %6702 = vmatprep.subr.bf16.mxu0 %v7280_v16  ;;  %v3487_v10 = vrot.slane %v3485_v14, 5  ;;  %v3465_v14 = vrot.slane %v3464_v38, 4  ;;  %v3556_v57 = vrot.slane %v3554_v22, 4  ;;  %v3569_v48 = vrot.slane %v3567_v54, 4  ;;  %v7295_v54 = vld [vmem:[%s9345_s3 + $0x238] sm:$0xff]  }
 0x218   : > { %v3451_v34 = vrot.slane %v3450_v47, 4  ;;  %v3474_v31 = vor.u32 %v3473_v55, %v8659_v6  ;;  %v3479_v47 = vrot.slane %v3477_v50, 5  ;;  %v3511_v55 = vrot.slane %v3509_v51, 5  ;;  %v7292_v51 = vld [vmem:[%s9345_s3 + $0x220] sm:$0xff]  }
 0x21a   : > { %6703 = vmatpush3.bf16.msra.mxu0 %v7280_v16  ;;  %v7286_v16 = vld [vmem:[#allocation2 + $0x6c] sm:$0xff]   ;;  %v3456_v17 = vsel %vm7934_vm11, %v3451_v34, %v3455_v60  ;;  %v3475_v56 = vrot.slane %v3474_v31, 4  ;;  %v3470_v31 = vsel %vm7934_vm11, %v3465_v14, %v8659_v6 }
 0x21b   : > { %6704 = vmatprep.subr.bf16.mxu0 %v7281_v35  ;;  %v5973_v63 = vcombine.low %v3446_v1, %v3456_v17  ;;  %v7291_v17 = vld [vmem:[%s9345_s3 + $0x218] sm:$0xff]  }
 0x21c   : > { %v3480_v24 = vsel %vm7934_vm11, %v3475_v56, %v3479_v47  ;;  %v3560_v56 = vor.u32 %v3559_v37, %v3556_v57 }
 0x21d   : > { %6689 = vmatmul.mubr.bf16.gmra.mrb[40].mxu0 %v7282_v27  ;;  %v7288_v27 = vld [vmem:[%s9345_s3 + $0x200] sm:$0xff]  }
 0x21e   : > { %6705 = vmatpush3.bf16.msra.mxu0 %v7281_v35  ;;  %6692 = vmatprep.mubr.bf16.mxu0 %v7283_v13  ;;  %v8665_v35 = vld [vmem:[#allocation2 + $0x58] sm:$0xf]  ;;  %v3561_v14 = vrot.slane %v3560_v56, 4 }
 0x21f   : > { %6706 = vmatprep.subr.bf16.mxu0 %v7284_v58  ;;  %v3515_v3 = vshll.u32 %v8665_v35, 16  ;;  %v3519_v13 = vshrl.u32 %v8665_v35, 16 }
 0x221   : > { %v8693_v25 = vrot.slane %v3515_v3, 5  ;;  %v3521_v26 = vrot.slane %v3519_v13, 4  ;;  %v3525_v3 = vshll.u32 %v8706_v59, 16  ;;  %v5974_v13 = vcombine.low %v3470_v31, %v3480_v24 }
 0x222   : > { %6707 = vmatpush3.bf16.msra.mxu0 %v7284_v58  ;;  %v3498_v58 = vor.u32 %v3497_v12, %v8661_v11  ;;  %v8697_v12 = vld [vmem:[#allocation2 + $0x68] sm:$0x1]  ;;  %v3838_v31 = vrot.slane %v8638_v40, 5 }
 0x223   : > { %6708 = vmatprep.subr.bf16.mxu0 %v7285_v8  ;;  %v3522_v60 = vor.u32 %v3521_v26, %v8693_v25 }
 0x224   : > { %v3499_v5 = vrot.slane %v3498_v58, 4 }
 0x225   : > { %6693 = vmatmul.mubr.bf16.gmra.mrb[44].mxu0 %v7286_v16  ;;  %v3523_v50 = vrot.slane %v3522_v60, 4 }
 0x226   : > { %6709 = vmatpush3.bf16.msra.mxu0 %v7285_v8  ;;  %6712 = vmatprep.mubr.bf16.mxu0 %v5971_v9  ;;  %v3488_v8 = vor.u32 %v3487_v10, %v3484_v20  ;;  %v7290_v9 = vld [vmem:[%s9345_s3 + $0x210] sm:$0xff]   ;;  %v3504_v34 = vsel %vm7934_vm11, %v3499_v5, %v3503_v49  ;;  %v3536_v20 = vor.u32 %v3535_v21, %v3532_v41  ;;  %v3821_v49 = vrot.slane %v8596_v52, 5  ;;  %v7293_v21 = vld [vmem:[%s9345_s3 + $0x228] sm:$0xff]   ;;  %v3787_v52 = vld [vmem:[#allocation2 + $0x18] sm:$0xe] }
 0x227   : > { %6710 = vmatprep.subr.bf16.mxu0 %v7287_v62  ;;  %v3546_v10 = vor.u32 %v3545_v28, %v3541_v43  ;;  %v5987_v60 = vrot.slane %v3787_v52, 9 }
 0x228   : > { %v3489_v16 = vrot.slane %v3488_v8, 4  ;;  %v3537_v6 = vrot.slane %v3536_v20, 4 }
 0x229   : > { %v3547_v18 = vrot.slane %v3546_v10, 4  ;;  %v3837_v10 = vrot.slane %v3835_v33, 4 }
 0x22a   : > { %6711 = vmatpush3.bf16.msra.mxu0 %v7287_v62  ;;  %v3508_v62 = vrot.slane %v3506_v61, 4  ;;  %v3494_v58 = vsel %vm7934_vm11, %v3489_v16, %v8661_v11  ;;  %v8722_v11 = vld [vmem:[#allocation2 + $0x74] sm:$0x1]  ;;  %v3527_v61 = vrot.slane %v3525_v3, 5  ;;  %v3842_v3 = vrot.slane %v8628_v30, 5 }
 0x22b   : > { %6728 = vmatprep.subr.bf16.mxu0 %v7288_v27  ;;  %v5975_v1 = vcombine.low %v3494_v58, %v3504_v34  ;;  %v3573_v26 = vshll.u32 %v8722_v11, 16  ;;  %v3828_v34 = vrot.slane %v8601_v7, 5  ;;  %v3788_v7 = vld [vmem:[#allocation2 + $0x24] sm:$0xe]  ;;  %v3845_v30 = vrot.slane %v8663_v0, 5 }
 0x22c   : > { %v3512_v45 = vor.u32 %v3511_v55, %v3508_v62  ;;  %v3823_v62 = vrot.slane %v3821_v49, 4  ;;  %v3824_v55 = vrot.slane %v8619_v23, 5  ;;  %v3822_v23 = vsel %vm8113_vm14, %v5987_v60, %v3821_v49  ;;  %v7316_v60 = vld [vmem:[%s9347_s5 + $0xc4] ss:$16 sps:$4 sm:$0xff]  }
 0x22d   : > { %6713 = vmatmul.mubr.bf16.vlgmr.msra.gmra.mrb[32].mxu0 %v5972_v39  ;;  %v3563_v39 = vshll.u32 %v8695_v53, 16  ;;  %v3830_v20 = vrot.slane %v3828_v34, 4  ;;  %v5988_v58 = vrot.slane %v3788_v7, 9  ;;  %v3844_v37 = vrot.slane %v3842_v3, 4  ;;  %4358 = vmatprep.subr.bf16.mxu1 %v7316_v60 }
 0x22e   : > { %6729 = vmatpush3.bf16.msra.mxu0 %v7288_v27  ;;  %6716 = vmatprep.mubr.bf16.mxu0 %v5973_v63  ;;  %v3549_v27 = vshll.u32 %v8697_v12, 16  ;;  %v3513_v8 = vrot.slane %v3512_v45, 4  ;;  %v3542_v63 = vsel %vm7934_vm11, %v3537_v6, %v3541_v43  ;;  %v3575_v43 = vrot.slane %v3573_v26, 5  ;;  %v3791_v6 = vld [vmem:[#allocation2 + $0x48] sm:$0xe] }
 0x22f   : > { %6730 = vmatprep.subr.bf16.mxu0 %v7289_v32  ;;  %v3565_v42 = vrot.slane %v3563_v39, 5  ;;  %v3825_v22 = vsel %vm8113_vm14, %v3823_v62, %v3824_v55  ;;  %v3873_v55 = vrot.slane %v8722_v11, 5  ;;  %v7317_v11 = vld [vmem:[%s9347_s5 + $0xe0] ss:$16 sps:$4 sm:$0xff]  }
 0x230   : > { %v3551_v38 = vrot.slane %v3549_v27, 5  ;;  %v3518_v46 = vsel %vm7934_vm11, %v3513_v8, %v8693_v25  ;;  %v7294_v25 = vld [vmem:[%s9345_s3 + $0x230] sm:$0xff]   ;;  %v6011_v4 = vcombine.low %v3822_v23, %v3825_v22  ;;  %v3831_v27 = vrot.slane %v8621_v44, 5  ;;  %v7322_v22 = vld [vmem:[%s9347_s5 + $0xc] ss:$16 sps:$4 sm:$0xff]  }
 0x231   : > { %v3570_v5 = vor.u32 %v3569_v48, %v3565_v42  ;;  %v3829_v44 = vsel %vm8113_vm14, %v5988_v58, %v3828_v34  ;;  %v3856_v8 = vrot.slane %v8665_v35, 5  ;;  %v7314_v34 = vld [vmem:[%s9347_s5 + $0xc0] ss:$16 sps:$4 sm:$0xff]  }
 0x232   : > { %6731 = vmatpush3.bf16.msra.mxu0 %v7289_v32  ;;  %v3528_v32 = vsel %vm7934_vm11, %v3523_v50, %v3527_v61  ;;  %v3552_v47 = vsel %vm7934_vm11, %v3547_v18, %v3551_v38  ;;  %v3832_v45 = vsel %vm8113_vm14, %v3830_v20, %v3831_v27  ;;  %v3852_v18 = vrot.slane %v8670_v15, 5  ;;  %4359 = vmatpush1.bf16.msra.mxu1 %v7314_v34 }
 0x233   : > { %6732 = vmatprep.subr.bf16.mxu0 %v7290_v9  ;;  %v5976_v41 = vcombine.low %v3518_v46, %v3528_v32  ;;  %v5977_v28 = vcombine.low %v3542_v63, %v3552_v47  ;;  %v3571_v16 = vrot.slane %v3570_v5, 4  ;;  %v6012_v50 = vcombine.low %v3829_v44, %v3832_v45  ;;  %v3793_v5 = vld [vmem:[#allocation2 + $0x60] sm:$0xe]  ;;  %v3792_v47 = vld [vmem:[#allocation2 + $0x54] sm:$0xe]  ;;  %4360 = vmatprep.subr.bf16.mxu1 %v7319_v36 }
 0x234   : > { %v3846_v38 = vsel %vm8113_vm14, %v3844_v37, %v3845_v30  ;;  %v5991_v61 = vrot.slane %v3791_v6, 9  ;;  %v3863_v32 = vrot.slane %v8672_v29, 5  ;;  %v3858_v63 = vrot.slane %v3856_v8, 4  ;;  %v7323_v6 = vld [vmem:[%s9347_s5 + $0x28] ss:$16 sps:$4 sm:$0xff]  }
 0x235   : > { %6717 = vmatmul.mubr.bf16.gmra.mrb[36].mxu0 %v5974_v13  ;;  %v3576_v24 = vsel %vm7934_vm11, %v3571_v16, %v3575_v43  ;;  %v5989_v13 = vrot.slane %v3789_v2, 9  ;;  %v5993_v49 = vrot.slane %v3793_v5, 9  ;;  %v3866_v46 = vrot.slane %v8697_v12, 5  ;;  %v3794_v43 = vld [vmem:[#allocation2 + $0x6c] sm:$0xe] }
 0x236   : > { %6733 = vmatpush3.bf16.msra.mxu0 %v7290_v9  ;;  %6720 = vmatprep.mubr.bf16.mxu0 %v5975_v1  ;;  %v3566_v9 = vsel %vm7934_vm11, %v3561_v14, %v3565_v42  ;;  %v3839_v1 = vsel %vm8113_vm14, %v3837_v10, %v3838_v31  ;;  %v3790_v42 = vld [vmem:[#allocation2 + $0x3c] sm:$0xe]  ;;  %v3865_v35 = vrot.slane %v3863_v32, 4  ;;  %v5992_v29 = vrot.slane %v3792_v47, 9 }
 0x237   : > { %6734 = vmatprep.subr.bf16.mxu0 %v7291_v17  ;;  %v5978_v39 = vcombine.low %v3566_v9, %v3576_v24  ;;  %v3836_v40 = vsel %vm8113_vm14, %v5989_v13, %v3835_v33  ;;  %v3864_v14 = vsel %vm8113_vm14, %v5993_v49, %v3863_v32  ;;  %4361 = vmatpush1.bf16.msra.mxu1 %v7317_v11  ;;  %v7553_v33 = vmov 0   ;;  %v7335_v11 = vld [vmem:[%s9347_s5 + $0xa8] ss:$16 sps:$4 sm:$0xff]  }
 0x238   : > { %v6013_v57 = vcombine.low %v3836_v40, %v3839_v1  ;;  %v3867_v16 = vsel %vm8113_vm14, %v3865_v35, %v3866_v46  ;;  %v3857_v62 = vsel %vm8113_vm14, %v5992_v29, %v3856_v8  ;;  %4378 = vmatprep.mubr.bf16.mxu1 %v7553_v33  ;;  %4459 = vmatprep.subr.bf16.mxu1 %v7322_v22  ;;  %v7320_v1 = vld [vmem:[%s9347_s5 + $0x8] ss:$16 sps:$4 sm:$0xff]   ;;  %v7340_v22 = vld [vmem:[%s9347_s5 + $0xcc] ss:$16 sps:$4 sm:$0xff]  }
 0x239   : > { %v6017_v52 = vcombine.low %v3864_v14, %v3867_v16 }
 0x23a   : > { %6735 = vmatpush3.bf16.msra.mxu0 %v7291_v17  ;;  %v3849_v17 = vrot.slane %v8634_v19, 5  ;;  %v5990_v19 = vrot.slane %v3790_v42, 9 }
 0x23b   : > { %6736 = vmatprep.subr.bf16.mxu0 %v7292_v51 }
 0x23c   : > { %v3851_v48 = vrot.slane %v3849_v17, 4  ;;  %v3843_v56 = vsel %vm8113_vm14, %v5990_v19, %v3842_v3  ;;  %v3850_v15 = vsel %vm8113_vm14, %v5991_v61, %v3849_v17  ;;  %v7328_v19 = vld [vmem:[%s9347_s5 + $0x4c] ss:$16 sps:$4 sm:$0xff]  }
 0x23d   : > { %6721 = vmatmul.mubr.bf16.gmra.mrb[40].mxu0 %v5976_v41  ;;  %v6014_v0 = vcombine.low %v3843_v56, %v3846_v38  ;;  %v3859_v41 = vrot.slane %v8706_v59, 5  ;;  %v7326_v56 = vld [vmem:[%s9347_s5 + $0x48] ss:$16 sps:$4 sm:$0xff]  }
 0x23e   : > { %6737 = vmatpush3.bf16.msra.mxu0 %v7292_v51  ;;  %6724 = vmatprep.mubr.bf16.mxu0 %v5977_v28  ;;  %v3853_v51 = vsel %vm8113_vm14, %v3851_v48, %v3852_v18  ;;  %v3870_v28 = vrot.slane %v8695_v53, 5 }
 0x23f   : > { %6738 = vmatprep.subr.bf16.mxu0 %v7293_v21  ;;  %v6015_v26 = vcombine.low %v3850_v15, %v3853_v51  ;;  %v7331_v15 = vld [vmem:[%s9347_s5 + $0x6c] ss:$16 sps:$4 sm:$0xff]  }
 0x240   : > { %v3872_v59 = vrot.slane %v3870_v28, 4 }
 0x242   : > { %6739 = vmatpush3.bf16.msra.mxu0 %v7293_v21  ;;  %v3860_v21 = vsel %vm8113_vm14, %v3858_v63, %v3859_v41  ;;  %v3874_v9 = vsel %vm8113_vm14, %v3872_v59, %v3873_v55  ;;  %v7329_v41 = vld [vmem:[%s9347_s5 + $0x68] ss:$16 sps:$4 sm:$0xff]   ;;  %v7337_v59 = vld [vmem:[%s9347_s5 + $0xac] ss:$16 sps:$4 sm:$0xff]  }
 0x243   : > { %6740 = vmatprep.subr.bf16.mxu0 %v7294_v25  ;;  %v6016_v12 = vcombine.low %v3857_v62, %v3860_v21  ;;  %v7334_v21 = vld [vmem:[%s9347_s5 + $0x8c] ss:$16 sps:$4 sm:$0xff]  }
 0x245   : > { %6725 = vmatmul.mubr.bf16.gmra.mrb[44].mxu0 %v5978_v39  ;;  %v8817_v39 = vld [vmem:[%s9346_s4] ss:$0 sm:$0xff] }
 0x246   : > { %6741 = vmatpush3.bf16.msra.mxu0 %v7294_v25  ;;  %6744 = vmatprep.mubr.bf16.mxu0 %v6011_v4  ;;  %v5994_v25 = vrot.slane %v3794_v43, 9 }
 0x247   : > { %6742 = vmatprep.subr.bf16.mxu0 %v7295_v54 }
 0x248   : > { %v3871_v53 = vsel %vm8113_vm14, %v5994_v25, %v3870_v28 }
 0x249   : > { %v6018_v24 = vcombine.low %v3871_v53, %v3874_v9 }
 0x24a   : > { %6743 = vmatpush3.bf16.msra.mxu0 %v7295_v54 }
 0x24d   : > { %6745 = vmatmul.mubr.bf16.vlgmr.msra.gmra.mrb[32].mxu0 %v6012_v50  ;;  %v7325_v50 = vld [vmem:[%s9347_s5 + $0x2c] ss:$16 sps:$4 sm:$0xff]  }
 0x24e   : > { %6748 = vmatprep.mubr.bf16.mxu0 %v6013_v57 }
 0x255   : > { %6749 = vmatmul.mubr.bf16.gmra.mrb[36].mxu0 %v6014_v0 }
 0x256   : > { %6752 = vmatprep.mubr.bf16.mxu0 %v6015_v26 }
 0x25d   : > { %6753 = vmatmul.mubr.bf16.gmra.mrb[40].mxu0 %v6016_v12  ;;  %v7332_v12 = vld [vmem:[%s9347_s5 + $0x88] ss:$16 sps:$4 sm:$0xff]  }
 0x25e   : > { %6756 = vmatprep.mubr.bf16.mxu0 %v6017_v52 }
 0x265   : > { %6757 = vmatmul.mubr.bf16.gmra.mrb[44].mxu0 %v6018_v24 }
 0x320   : > { %v6746_v23 = vpop.f32.mrb[32].mxu0 }
 0x321   : > { %v4094_v54 = vadd.f32 %v6746_v23, %v8817_v39  ;;  %v4006_v4 = vpop.f32.mrb[33].mxu0 }
 0x322   : > { %v4092_v20 = vadd.f32 %v8817_v39, %v4006_v4  ;;  %v6747_v7 = vpop.f32.mrb[34].mxu0 }
 0x323   : > { %v4095_v10 = vadd.f32 %v6747_v7, %v8817_v39  ;;  %v4009_v27 = vpop.f32.mrb[35].mxu0  ;;  %v4110_v31 = vmax.f32 %v4094_v54, 0.0 }
 0x324   : > { %v4093_v2 = vadd.f32 %v8817_v39, %v4009_v27  ;;  %v4108_v45 = vmax.f32 %v4092_v20, 0.0 }
 0x325   : > { %v4111_v58 = vmax.f32 %v4095_v10, 0.0  ;;  %v7338_v10 = vld [vmem:[%s9347_s5 + $0xc8] ss:$16 sps:$4 sm:$0xff]  }
 0x326   : > { %v4109_v3 = vmax.f32 %v4093_v2, 0.0  ;;  %v7341_v2 = vld [vmem:[%s9347_s5 + $0xe8] ss:$16 sps:$4 sm:$0xff]  }
 0x327   : > { %v8823_v13 = vpack.c.bf16 %v4111_v58, %v4110_v31  ;;  %v7346_v31 = vld [vmem:[%s9349_s7 + $0x4] ss:$16 sps:$4 sm:$0xff]   ;;  %v7344_v58 = vld [vmem:[%s9349_s7] ss:$16 sps:$4 sm:$0xff]  }
 0x328   : > { %v8828_v17 = vpack.c.bf16 %v4109_v3, %v4108_v45  ;;  %v6750_v44 = vpop.f32.mrb[36].mxu0  ;;  %v7349_v45 = vld [vmem:[%s9349_s7 + $0x24] ss:$16 sps:$4 sm:$0xff]   ;;  %v7347_v3 = vld [vmem:[%s9349_s7 + $0x20] ss:$16 sps:$4 sm:$0xff]  }
 0x329   : > { %v4098_v40 = vadd.f32 %v6750_v44, %v8817_v39  ;;  %v4022_v57 = vpop.f32.mrb[37].mxu0  ;;  %v7350_v44 = vld [vmem:[%s9349_s7 + $0x40] ss:$16 sps:$4 sm:$0xff]  }
 0x32a   : > { %v4096_v37 = vadd.f32 %v8817_v39, %v4022_v57  ;;  %v6751_v42 = vpop.f32.mrb[38].mxu0  ;;  %4379 = vmatmul.mubr.bf16.vlgmr.msra.gmra.mrb[8].mxu1 %v8828_v17  ;;  %v7356_v57 = vld [vmem:[%s9349_s7 + $0x80] ss:$16 sps:$4 sm:$0xff]  }
 0x32b   : > { %v4099_v48 = vadd.f32 %v6751_v42, %v8817_v39  ;;  %4460 = vmatpush1.bf16.msra.mxu1 %v7320_v1  ;;  %v4025_v30 = vpop.f32.mrb[39].mxu0  ;;  %4388 = vmatprep.mubr.bf16.mxu1 %v7553_v33  ;;  %v4114_v38 = vmax.f32 %v4098_v40, 0.0  ;;  %v7352_v1 = vld [vmem:[%s9349_s7 + $0x44] ss:$16 sps:$4 sm:$0xff]  }
 0x32c   : > { %v4097_v18 = vadd.f32 %v8817_v39, %v4025_v30  ;;  %4461 = vmatprep.subr.bf16.mxu1 %v7325_v50  ;;  %v4112_v61 = vmax.f32 %v4096_v37, 0.0  ;;  %v7353_v50 = vld [vmem:[%s9349_s7 + $0x60] ss:$16 sps:$4 sm:$0xff]   ;;  %v7358_v40 = vld [vmem:[%s9349_s7 + $0x84] ss:$16 sps:$4 sm:$0xff]  }
 0x32d   : > { %v4115_v8 = vmax.f32 %v4099_v48, 0.0  ;;  %v7359_v37 = vld [vmem:[%s9349_s7 + $0xa0] ss:$16 sps:$4 sm:$0xff]   ;;  %v7364_v42 = vld [vmem:[%s9349_s7 + $0xc4] ss:$16 sps:$4 sm:$0xff]  }
 0x32e   : > { %v4113_v51 = vmax.f32 %v4097_v18, 0.0  ;;  %v7362_v48 = vld [vmem:[%s9349_s7 + $0xc0] ss:$16 sps:$4 sm:$0xff]   ;;  %v7367_v30 = vld [vmem:[%s9349_s7 + $0xe4] ss:$16 sps:$4 sm:$0xff]  }
 0x32f   : > { %v8845_v32 = vpack.c.bf16 %v4115_v8, %v4114_v38  ;;  %4462 = vmatpush1.bf16.msra.mxu1 %v7323_v6  ;;  %v7365_v6 = vld [vmem:[%s9349_s7 + $0xe0] ss:$16 sps:$4 sm:$0xff]   ;;  %v7370_v18 = vld [vmem:[%s9349_s7 + $0x104] ss:$16 sps:$4 sm:$0xff]  }
 0x330   : > { %v8850_v5 = vpack.c.bf16 %v4113_v51, %v4112_v61  ;;  %v6754_v0 = vpop.f32.mrb[40].mxu0  ;;  %4463 = vmatprep.subr.bf16.mxu1 %v7328_v19  ;;  %v7368_v19 = vld [vmem:[%s9349_s7 + $0x100] ss:$16 sps:$4 sm:$0xff]   ;;  %v7373_v38 = vld [vmem:[%s9349_s7 + $0x124] ss:$16 sps:$4 sm:$0xff]  }
 0x331   : > { %v4102_v26 = vadd.f32 %v6754_v0, %v8817_v39  ;;  %v4038_v63 = vpop.f32.mrb[41].mxu0  ;;  %v7371_v8 = vld [vmem:[%s9349_s7 + $0x120] ss:$16 sps:$4 sm:$0xff]   ;;  %v7376_v61 = vld [vmem:[%s9349_s7 + $0x144] ss:$16 sps:$4 sm:$0xff]  }
 0x332   : > { %v4100_v47 = vadd.f32 %v8817_v39, %v4038_v63  ;;  %v6755_v49 = vpop.f32.mrb[42].mxu0  ;;  %4389 = vmatmul.mubr.bf16.gmra.mrb[12].mxu1 %v8823_v13  ;;  %v7374_v51 = vld [vmem:[%s9349_s7 + $0x140] ss:$16 sps:$4 sm:$0xff]   ;;  %v7388_v63 = vld [vmem:[%s9349_s7 + $0x1c4] ss:$16 sps:$4 sm:$0xff]  }
 0x333   : > { %v4103_v35 = vadd.f32 %v6755_v49, %v8817_v39  ;;  %v4041_v46 = vpop.f32.mrb[43].mxu0  ;;  %4398 = vmatprep.mubr.bf16.mxu1 %v7553_v33  ;;  %4464 = vmatpush1.bf16.msra.mxu1 %v7326_v56  ;;  %v4118_v28 = vmax.f32 %v4102_v26, 0.0  ;;  %v7377_v56 = vld [vmem:[%s9349_s7 + $0x160] ss:$16 sps:$4 sm:$0xff]   ;;  %v7391_v49 = vld [vmem:[%s9349_s7 + $0x1e4] ss:$16 sps:$4 sm:$0xff]  }
 0x334   : > { %v4101_v29 = vadd.f32 %v8817_v39, %v4041_v46  ;;  %4465 = vmatprep.subr.bf16.mxu1 %v7331_v15  ;;  %v4116_v16 = vmax.f32 %v4100_v47, 0.0  ;;  %v7380_v0 = vld [vmem:[%s9349_s7 + $0x180] ss:$16 sps:$4 sm:$0xff]   ;;  %v7385_v15 = vld [vmem:[%s9349_s7 + $0x1a4] ss:$16 sps:$4 sm:$0xff]  }
 0x335   : > { %v4119_v14 = vmax.f32 %v4103_v35, 0.0  ;;  %v7383_v26 = vld [vmem:[%s9349_s7 + $0x1a0] ss:$16 sps:$4 sm:$0xff]   ;;  %v9024_v35 = vld [vmem:[%s7741_s29 + $0x4] ss:$8 sps:$4 sm:$0xff]  }
 0x336   : > { %v4117_v43 = vmax.f32 %v4101_v29, 0.0  ;;  %v7386_v47 = vld [vmem:[%s9349_s7 + $0x1c0] ss:$16 sps:$4 sm:$0xff]   ;;  %v7394_v46 = vld [vmem:[%s9349_s7 + $0xc] ss:$16 sps:$4 sm:$0xff]  }
 0x337   : > { %v8867_v62 = vpack.c.bf16 %v4119_v14, %v4118_v28  ;;  %4466 = vmatpush1.bf16.msra.mxu1 %v7329_v41  ;;  %v7392_v41 = vld [vmem:[%s9349_s7 + $0x8] ss:$16 sps:$4 sm:$0xff]   ;;  %v7397_v29 = vld [vmem:[%s9349_s7 + $0x2c] ss:$16 sps:$4 sm:$0xff]  }
 0x338   : > { %v8872_v52 = vpack.c.bf16 %v4117_v43, %v4116_v16  ;;  %v6758_v25 = vpop.f32.mrb[44].mxu0  ;;  %4467 = vmatprep.subr.bf16.mxu1 %v7334_v21  ;;  %v9037_v21 = vld [vmem:[%s7741_s29] ss:$8 sps:$4 sm:$0xff]   ;;  %v9044_v14 = vld [vmem:[%s7741_s29 + $0x14] ss:$8 sps:$4 sm:$0xff]  }
 0x339   : > { %v4106_v55 = vadd.f32 %v6758_v25, %v8817_v39  ;;  %v4054_v53 = vpop.f32.mrb[45].mxu0  ;;  %v7395_v28 = vld [vmem:[%s9349_s7 + $0x28] ss:$16 sps:$4 sm:$0xff]   ;;  %v7400_v16 = vld [vmem:[%s9349_s7 + $0x4c] ss:$16 sps:$4 sm:$0xff]  }
 0x33a   : > { %v4104_v9 = vadd.f32 %v8817_v39, %v4054_v53  ;;  %v6759_v24 = vpop.f32.mrb[46].mxu0  ;;  %4399 = vmatmul.mubr.bf16.gmra.mrb[16].mxu1 %v8850_v5  ;;  %v7398_v43 = vld [vmem:[%s9349_s7 + $0x48] ss:$16 sps:$4 sm:$0xff]   ;;  %v9064_v25 = vld [vmem:[%s7741_s29 + $0x24] ss:$8 sps:$4 sm:$0xff]  }
 0x33b   : > { %v4107_v34 = vadd.f32 %v6759_v24, %v8817_v39  ;;  %v4057_v60 = vpop.f32.mrb[47].mxu0  ;;  %4408 = vmatprep.mubr.bf16.mxu1 %v7553_v33  ;;  %4468 = vmatpush1.bf16.msra.mxu1 %v7332_v12  ;;  %v4122_v23 = vmax.f32 %v4106_v55, 0.0  ;;  %v9057_v12 = vld [vmem:[%s7741_s29 + $0x10] ss:$8 sps:$4 sm:$0xff]   ;;  %v7409_v53 = vld [vmem:[%s9349_s7 + $0xac] ss:$16 sps:$4 sm:$0xff]  }
 0x33c   : > { %v4105_v36 = vadd.f32 %v8817_v39, %v4057_v60  ;;  %4469 = vmatprep.subr.bf16.mxu1 %v7337_v59  ;;  %v4120_v4 = vmax.f32 %v4104_v9, 0.0  ;;  %v7343_v39 = vld [vmem:[%s9347_s5 + $0xec] ss:$16 sps:$4 sm:$0xff]   ;;  %v7404_v55 = vld [vmem:[%s9349_s7 + $0x88] ss:$16 sps:$4 sm:$0xff]  }
 0x33d   : > { %v4123_v54 = vmax.f32 %v4107_v34, 0.0  ;;  %v7406_v59 = vld [vmem:[%s9349_s7 + $0x8c] ss:$16 sps:$4 sm:$0xff]   ;;  %v9077_v9 = vld [vmem:[%s7741_s29 + $0x20] ss:$8 sps:$4 sm:$0xff]  }
 0x33e   : > { %v4121_v20 = vmax.f32 %v4105_v36, 0.0  ;;  %v7407_v24 = vld [vmem:[%s9349_s7 + $0xa8] ss:$16 sps:$4 sm:$0xff]   ;;  %v9084_v34 = vld [vmem:[%s7741_s29 + $0x34] ss:$8 sps:$4 sm:$0xff]  }
 0x33f   : > { %v8889_v7 = vpack.c.bf16 %v4123_v54, %v4122_v23  ;;  %4470 = vmatpush1.bf16.msra.mxu1 %v7335_v11  ;;  %v7412_v60 = vld [vmem:[%s9349_s7 + $0xcc] ss:$16 sps:$4 sm:$0xff]   ;;  %v7410_v11 = vld [vmem:[%s9349_s7 + $0xc8] ss:$16 sps:$4 sm:$0xff]  }
 0x340   : > { %v8894_v27 = vpack.c.bf16 %v4121_v20, %v4120_v4  ;;  %4471 = vmatprep.subr.bf16.mxu1 %v7340_v22  ;;  %v7415_v36 = vld [vmem:[%s9349_s7 + $0xec] ss:$16 sps:$4 sm:$0xff]   ;;  %v7448_v22 = vld [vmem:[%s7741_s29 + $0x30] ss:$8 sps:$4 sm:$0xff]  }
 0x341   : > { %v7413_v23 = vld [vmem:[%s9349_s7 + $0xe8] ss:$16 sps:$4 sm:$0xff]   ;;  %v7449_v54 = vld [vmem:[%s7741_s29 + $0x44] ss:$8 sps:$4 sm:$0xff]  }
 0x342   : > { %4409 = vmatmul.mubr.bf16.gmra.mrb[20].mxu1 %v8845_v32  ;;  %v7418_v4 = vld [vmem:[%s9349_s7 + $0x10c] ss:$16 sps:$4 sm:$0xff]   ;;  %v7416_v20 = vld [vmem:[%s9349_s7 + $0x108] ss:$16 sps:$4 sm:$0xff]  }
 0x343   : > { %4418 = vmatprep.mubr.bf16.mxu1 %v7553_v33  ;;  %4472 = vmatpush1.bf16.msra.mxu1 %v7338_v10  ;;  %v7450_v10 = vld [vmem:[%s7741_s29 + $0x40] ss:$8 sps:$4 sm:$0xff]  }
 0x344   : > { %4473 = vmatprep.subr.bf16.mxu1 %v7343_v39  ;;  %v7451_v39 = vld [vmem:[%s7741_s29 + $0x54] ss:$8 sps:$4 sm:$0xff]  }
 0x347   : > { %4474 = vmatpush1.bf16.msra.mxu1 %v7341_v2  ;;  %v7424_v2 = vld [vmem:[%s9349_s7 + $0x14c] ss:$16 sps:$4 sm:$0xff]  }
 0x348   : > { %4978 = vmatprep.subr.bf16.mxu1 %v7346_v31  ;;  %v7422_v31 = vld [vmem:[%s9349_s7 + $0x148] ss:$16 sps:$4 sm:$0xff]  }
 0x34a   : > { %4419 = vmatmul.mubr.bf16.gmra.mrb[24].mxu1 %v8872_v52 }
 0x34b   : > { %4428 = vmatprep.mubr.bf16.mxu1 %v7553_v33 }
 0x352   : > { %4429 = vmatmul.mubr.bf16.gmra.mrb[28].mxu1 %v8867_v62 }
 0x353   : > { %4438 = vmatprep.mubr.bf16.mxu1 %v7553_v33 }
 0x35a   : > { %4439 = vmatmul.mubr.bf16.gmra.mrb[32].mxu1 %v8894_v27 }
 0x35b   : > { %4448 = vmatprep.mubr.bf16.mxu1 %v7553_v33 }
 0x362   : > { %4449 = vmatmul.mubr.bf16.gmra.mrb[36].mxu1 %v8889_v7 }
 0x363   : > { %4491 = vmatprep.mubr.bf16.mxu1 %v7553_v33 }
 0x36a   : > { %4492 = vmatmul.mubr.bf16.vlgmr.msra.gmra.mrb[40].mxu1 %v8828_v17  ;;  %v7355_v17 = vld [vmem:[%s9349_s7 + $0x64] ss:$16 sps:$4 sm:$0xff]  }
 0x36b   : > { %4979 = vmatpush1.bf16.msra.mxu1 %v7344_v58  ;;  %4501 = vmatprep.mubr.bf16.mxu1 %v7553_v33  ;;  %v7427_v58 = vld [vmem:[%s9349_s7 + $0x16c] ss:$16 sps:$4 sm:$0xff]  }
 0x36c   : > { %4980 = vmatprep.subr.bf16.mxu1 %v7349_v45  ;;  %v7452_v45 = vld [vmem:[%s7741_s29 + $0x50] ss:$8 sps:$4 sm:$0xff]  }
 0x36f   : > { %4981 = vmatpush1.bf16.msra.mxu1 %v7347_v3  ;;  %v7425_v3 = vld [vmem:[%s9349_s7 + $0x168] ss:$16 sps:$4 sm:$0xff]  }
 0x370   : > { %4982 = vmatprep.subr.bf16.mxu1 %v7352_v1  ;;  %v7453_v1 = vld [vmem:[%s7741_s29 + $0x64] ss:$8 sps:$4 sm:$0xff]  }
 0x372   : > { %4502 = vmatmul.mubr.bf16.gmra.mrb[44].mxu1 %v8823_v13  ;;  %v7361_v13 = vld [vmem:[%s9349_s7 + $0xa4] ss:$16 sps:$4 sm:$0xff]  }
 0x373   : > { %4983 = vmatpush1.bf16.msra.mxu1 %v7350_v44  ;;  %4511 = vmatprep.mubr.bf16.mxu1 %v7553_v33  ;;  %v7430_v44 = vld [vmem:[%s9349_s7 + $0x18c] ss:$16 sps:$4 sm:$0xff]  }
 0x374   : > { %4984 = vmatprep.subr.bf16.mxu1 %v7355_v17  ;;  %v7428_v17 = vld [vmem:[%s9349_s7 + $0x188] ss:$16 sps:$4 sm:$0xff]  }
 0x377   : > { %4985 = vmatpush1.bf16.msra.mxu1 %v7353_v50  ;;  %v7433_v50 = vld [vmem:[%s9349_s7 + $0x1ac] ss:$16 sps:$4 sm:$0xff]  }
 0x378   : > { %4986 = vmatprep.subr.bf16.mxu1 %v7358_v40  ;;  %v7454_v40 = vld [vmem:[%s7741_s29 + $0x60] ss:$8 sps:$4 sm:$0xff]  }
 0x37a   : > { %4512 = vmatmul.mubr.bf16.gmra.mrb[48].mxu1 %v8850_v5  ;;  %v7382_v5 = vld [vmem:[%s9349_s7 + $0x184] ss:$16 sps:$4 sm:$0xff]  }
 0x37b   : > { %4987 = vmatpush1.bf16.msra.mxu1 %v7356_v57  ;;  %4521 = vmatprep.mubr.bf16.mxu1 %v7553_v33  ;;  %v7431_v57 = vld [vmem:[%s9349_s7 + $0x1a8] ss:$16 sps:$4 sm:$0xff]  }
 0x37c   : > { %4988 = vmatprep.subr.bf16.mxu1 %v7361_v13  ;;  %v7455_v13 = vld [vmem:[%s7741_s29 + $0x74] ss:$8 sps:$4 sm:$0xff]  }
 0x37f   : > { %4989 = vmatpush1.bf16.msra.mxu1 %v7359_v37  ;;  %v7436_v37 = vld [vmem:[%s9349_s7 + $0x1cc] ss:$16 sps:$4 sm:$0xff]  }
 0x380   : > { %4990 = vmatprep.subr.bf16.mxu1 %v7364_v42  ;;  %v7434_v42 = vld [vmem:[%s9349_s7 + $0x1c8] ss:$16 sps:$4 sm:$0xff]  }
 0x382   : > { %4522 = vmatmul.mubr.bf16.gmra.mrb[52].mxu1 %v8845_v32  ;;  %v7379_v32 = vld [vmem:[%s9349_s7 + $0x164] ss:$16 sps:$4 sm:$0xff]  }
 0x383   : > { %4991 = vmatpush1.bf16.msra.mxu1 %v7362_v48  ;;  %4531 = vmatprep.mubr.bf16.mxu1 %v7553_v33  ;;  %v7439_v48 = vld [vmem:[%s9349_s7 + $0x1ec] ss:$16 sps:$4 sm:$0xff]  }
 0x384   : > { %4992 = vmatprep.subr.bf16.mxu1 %v7367_v30  ;;  %v7456_v30 = vld [vmem:[%s7741_s29 + $0x70] ss:$8 sps:$4 sm:$0xff]   ;;  %s9290_s29 = scalar_lea.sflag [#allocation4], %s337_s26 }
 0x387   : > { %4993 = vmatpush1.bf16.msra.mxu1 %v7365_v6  ;;  %v7437_v6 = vld [vmem:[%s9349_s7 + $0x1e8] ss:$16 sps:$4 sm:$0xff]  }
 0x388   : > { %4994 = vmatprep.subr.bf16.mxu1 %v7370_v18  ;;  %v4166_v18 = vlaneseq }
 0x38a   : > { %4532 = vmatmul.mubr.bf16.gmra.mrb[56].mxu1 %v8872_v52  ;;  %v7401_v52 = vld [vmem:[%s9349_s7 + $0x68] ss:$16 sps:$4 sm:$0xff]  }
 0x38b   : > { %4995 = vmatpush1.bf16.msra.mxu1 %v7368_v19  ;;  %4541 = vmatprep.mubr.bf16.mxu1 %v7553_v33  ;;  %v4167_v19 = vshrl.u32 %v4166_v18, 7 }
 0x38c   : > { %4996 = vmatprep.subr.bf16.mxu1 %v7373_v38 }
 0x38d   : > { %v4176_v38 = vsub.s32 2, %v4167_v19 }
 0x38f   : > { %4997 = vmatpush1.bf16.msra.mxu1 %v7371_v8  ;;  %v4164_v8 = vld [vmem:[%s9348_s6] sm:$0xf] }
 0x390   : > { %4998 = vmatprep.subr.bf16.mxu1 %v7376_v61  ;;  %v4636_v61 = vld [vmem:[%s9350_s8] sm:$0xf] }
 0x392   : > { %4542 = vmatmul.mubr.bf16.gmra.mrb[60].mxu1 %v8867_v62  ;;  %v7403_v62 = vld [vmem:[%s9349_s7 + $0x6c] ss:$16 sps:$4 sm:$0xff]  }
 0x393   : > { %4999 = vmatpush1.bf16.msra.mxu1 %v7374_v51  ;;  %4551 = vmatprep.mubr.bf16.mxu1 %v7553_v33  ;;  %v4180_v51 = vsub.s32 3, %v4167_v19 }
 0x394   : > { %5000 = vmatprep.subr.bf16.mxu1 %v7379_v32  ;;  %v4177_v32 = vrot.slane %v4164_v8, %v4176_v38 }
 0x397   : > { %5001 = vmatpush1.bf16.msra.mxu1 %v7377_v56  ;;  %v4649_v56 = vrot.slane %v4636_v61, %v4176_v38 }
 0x398   : > { %5002 = vmatprep.subr.bf16.mxu1 %v7382_v5  ;;  %v4181_v5 = vrot.slane %v4164_v8, %v4180_v51 }
 0x39a   : > { %4552 = vmatmul.mubr.bf16.gmra.mrb[64].mxu1 %v8894_v27  ;;  %v7419_v27 = vld [vmem:[%s9349_s7 + $0x128] ss:$16 sps:$4 sm:$0xff]  }
 0x39b   : > { %5003 = vmatpush1.bf16.msra.mxu1 %v7380_v0  ;;  %4561 = vmatprep.mubr.bf16.mxu1 %v7553_v33  ;;  %v7389_v33 = vld [vmem:[%s9349_s7 + $0x1e0] ss:$16 sps:$4 sm:$0xff]   ;;  %v4653_v0 = vrot.slane %v4636_v61, %v4180_v51 }
 0x39c   : > { %5004 = vmatprep.subr.bf16.mxu1 %v7385_v15  ;;  %v9169_v15 = vadd.f32 %v4649_v56, %v4177_v32 }
 0x39f   : > { %5005 = vmatpush1.bf16.msra.mxu1 %v7383_v26  ;;  %v9171_v26 = vadd.f32 %v4653_v0, %v4181_v5 }
 0x3a0   : > { %5006 = vmatprep.subr.bf16.mxu1 %v7388_v63  ;;  %v4168_v63 = vsub.s32 0, %v4167_v19 }
 0x3a2   : > { %4562 = vmatmul.mubr.bf16.gmra.mrb[68].mxu1 %v8889_v7  ;;  %v7421_v7 = vld [vmem:[%s9349_s7 + $0x12c] ss:$16 sps:$4 sm:$0xff]  }
 0x3a3   : > { %5007 = vmatpush1.bf16.msra.mxu1 %v7386_v47  ;;  %5010 = vmatprep.mubr.bf16.mxu1 %v9024_v35  ;;  %v4172_v47 = vsub.s32 1, %v4167_v19 }
 0x3a4   : > { %5008 = vmatprep.subr.bf16.mxu1 %v7391_v49  ;;  %v4169_v49 = vrot.slane %v4164_v8, %v4168_v63 }
 0x3a7   : > { %5009 = vmatpush1.bf16.msra.mxu1 %v7389_v33  ;;  %v4641_v33 = vrot.slane %v4636_v61, %v4168_v63 }
 0x3a8   : > { %5091 = vmatprep.subr.bf16.mxu1 %v7394_v46  ;;  %v4645_v46 = vrot.slane %v4636_v61, %v4172_v47 }
 0x3aa   : > { %5011 = vmatmul.mubr.bf16.vlgmr.msra.gmra.mrb[8].mxu1 %v9037_v21 }
 0x3ab   : > { %5092 = vmatpush1.bf16.msra.mxu1 %v7392_v41  ;;  %5020 = vmatprep.mubr.bf16.mxu1 %v9044_v14  ;;  %v9173_v41 = vadd.f32 %v4641_v33, %v4169_v49 }
 0x3ac   : > { %5093 = vmatprep.subr.bf16.mxu1 %v7397_v29 }
 0x3af   : > { %5094 = vmatpush1.bf16.msra.mxu1 %v7395_v28 }
 0x3b0   : > { %5095 = vmatprep.subr.bf16.mxu1 %v7400_v16 }
 0x3b2   : > { %5021 = vmatmul.mubr.bf16.gmra.mrb[12].mxu1 %v9057_v12 }
 0x3b3   : > { %5096 = vmatpush1.bf16.msra.mxu1 %v7398_v43  ;;  %5030 = vmatprep.mubr.bf16.mxu1 %v9064_v25 }
 0x3b4   : > { %5097 = vmatprep.subr.bf16.mxu1 %v7403_v62 }
 0x3b7   : > { %5098 = vmatpush1.bf16.msra.mxu1 %v7401_v52 }
 0x3b8   : > { %5099 = vmatprep.subr.bf16.mxu1 %v7406_v59 }
 0x3ba   : > { %5031 = vmatmul.mubr.bf16.gmra.mrb[16].mxu1 %v9077_v9 }
 0x3bb   : > { %5100 = vmatpush1.bf16.msra.mxu1 %v7404_v55  ;;  %5040 = vmatprep.mubr.bf16.mxu1 %v9084_v34 }
 0x3bc   : > { %5101 = vmatprep.subr.bf16.mxu1 %v7409_v53 }
 0x3bf   : > { %5102 = vmatpush1.bf16.msra.mxu1 %v7407_v24 }
 0x3c0   : > { %5103 = vmatprep.subr.bf16.mxu1 %v7412_v60 }
 0x3c2   : > { %5041 = vmatmul.mubr.bf16.gmra.mrb[20].mxu1 %v7448_v22 }
 0x3c3   : > { %5104 = vmatpush1.bf16.msra.mxu1 %v7410_v11  ;;  %5050 = vmatprep.mubr.bf16.mxu1 %v7449_v54 }
 0x3c4   : > { %5105 = vmatprep.subr.bf16.mxu1 %v7415_v36 }
 0x3c7   : > { %5106 = vmatpush1.bf16.msra.mxu1 %v7413_v23 }
 0x3c8   : > { %5107 = vmatprep.subr.bf16.mxu1 %v7418_v4 }
 0x3ca   : > { %5051 = vmatmul.mubr.bf16.gmra.mrb[24].mxu1 %v7450_v10 }
 0x3cb   : > { %5108 = vmatpush1.bf16.msra.mxu1 %v7416_v20  ;;  %5060 = vmatprep.mubr.bf16.mxu1 %v7451_v39 }
 0x3cc   : > { %5109 = vmatprep.subr.bf16.mxu1 %v7421_v7 }
 0x3cf   : > { %5110 = vmatpush1.bf16.msra.mxu1 %v7419_v27 }
 0x3d0   : > { %5111 = vmatprep.subr.bf16.mxu1 %v7424_v2 }
 0x3d2   : > { %5061 = vmatmul.mubr.bf16.gmra.mrb[28].mxu1 %v7452_v45 }
 0x3d3   : > { %5112 = vmatpush1.bf16.msra.mxu1 %v7422_v31  ;;  %5070 = vmatprep.mubr.bf16.mxu1 %v7453_v1 }
 0x3d4   : > { %5113 = vmatprep.subr.bf16.mxu1 %v7427_v58 }
 0x3d7   : > { %5114 = vmatpush1.bf16.msra.mxu1 %v7425_v3 }
 0x3d8   : > { %5115 = vmatprep.subr.bf16.mxu1 %v7430_v44 }
 0x3da   : > { %5071 = vmatmul.mubr.bf16.gmra.mrb[32].mxu1 %v7454_v40 }
 0x3db   : > { %5116 = vmatpush1.bf16.msra.mxu1 %v7428_v17  ;;  %5080 = vmatprep.mubr.bf16.mxu1 %v7455_v13 }
 0x3dc   : > { %5117 = vmatprep.subr.bf16.mxu1 %v7433_v50 }
 0x3df   : > { %5118 = vmatpush1.bf16.msra.mxu1 %v7431_v57 }
 0x3e0   : > { %5119 = vmatprep.subr.bf16.mxu1 %v7436_v37 }
 0x3e2   : > { %5081 = vmatmul.mubr.bf16.gmra.mrb[36].mxu1 %v7456_v30 }
 0x3e3   : > { %5120 = vmatpush1.bf16.msra.mxu1 %v7434_v42  ;;  %5123 = vmatprep.mubr.bf16.mxu1 %v9024_v35  ;;  %v4173_v35 = vrot.slane %v4164_v8, %v4172_v47 }
 0x3e4   : > { %5121 = vmatprep.subr.bf16.mxu1 %v7439_v48 }
 0x3e5   : > { %v9175_v29 = vadd.f32 %v4645_v46, %v4173_v35 }
 0x3e7   : > { %5122 = vmatpush1.bf16.msra.mxu1 %v7437_v6 }
 0x3ea   : > { %5124 = vmatmul.mubr.bf16.vlgmr.msra.gmra.mrb[40].mxu1 %v9037_v21 }
 0x3eb   : > { %5133 = vmatprep.mubr.bf16.mxu1 %v9044_v14 }
 0x3f2   : > { %5134 = vmatmul.mubr.bf16.gmra.mrb[44].mxu1 %v9057_v12 }
 0x3f3   : > { %5143 = vmatprep.mubr.bf16.mxu1 %v9064_v25 }
 0x3fa   : > { %5144 = vmatmul.mubr.bf16.gmra.mrb[48].mxu1 %v9077_v9 }
 0x3fb   : > { %5153 = vmatprep.mubr.bf16.mxu1 %v9084_v34 }
 0x402   : > { %5154 = vmatmul.mubr.bf16.gmra.mrb[52].mxu1 %v7448_v22 }
 0x403   : > { %5163 = vmatprep.mubr.bf16.mxu1 %v7449_v54 }
 0x40a   : > { %5164 = vmatmul.mubr.bf16.gmra.mrb[56].mxu1 %v7450_v10 }
 0x40b   : > { %5173 = vmatprep.mubr.bf16.mxu1 %v7451_v39 }
 0x412   : > { %5174 = vmatmul.mubr.bf16.gmra.mrb[60].mxu1 %v7452_v45 }
 0x413   : > { %5183 = vmatprep.mubr.bf16.mxu1 %v7453_v1 }
 0x41a   : > { %5184 = vmatmul.mubr.bf16.gmra.mrb[64].mxu1 %v7454_v40 }
 0x41b   : > { %5193 = vmatprep.mubr.bf16.mxu1 %v7455_v13 }
 0x422   : > { %5194 = vmatmul.mubr.bf16.gmra.mrb[68].mxu1 %v7456_v30 }
 0x47d   : > { %v5012_v21 = vpop.f32.mrb[8].mxu1 }
 0x47e   : > { %v6761_v28 = vadd.f32 %v9173_v41, %v5012_v21  ;;  %v5014_v14 = vpop.f32.mrb[9].mxu1 }
 0x47f   : > { %v6763_v16 = vadd.f32 %v9175_v29, %v5014_v14  ;;  %v5016_v43 = vpop.f32.mrb[10].mxu1 }
 0x480   : > { %v5268_v62 = vmax.f32 %v6761_v28, 0.0  ;;  %v6765_v12 = vadd.f32 %v9173_v41, %v5016_v43  ;;  %v5018_v52 = vpop.f32.mrb[11].mxu1 }
 0x481   : > { %v5269_v25 = vmax.f32 %v6763_v16, 0.0  ;;  %v6767_v59 = vadd.f32 %v9175_v29, %v5018_v52 }
 0x482   : > { %v5272_v55 = vmax.f32 %v6765_v12, 0.0 }
 0x483   : > { %v6187_v53 = vpack.c.bf16 %v5269_v25, %v5268_v62  ;;  %v5273_v9 = vmax.f32 %v6767_v59, 0.0 }
 0x485   : > { %5524 = vst [vmem:[%s9184_s14] sm:$0xff] %v6187_v53  ;;  %v6189_v24 = vpack.c.bf16 %v5273_v9, %v5272_v55  ;;  %v5022_v34 = vpop.f32.mrb[12].mxu1 }
 0x486   : > { %v6769_v60 = vadd.f32 %v9173_v41, %v5022_v34  ;;  %v5024_v11 = vpop.f32.mrb[13].mxu1 }
 0x487   : > { %5526 = vst [vmem:[%s9184_s14 + $0x10] sm:$0xff] %v6189_v24  ;;  %v6771_v36 = vadd.f32 %v9175_v29, %v5024_v11  ;;  %v5026_v22 = vpop.f32.mrb[14].mxu1 }
 0x488   : > { %v5276_v23 = vmax.f32 %v6769_v60, 0.0  ;;  %v6773_v54 = vadd.f32 %v9173_v41, %v5026_v22  ;;  %v5028_v4 = vpop.f32.mrb[15].mxu1 }
 0x489   : > { %v5277_v20 = vmax.f32 %v6771_v36, 0.0  ;;  %v6775_v7 = vadd.f32 %v9175_v29, %v5028_v4 }
 0x48a   : > { %v5280_v10 = vmax.f32 %v6773_v54, 0.0 }
 0x48b   : > { %v6191_v27 = vpack.c.bf16 %v5277_v20, %v5276_v23  ;;  %v5281_v39 = vmax.f32 %v6775_v7, 0.0 }
 0x48d   : > { %5528 = vst [vmem:[%s9184_s14 + $0x20] sm:$0xff] %v6191_v27  ;;  %v6193_v2 = vpack.c.bf16 %v5281_v39, %v5280_v10  ;;  %v5032_v31 = vpop.f32.mrb[16].mxu1 }
 0x48e   : > { %v6777_v58 = vadd.f32 %v9173_v41, %v5032_v31  ;;  %v5034_v45 = vpop.f32.mrb[17].mxu1 }
 0x48f   : > { %5530 = vst [vmem:[%s9184_s14 + $0x30] sm:$0xff] %v6193_v2  ;;  %v6779_v3 = vadd.f32 %v9175_v29, %v5034_v45  ;;  %v5036_v1 = vpop.f32.mrb[18].mxu1 }
 0x490   : > { %v5284_v44 = vmax.f32 %v6777_v58, 0.0  ;;  %v6781_v17 = vadd.f32 %v9173_v41, %v5036_v1  ;;  %v5038_v50 = vpop.f32.mrb[19].mxu1 }
 0x491   : > { %v5285_v40 = vmax.f32 %v6779_v3, 0.0  ;;  %v6783_v57 = vadd.f32 %v9175_v29, %v5038_v50 }
 0x492   : > { %v5288_v13 = vmax.f32 %v6781_v17, 0.0 }
 0x493   : > { %v6195_v37 = vpack.c.bf16 %v5285_v40, %v5284_v44  ;;  %v5289_v42 = vmax.f32 %v6783_v57, 0.0 }
 0x495   : > { %5532 = vst [vmem:[%s9184_s14 + $0x40] sm:$0xff] %v6195_v37  ;;  %v6197_v48 = vpack.c.bf16 %v5289_v42, %v5288_v13  ;;  %v5042_v30 = vpop.f32.mrb[20].mxu1 }
 0x496   : > { %v6785_v6 = vadd.f32 %v9173_v41, %v5042_v30  ;;  %v5044_v18 = vpop.f32.mrb[21].mxu1 }
 0x497   : > { %5534 = vst [vmem:[%s9184_s14 + $0x50] sm:$0xff] %v6197_v48  ;;  %v6787_v19 = vadd.f32 %v9175_v29, %v5044_v18  ;;  %v5046_v38 = vpop.f32.mrb[22].mxu1 }
 0x498   : > { %v5292_v8 = vmax.f32 %v6785_v6, 0.0  ;;  %v6789_v61 = vadd.f32 %v9173_v41, %v5046_v38  ;;  %v5048_v51 = vpop.f32.mrb[23].mxu1 }
 0x499   : > { %v5293_v32 = vmax.f32 %v6787_v19, 0.0  ;;  %v6791_v56 = vadd.f32 %v9175_v29, %v5048_v51 }
 0x49a   : > { %v5296_v5 = vmax.f32 %v6789_v61, 0.0 }
 0x49b   : > { %v6199_v0 = vpack.c.bf16 %v5293_v32, %v5292_v8  ;;  %v5297_v63 = vmax.f32 %v6791_v56, 0.0 }
 0x49d   : > { %5536 = vst [vmem:[%s9184_s14 + $0x60] sm:$0xff] %v6199_v0  ;;  %v6201_v47 = vpack.c.bf16 %v5297_v63, %v5296_v5  ;;  %v5052_v49 = vpop.f32.mrb[24].mxu1 }
 0x49e   : > { %v6793_v33 = vadd.f32 %v9173_v41, %v5052_v49  ;;  %v5054_v35 = vpop.f32.mrb[25].mxu1 }
 0x49f   : > { %5538 = vst [vmem:[%s9184_s14 + $0x70] sm:$0xff] %v6201_v47  ;;  %v6795_v46 = vadd.f32 %v9175_v29, %v5054_v35  ;;  %v5056_v21 = vpop.f32.mrb[26].mxu1 }
 0x4a0   : > { %v5300_v28 = vmax.f32 %v6793_v33, 0.0  ;;  %v6797_v14 = vadd.f32 %v9173_v41, %v5056_v21  ;;  %v5058_v16 = vpop.f32.mrb[27].mxu1 }
 0x4a1   : > { %v5301_v43 = vmax.f32 %v6795_v46, 0.0  ;;  %v6799_v62 = vadd.f32 %v9175_v29, %v5058_v16 }
 0x4a2   : > { %v5304_v12 = vmax.f32 %v6797_v14, 0.0 }
 0x4a3   : > { %v6203_v52 = vpack.c.bf16 %v5301_v43, %v5300_v28  ;;  %v5305_v25 = vmax.f32 %v6799_v62, 0.0 }
 0x4a5   : > { %5540 = vst [vmem:[%s9184_s14 + $0x80] sm:$0xff] %v6203_v52  ;;  %v6205_v59 = vpack.c.bf16 %v5305_v25, %v5304_v12  ;;  %v5062_v55 = vpop.f32.mrb[28].mxu1 }
 0x4a6   : > { %v6801_v53 = vadd.f32 %v9173_v41, %v5062_v55  ;;  %v5064_v9 = vpop.f32.mrb[29].mxu1 }
 0x4a7   : > { %5542 = vst [vmem:[%s9184_s14 + $0x90] sm:$0xff] %v6205_v59  ;;  %v6803_v24 = vadd.f32 %v9175_v29, %v5064_v9  ;;  %v5066_v34 = vpop.f32.mrb[30].mxu1 }
 0x4a8   : > { %v5308_v60 = vmax.f32 %v6801_v53, 0.0  ;;  %v6805_v11 = vadd.f32 %v9173_v41, %v5066_v34  ;;  %v5068_v36 = vpop.f32.mrb[31].mxu1 }
 0x4a9   : > { %v5309_v22 = vmax.f32 %v6803_v24, 0.0  ;;  %v6807_v23 = vadd.f32 %v9175_v29, %v5068_v36 }
 0x4aa   : > { %v5312_v54 = vmax.f32 %v6805_v11, 0.0 }
 0x4ab   : > { %v6207_v4 = vpack.c.bf16 %v5309_v22, %v5308_v60  ;;  %v5313_v20 = vmax.f32 %v6807_v23, 0.0 }
 0x4ad   : > { %5544 = vst [vmem:[%s9184_s14 + $0xa0] sm:$0xff] %v6207_v4  ;;  %v6209_v7 = vpack.c.bf16 %v5313_v20, %v5312_v54  ;;  %v5072_v10 = vpop.f32.mrb[32].mxu1 }
 0x4ae   : > { %v6809_v27 = vadd.f32 %v9173_v41, %v5072_v10  ;;  %v5074_v39 = vpop.f32.mrb[33].mxu1 }
 0x4af   : > { %5546 = vst [vmem:[%s9184_s14 + $0xb0] sm:$0xff] %v6209_v7  ;;  %v6811_v2 = vadd.f32 %v9175_v29, %v5074_v39  ;;  %v5076_v31 = vpop.f32.mrb[34].mxu1 }
 0x4b0   : > { %v5316_v58 = vmax.f32 %v6809_v27, 0.0  ;;  %v6813_v45 = vadd.f32 %v9173_v41, %v5076_v31  ;;  %v5078_v3 = vpop.f32.mrb[35].mxu1 }
 0x4b1   : > { %v5317_v1 = vmax.f32 %v6811_v2, 0.0  ;;  %v6815_v44 = vadd.f32 %v9175_v29, %v5078_v3 }
 0x4b2   : > { %v5320_v17 = vmax.f32 %v6813_v45, 0.0 }
 0x4b3   : > { %v6211_v50 = vpack.c.bf16 %v5317_v1, %v5316_v58  ;;  %v5321_v40 = vmax.f32 %v6815_v44, 0.0 }
 0x4b5   : > { %5548 = vst [vmem:[%s9184_s14 + $0xc0] sm:$0xff] %v6211_v50  ;;  %v6213_v57 = vpack.c.bf16 %v5321_v40, %v5320_v17  ;;  %v5082_v13 = vpop.f32.mrb[36].mxu1 }
 0x4b6   : > { %v6817_v37 = vadd.f32 %v9173_v41, %v5082_v13  ;;  %v5084_v42 = vpop.f32.mrb[37].mxu1 }
 0x4b7   : > { %5550 = vst [vmem:[%s9184_s14 + $0xd0] sm:$0xff] %v6213_v57  ;;  %v6819_v48 = vadd.f32 %v9175_v29, %v5084_v42  ;;  %v5086_v30 = vpop.f32.mrb[38].mxu1 }
 0x4b8   : > { %v5324_v6 = vmax.f32 %v6817_v37, 0.0  ;;  %v6821_v18 = vadd.f32 %v9173_v41, %v5086_v30  ;;  %v5088_v19 = vpop.f32.mrb[39].mxu1 }
 0x4b9   : > { %v5325_v38 = vmax.f32 %v6819_v48, 0.0  ;;  %v6823_v8 = vadd.f32 %v9175_v29, %v5088_v19 }
 0x4ba   : > { %v5328_v61 = vmax.f32 %v6821_v18, 0.0 }
 0x4bb   : > { %v6215_v51 = vpack.c.bf16 %v5325_v38, %v5324_v6  ;;  %v5329_v32 = vmax.f32 %v6823_v8, 0.0 }
 0x4bd   : > { %5552 = vst [vmem:[%s9184_s14 + $0xe0] sm:$0xff] %v6215_v51  ;;  %v6217_v56 = vpack.c.bf16 %v5329_v32, %v5328_v61  ;;  %v5125_v5 = vpop.f32.mrb[40].mxu1 }
 0x4be   : > { %v6825_v0 = vadd.f32 %v9169_v15, %v5125_v5  ;;  %v5127_v63 = vpop.f32.mrb[41].mxu1 }
 0x4bf   : > { %5554 = vst [vmem:[%s9184_s14 + $0xf0] sm:$0xff] %v6217_v56  ;;  %v6827_v47 = vadd.f32 %v9171_v26, %v5127_v63  ;;  %v5129_v49 = vpop.f32.mrb[42].mxu1 }
 0x4c0   : > { %v5270_v41 = vmax.f32 %v6825_v0, 0.0  ;;  %v6829_v33 = vadd.f32 %v9169_v15, %v5129_v49  ;;  %v5131_v35 = vpop.f32.mrb[43].mxu1 }
 0x4c1   : > { %v5271_v29 = vmax.f32 %v6827_v47, 0.0  ;;  %v6831_v46 = vadd.f32 %v9171_v26, %v5131_v35 }
 0x4c2   : > { %v5274_v21 = vmax.f32 %v6829_v33, 0.0 }
 0x4c3   : > { %v6188_v28 = vpack.c.bf16 %v5271_v29, %v5270_v41  ;;  %v5275_v14 = vmax.f32 %v6831_v46, 0.0 }
 0x4c5   : > { %5525 = vst [vmem:[%s9184_s14 + $0x8] sm:$0xff] %v6188_v28  ;;  %v6190_v16 = vpack.c.bf16 %v5275_v14, %v5274_v21  ;;  %v5135_v43 = vpop.f32.mrb[44].mxu1 }
 0x4c6   : > { %v6833_v62 = vadd.f32 %v9169_v15, %v5135_v43  ;;  %v5137_v12 = vpop.f32.mrb[45].mxu1 }
 0x4c7   : > { %5527 = vst [vmem:[%s9184_s14 + $0x18] sm:$0xff] %v6190_v16  ;;  %v6835_v52 = vadd.f32 %v9171_v26, %v5137_v12  ;;  %v5139_v25 = vpop.f32.mrb[46].mxu1 }
 0x4c8   : > { %v5278_v59 = vmax.f32 %v6833_v62, 0.0  ;;  %v6837_v55 = vadd.f32 %v9169_v15, %v5139_v25  ;;  %v5141_v53 = vpop.f32.mrb[47].mxu1 }
 0x4c9   : > { %v5279_v9 = vmax.f32 %v6835_v52, 0.0  ;;  %v6839_v24 = vadd.f32 %v9171_v26, %v5141_v53 }
 0x4ca   : > { %v5282_v34 = vmax.f32 %v6837_v55, 0.0 }
 0x4cb   : > { %v6192_v60 = vpack.c.bf16 %v5279_v9, %v5278_v59  ;;  %v5283_v11 = vmax.f32 %v6839_v24, 0.0 }
 0x4cd   : > { %5529 = vst [vmem:[%s9184_s14 + $0x28] sm:$0xff] %v6192_v60  ;;  %v6194_v36 = vpack.c.bf16 %v5283_v11, %v5282_v34  ;;  %v5145_v22 = vpop.f32.mrb[48].mxu1 }
 0x4ce   : > { %v6841_v23 = vadd.f32 %v9169_v15, %v5145_v22  ;;  %v5147_v54 = vpop.f32.mrb[49].mxu1 }
 0x4cf   : > { %5531 = vst [vmem:[%s9184_s14 + $0x38] sm:$0xff] %v6194_v36  ;;  %v6843_v4 = vadd.f32 %v9171_v26, %v5147_v54  ;;  %v5149_v20 = vpop.f32.mrb[50].mxu1 }
 0x4d0   : > { %v5286_v7 = vmax.f32 %v6841_v23, 0.0  ;;  %v6845_v10 = vadd.f32 %v9169_v15, %v5149_v20  ;;  %v5151_v27 = vpop.f32.mrb[51].mxu1 }
 0x4d1   : > { %v5287_v39 = vmax.f32 %v6843_v4, 0.0  ;;  %v6847_v2 = vadd.f32 %v9171_v26, %v5151_v27 }
 0x4d2   : > { %v5290_v31 = vmax.f32 %v6845_v10, 0.0 }
 0x4d3   : > { %v6196_v58 = vpack.c.bf16 %v5287_v39, %v5286_v7  ;;  %v5291_v45 = vmax.f32 %v6847_v2, 0.0 }
 0x4d5   : > { %5533 = vst [vmem:[%s9184_s14 + $0x48] sm:$0xff] %v6196_v58  ;;  %v6198_v3 = vpack.c.bf16 %v5291_v45, %v5290_v31  ;;  %v5155_v1 = vpop.f32.mrb[52].mxu1 }
 0x4d6   : > { %v6849_v44 = vadd.f32 %v9169_v15, %v5155_v1  ;;  %v5157_v17 = vpop.f32.mrb[53].mxu1 }
 0x4d7   : > { %5535 = vst [vmem:[%s9184_s14 + $0x58] sm:$0xff] %v6198_v3  ;;  %v6851_v50 = vadd.f32 %v9171_v26, %v5157_v17  ;;  %v5159_v40 = vpop.f32.mrb[54].mxu1 }
 0x4d8   : > { %v5294_v57 = vmax.f32 %v6849_v44, 0.0  ;;  %v6853_v13 = vadd.f32 %v9169_v15, %v5159_v40  ;;  %v5161_v37 = vpop.f32.mrb[55].mxu1 }
 0x4d9   : > { %v5295_v42 = vmax.f32 %v6851_v50, 0.0  ;;  %v6855_v48 = vadd.f32 %v9171_v26, %v5161_v37 }
 0x4da   : > { %v5298_v30 = vmax.f32 %v6853_v13, 0.0 }
 0x4db   : > { %v6200_v6 = vpack.c.bf16 %v5295_v42, %v5294_v57  ;;  %v5299_v18 = vmax.f32 %v6855_v48, 0.0 }
 0x4dd   : > { %5537 = vst [vmem:[%s9184_s14 + $0x68] sm:$0xff] %v6200_v6  ;;  %v6202_v19 = vpack.c.bf16 %v5299_v18, %v5298_v30  ;;  %v5165_v38 = vpop.f32.mrb[56].mxu1 }
 0x4de   : > { %v6857_v8 = vadd.f32 %v9169_v15, %v5165_v38  ;;  %v5167_v61 = vpop.f32.mrb[57].mxu1 }
 0x4df   : > { %5539 = vst [vmem:[%s9184_s14 + $0x78] sm:$0xff] %v6202_v19  ;;  %v6859_v51 = vadd.f32 %v9171_v26, %v5167_v61  ;;  %v5169_v32 = vpop.f32.mrb[58].mxu1 }
 0x4e0   : > { %v5302_v56 = vmax.f32 %v6857_v8, 0.0  ;;  %v6861_v5 = vadd.f32 %v9169_v15, %v5169_v32  ;;  %v5171_v0 = vpop.f32.mrb[59].mxu1 }
 0x4e1   : > { %v5303_v63 = vmax.f32 %v6859_v51, 0.0  ;;  %v6863_v47 = vadd.f32 %v9171_v26, %v5171_v0 }
 0x4e2   : > { %v5306_v49 = vmax.f32 %v6861_v5, 0.0 }
 0x4e3   : > { %v6204_v41 = vpack.c.bf16 %v5303_v63, %v5302_v56  ;;  %v5307_v33 = vmax.f32 %v6863_v47, 0.0 }
 0x4e5   : > { %5541 = vst [vmem:[%s9184_s14 + $0x88] sm:$0xff] %v6204_v41  ;;  %v6206_v35 = vpack.c.bf16 %v5307_v33, %v5306_v49  ;;  %v5175_v29 = vpop.f32.mrb[60].mxu1 }
 0x4e6   : > { %v6865_v46 = vadd.f32 %v9169_v15, %v5175_v29  ;;  %v5177_v21 = vpop.f32.mrb[61].mxu1 }
 0x4e7   : > { %5543 = vst [vmem:[%s9184_s14 + $0x98] sm:$0xff] %v6206_v35  ;;  %v6867_v28 = vadd.f32 %v9171_v26, %v5177_v21  ;;  %v5179_v14 = vpop.f32.mrb[62].mxu1 }
 0x4e8   : > { %v5310_v16 = vmax.f32 %v6865_v46, 0.0  ;;  %v6869_v43 = vadd.f32 %v9169_v15, %v5179_v14  ;;  %v5181_v62 = vpop.f32.mrb[63].mxu1 }
 0x4e9   : > { %v5311_v12 = vmax.f32 %v6867_v28, 0.0  ;;  %v6871_v52 = vadd.f32 %v9171_v26, %v5181_v62 }
 0x4ea   : > { %v5314_v25 = vmax.f32 %v6869_v43, 0.0 }
 0x4eb   : > { %v6208_v59 = vpack.c.bf16 %v5311_v12, %v5310_v16  ;;  %v5315_v55 = vmax.f32 %v6871_v52, 0.0 }
 0x4ed   : > { %5545 = vst [vmem:[%s9184_s14 + $0xa8] sm:$0xff] %v6208_v59  ;;  %v6210_v53 = vpack.c.bf16 %v5315_v55, %v5314_v25  ;;  %v5185_v9 = vpop.f32.mrb[64].mxu1 }
 0x4ee   : > { %v6873_v24 = vadd.f32 %v9169_v15, %v5185_v9  ;;  %v5187_v34 = vpop.f32.mrb[65].mxu1 }
 0x4ef   : > { %5547 = vst [vmem:[%s9184_s14 + $0xb8] sm:$0xff] %v6210_v53  ;;  %v6875_v60 = vadd.f32 %v9171_v26, %v5187_v34  ;;  %v5189_v11 = vpop.f32.mrb[66].mxu1 }
 0x4f0   : > { %v5318_v36 = vmax.f32 %v6873_v24, 0.0  ;;  %v6877_v22 = vadd.f32 %v9169_v15, %v5189_v11  ;;  %v5191_v23 = vpop.f32.mrb[67].mxu1 }
 0x4f1   : > { %v5319_v54 = vmax.f32 %v6875_v60, 0.0  ;;  %v6879_v4 = vadd.f32 %v9171_v26, %v5191_v23 }
 0x4f2   : > { %v5322_v20 = vmax.f32 %v6877_v22, 0.0 }
 0x4f3   : > { %v6212_v7 = vpack.c.bf16 %v5319_v54, %v5318_v36  ;;  %v5323_v10 = vmax.f32 %v6879_v4, 0.0 }
 0x4f5   : > { %5549 = vst [vmem:[%s9184_s14 + $0xc8] sm:$0xff] %v6212_v7  ;;  %v6214_v27 = vpack.c.bf16 %v5323_v10, %v5322_v20  ;;  %v5195_v39 = vpop.f32.mrb[68].mxu1 }
 0x4f6   : > { %v6881_v2 = vadd.f32 %v9169_v15, %v5195_v39  ;;  %v5197_v31 = vpop.f32.mrb[69].mxu1 }
 0x4f7   : > { %5551 = vst [vmem:[%s9184_s14 + $0xd8] sm:$0xff] %v6214_v27  ;;  %v6883_v58 = vadd.f32 %v9171_v26, %v5197_v31  ;;  %v5199_v45 = vpop.f32.mrb[70].mxu1 }
 0x4f8   : > { %v5326_v3 = vmax.f32 %v6881_v2, 0.0  ;;  %v6885_v1 = vadd.f32 %v9169_v15, %v5199_v45  ;;  %v5201_v44 = vpop.f32.mrb[71].mxu1 }
 0x4f9   : > { %v5327_v17 = vmax.f32 %v6883_v58, 0.0  ;;  %v6887_v50 = vadd.f32 %v9171_v26, %v5201_v44 }
 0x4fa   : > { %v5330_v40 = vmax.f32 %v6885_v1, 0.0 }
 0x4fb   : > { %v6216_v57 = vpack.c.bf16 %v5327_v17, %v5326_v3  ;;  %v5331_v13 = vmax.f32 %v6887_v50, 0.0 }
 0x4fd   : > { %5553 = vst [vmem:[%s9184_s14 + $0xe8] sm:$0xff] %v6216_v57  ;;  %v6218_v37 = vpack.c.bf16 %v5331_v13, %v5330_v40 }
 0x4ff   : > { %5555 = vst [vmem:[%s9184_s14 + $0xf8] sm:$0xff] %v6218_v37 }
 0x500   : > { %7470 = shalt.err (!%p7467_p11)
}
 0x501   : > { %s7471_s26 = scalar_lea.hbm %s9285_s21, 4096  ;;  %s7475_s17 = scalar_lea.hbm %s9351_s9, 16384 }
 0x502   : > { %p7472_p12 = scmp.ne.s32.totalorder %s9285_s21, %s7471_s26  ;;  %p7476_p1 = scmp.lt.u32.totalorder %s9285_s21, %s9351_s9 }
 0x503   : > { %p7477_p2 = scmp.lt.u32.totalorder %s7475_s17, %s7471_s26  ;;  %p7479_p5 = scmp.lt.u32.totalorder %s7471_s26, %s9285_s21 }
 0x504   : > { %p7473_p13 = pnand %p7472_p12, %p7658_p3 }
 0x505   : > { %p7478_p4 = por %p7477_p2, %p7476_p1 }
 0x506   : > { %p7474_p0 = pneg %p7473_p13 }
 0x507   : > { %p7480_p6 = por %p7479_p5, %p7478_p4 }
 0x509   : > { %p7481_p7 = pnand %p7480_p6, %p7474_p0 }
 0x50b   : > { %7484 = shalt.err (!%p7481_p7)
}
 0x50c   : > { %s7555_s20 = smov 256   ;;  %s7556_s28 = smov 16  }
 0x50d   : > { %7080 = dma.vmem_to_hbm [thread:$0]  (%p7658_p3), %s9279_s12, 4096, %s9285_s21, %s9290_s29, %s7555_s20, %s7555_s20, %s7556_s28  }
 0x50e PF: > { %p7086_p9 = scmp.ge.s32.totalorder %s7551_s16, 2  ;;  %s5588_s24 = sand.u32 1, %s7523_s30  }
 0x50f   : > { %s5589_s25 = scalar_lea.sflag [#allocation4], %s5588_s24 }
 0x510   : > { %p7083_p10 = pnand %p7086_p9, %p7667_p8 }
 0x512   : > { %7518 = dma.done.wait (!%p7083_p10), %s5589_s25, 4096  }
 0x513   : > { %7520 = vsyncadd (!%p7083_p10), %s5589_s25, 4294963200  ;;  %s22_s16 = sadd.s32 1, %s7551_s16   ;;  %s9378_s12 = sld [smem:[#allocation6_spill]] }
 0x514   : > { %p19_p11 = scmp.ge.s32.totalorder %s22_s16, 6   ;;  %s9379_s13 = sld [smem:[#allocation7_spill]] }
 0x515   : > { %s9380_s14 = sld [smem:[#allocation8_spill]]  ;;  %s9381_s15 = sld [smem:[#allocation9_spill]] }
 0x516   : > { %s9382_s30 = smov %s7527_s10  ;;  %s9383_s10 = smov %s7531_s11 }
 0x517   : > { %s9384_s11 = smov %s7676_s27  ;;  %21 = sbr.rel (!%p19_p11) target bundleno = 7 (0x7), region = 105 }
 0x51e   :  { %5594 = vsyncpa [#allocation4], 1 }
 0x51f   :  { %5596 = vsyncpa [#allocation4 + $0x1], 1 }

</bundles_post_ra>
